<compile_context>
chip_gen: v6e
topology: v6e:2x2x1
jax: 0.10.0
libtpu: 0.0.40
codegen_flags: <defaults>
</compile_context>

<pallas_src>
import functools

import jax
import jax.numpy as jnp
import numpy as np
from jax.experimental import pallas as pl
from jax.experimental.pallas import tpu as pltpu


def char_rnn_kernel(tok_ref, h0_ref, emb_ref, wih_ref, whh_ref, b_ref,
                    wdec_ref, bdec_ref, logits_ref, hout_ref,
                    pre_a, pre_b, *, T, B_pad, V):
    """Fused embedding + multi-layer tanh RNN + decoder, all resident in VMEM.

    tok_ref:    (T*B_pad, 1) int32 token ids, time-major rows (row t*B_pad + b)
    h0_ref:     (L, B_pad, H) initial hidden state per layer (zero-padded rows)
    emb_ref:    (V, H)        embedding table
    wih_ref:    (L, H, H)     input->hidden weights, stored (in, out)
    whh_ref:    (L, H, H)     hidden->hidden weights, stored (in, out)
    b_ref:      (L, 1, H)     combined bias  b_ih + b_hh
    wdec_ref:   (H, O_pad)    decoder weight, zero-padded to 128 lanes
    bdec_ref:   (1, O_pad)    decoder bias, zero-padded
    logits_ref: (T, B_pad, O_pad) time-major logits (full-tile stores)
    hout_ref:   (L, B_pad, H) final hidden state per layer
    pre_a/pre_b:(T*B_pad, H)  ping-pong pre-activation scratch slabs
    """
    L, _, H = h0_ref.shape

    # --- Fused embedding lookup: one-hot matmul (single MXU push). ---
    tok = tok_ref[...]                                           # (T*B_pad, 1)
    iota_v = jax.lax.broadcasted_iota(jnp.int32, (T * B_pad, V), 1)
    onehot = (iota_v == tok).astype(jnp.float32)                 # (T*B_pad, V)
    x0 = jnp.dot(onehot, emb_ref[...],
                 preferred_element_type=jnp.float32)             # (T*B_pad, H)

    # --- Layer-0 pre-activations: one hoisted (T*B_pad,H)x(H,H) push,
    #     entirely off the serial critical path. ---
    pre_a[...] = (jnp.dot(x0, wih_ref[0], preferred_element_type=jnp.float32)
                  + b_ref[0])

    pres = (pre_a, pre_b)
    for l in range(L):                         # small static L -> unrolled
        cur = pres[l % 2]                      # this layer's pre slab
        nxt = pres[(l + 1) % 2]                # next layer's pre slab
        w_hh = whh_ref[l]                      # (H, H)
        h = h0_ref[l]                          # (B_pad, H)
        last = (l == L - 1)
        if not last:
            w_ih_nxt = wih_ref[l + 1]
            bias_nxt = b_ref[l + 1]

        for t in range(T):                     # static unroll; serial part is
            # just one (B_pad,H)x(H,H) matmul + tanh per step.
            h = jnp.tanh(cur[pl.ds(t * B_pad, B_pad), :]
                         + jnp.dot(h, w_hh,
                                   preferred_element_type=jnp.float32))
            if last:
                # Decoder push straight off the recurrence: lane-dense
                # (B_pad, O_pad) full-tile store.
                logits_ref[t] = (jnp.dot(h, wdec_ref[...],
                                         preferred_element_type=jnp.float32)
                                 + bdec_ref[...])
            else:
                # Feed next layer's pre immediately: independent of the serial
                # chain (fills dead MXU cycles), no inter-layer concatenate.
                nxt[pl.ds(t * B_pad, B_pad), :] = (
                    jnp.dot(h, w_ih_nxt, preferred_element_type=jnp.float32)
                    + bias_nxt)

        hout_ref[l] = h                        # full (B_pad, H) tile store


def char_rnn_forward(tokens, hidden, params):
    """tokens: (B, T) int32, hidden: (L, B, H) f32 -> (logits (B*T, O), hidden)."""
    emb = params["embedding"]                          # (V, H)
    B, T = tokens.shape
    L, _, H = hidden.shape
    V = emb.shape[0]
    O = params["w_dec"].shape[1]
    O_pad = ((O + 127) // 128) * 128                   # lane-dense output width
    B_pad = max(8, ((B + 7) // 8) * 8)                 # full-sublane batch rows

    # Time-major token column (row t*B_pad + b); padded rows use token 0.
    tok_tm = jnp.transpose(tokens)                     # (T, B)
    tok_tm = jnp.pad(tok_tm, ((0, 0), (0, B_pad - B)))
    tok_col = tok_tm.reshape(T * B_pad, 1).astype(jnp.int32)

    h0 = jnp.pad(hidden, ((0, 0), (0, B_pad - B), (0, 0)))        # (L, B_pad, H)
    bias = params["b_ih"] + params["b_hh"]                        # (L, 1, H)
    w_dec = jnp.pad(params["w_dec"], ((0, 0), (0, O_pad - O)))    # (H, O_pad)
    b_dec = jnp.pad(params["b_dec"], ((0, 0), (0, O_pad - O)))    # (1, O_pad)

    # Advisory cost estimate for XLA scheduling around the custom call.
    rows = T * B_pad
    flops = 2 * rows * (V * H + 2 * L * H * H + H * O_pad)
    transcendentals = L * rows * H
    bytes_accessed = 4 * (rows * 1 + L * B_pad * H + V * H + 2 * L * H * H
                          + L * H + H * O_pad + O_pad
                          + rows * O_pad + L * B_pad * H)

    vmem = pl.BlockSpec(memory_space=pltpu.MemorySpace.VMEM)
    logits_tm, h_out = pl.pallas_call(
        functools.partial(char_rnn_kernel, T=T, B_pad=B_pad, V=V),
        out_shape=(
            jax.ShapeDtypeStruct((T, B_pad, O_pad), jnp.float32),
            jax.ShapeDtypeStruct((L, B_pad, H), jnp.float32),
        ),
        in_specs=[vmem] * 8,
        out_specs=(vmem, vmem),
        scratch_shapes=[pltpu.VMEM((T * B_pad, H), jnp.float32),
                        pltpu.VMEM((T * B_pad, H), jnp.float32)],
        cost_estimate=pl.CostEstimate(flops=flops,
                                      transcendentals=transcendentals,
                                      bytes_accessed=bytes_accessed),
    )(tok_col, h0, emb, params["w_ih"], params["w_hh"], bias, w_dec, b_dec)

    # Drop padding and reorder to PyTorch's batch-major rows (b*T + t):
    # an ~8 KB XLA transpose, essentially free.
    logits = (logits_tm[:, :B, :O].transpose(1, 0, 2).reshape(B * T, O))
    return logits, h_out[:, :B, :]


def init_params(key, vocab, hidden, output, n_layers):
    """Deterministic uniform(-1/sqrt(H), 1/sqrt(H)) init (like PyTorch RNN)."""
    bound = 1.0 / np.sqrt(hidden)
    ks = jax.random.split(key, 8)
    u = lambda k, shape: jax.random.uniform(k, shape, jnp.float32, -bound, bound)
    return {
        "embedding": jax.random.normal(ks[0], (vocab, hidden), jnp.float32),
        "w_ih": u(ks[1], (n_layers, hidden, hidden)),   # stored (in, out)
        "w_hh": u(ks[2], (n_layers, hidden, hidden)),   # stored (in, out)
        "b_ih": u(ks[3], (n_layers, 1, hidden)),
        "b_hh": u(ks[4], (n_layers, 1, hidden)),
        "w_dec": u(ks[5], (hidden, output)),            # stored (in, out)
        "b_dec": u(ks[6], (1, output)),
    }


def ref_forward(tokens, hidden, params):
    """Pure-JAX reference matching torch semantics (sanity check)."""
    enc = jnp.take(params["embedding"], tokens, axis=0)   # (B, T, H)
    B, T, H = enc.shape
    L = hidden.shape[0]
    x = enc
    h_last = []
    for l in range(L):
        h = hidden[l]
        outs = []
        for t in range(T):
            h = jnp.tanh(x[:, t] @ params["w_ih"][l] + params["b_ih"][l, 0]
                         + h @ params["w_hh"][l] + params["b_hh"][l, 0])
            outs.append(h)
        x = jnp.stack(outs, axis=1)
        h_last.append(h)
    logits = x.reshape(-1, H) @ params["w_dec"] + params["b_dec"][0]
    return logits, jnp.stack(h_last)


if __name__ == "__main__":
    VOCAB, HIDDEN, OUTPUT, N_LAYERS = 16, 32, 16, 5
    B, T = 2, 8

    key = jax.random.PRNGKey(0)
    k_par, k_tok, k_hid = jax.random.split(key, 3)

    params = init_params(k_par, VOCAB, HIDDEN, OUTPUT, N_LAYERS)
    tokens = jax.random.randint(k_tok, (B, T), 0, VOCAB, dtype=jnp.int32)
    hidden = jax.random.normal(k_hid, (N_LAYERS, B, HIDDEN), jnp.float32)

    fwd = jax.jit(functools.partial(char_rnn_forward, params=params))
    logits, h_out = fwd(tokens, hidden)
    jax.block_until_ready((logits, h_out))

    ref_logits, ref_h = ref_forward(tokens, hidden, params)
    np.testing.assert_allclose(np.asarray(logits), np.asarray(ref_logits),
                               rtol=1e-4, atol=1e-4)
    np.testing.assert_allclose(np.asarray(h_out), np.asarray(ref_h),
                               rtol=1e-4, atol=1e-4)

    assert logits.shape == (B * T, OUTPUT)
    assert h_out.shape == (N_LAYERS, B, HIDDEN)
    print("KERNEL_OK")
</pallas_src>

<mosaic_0001>
module attributes {stable_mosaic.version = 11 : i64} {
  func.func @char_rnn_kernel(%arg0: memref<64x1xi32, #tpu.memory_space<vmem>>, %arg1: memref<5x8x32xf32, #tpu.memory_space<vmem>>, %arg2: memref<16x32xf32, #tpu.memory_space<vmem>>, %arg3: memref<5x32x32xf32, #tpu.memory_space<vmem>>, %arg4: memref<5x32x32xf32, #tpu.memory_space<vmem>>, %arg5: memref<5x1x32xf32, #tpu.memory_space<vmem>>, %arg6: memref<32x128xf32, #tpu.memory_space<vmem>>, %arg7: memref<1x128xf32, #tpu.memory_space<vmem>>, %arg8: memref<8x8x128xf32, #tpu.memory_space<vmem>>, %arg9: memref<5x8x32xf32, #tpu.memory_space<vmem>>, %arg10: memref<64x32xf32, #tpu.memory_space<vmem>>, %arg11: memref<64x32xf32, #tpu.memory_space<vmem>>) attributes {dimension_semantics = [], scalar_prefetch = 0 : i64, scratch_operands = 2 : i64, tpu.core_type = #tpu.core_type<tc>} {
    %c0 = arith.constant 0 : index
    %c0_0 = arith.constant 0 : index
    %0 = vector.load %arg0[%c0, %c0_0] : memref<64x1xi32, #tpu.memory_space<vmem>>, vector<64x1xi32>
    %1 = tpu.iota {dimensions = array<i32: 1>} : vector<64x16xi32>
    %2 = vector.broadcast %0 : vector<64x1xi32> to vector<64x16xi32>
    %3 = arith.cmpi eq, %1, %2 : vector<64x16xi32>
    %4 = arith.extui %3 : vector<64x16xi1> to vector<64x16xi32>
    %5 = arith.sitofp %4 : vector<64x16xi32> to vector<64x16xf32>
    %c0_1 = arith.constant 0 : index
    %c0_2 = arith.constant 0 : index
    %6 = vector.load %arg2[%c0_1, %c0_2] : memref<16x32xf32, #tpu.memory_space<vmem>>, vector<16x32xf32>
    %cst = arith.constant dense<0.000000e+00> : vector<64x32xf32>
    %7 = tpu.matmul %5, %6, %cst {dimension_numbers = #tpu.dot_dimension_numbers<[1], [0], [0], [1], [0, 0, 1, 1], [], []>} : vector<64x16xf32>, vector<16x32xf32>, vector<64x32xf32> -> vector<64x32xf32>
    %c0_3 = arith.constant 0 : index
    %c0_4 = arith.constant 0 : index
    %c0_5 = arith.constant 0 : index
    %8 = vector.load %arg3[%c0_3, %c0_4, %c0_5] : memref<5x32x32xf32, #tpu.memory_space<vmem>>, vector<1x32x32xf32>
    %9 = vector.shape_cast %8 : vector<1x32x32xf32> to vector<32x32xf32>
    %cst_6 = arith.constant dense<0.000000e+00> : vector<64x32xf32>
    %10 = tpu.matmul %7, %9, %cst_6 {dimension_numbers = #tpu.dot_dimension_numbers<[1], [0], [0], [1], [0, 0, 1, 1], [], []>} : vector<64x32xf32>, vector<32x32xf32>, vector<64x32xf32> -> vector<64x32xf32>
    %c0_7 = arith.constant 0 : index
    %c0_8 = arith.constant 0 : index
    %c0_9 = arith.constant 0 : index
    %11 = vector.load %arg5[%c0_7, %c0_8, %c0_9] : memref<5x1x32xf32, #tpu.memory_space<vmem>>, vector<1x1x32xf32>
    %12 = vector.shape_cast %11 : vector<1x1x32xf32> to vector<1x32xf32>
    %13 = vector.broadcast %12 : vector<1x32xf32> to vector<64x32xf32>
    %14 = arith.addf %10, %13 : vector<64x32xf32>
    %c0_10 = arith.constant 0 : index
    %c0_11 = arith.constant 0 : index
    %15 = vector.load %arg10[%c0_10, %c0_11] : memref<64x32xf32, #tpu.memory_space<vmem>>, vector<64x32xf32>
    tpu.vector_store %arg10[%c0_10, %c0_11], %14 {strides = array<i32>} : memref<64x32xf32, #tpu.memory_space<vmem>>, vector<64x32xf32>,
    %c0_12 = arith.constant 0 : index
    %c0_13 = arith.constant 0 : index
    %c0_14 = arith.constant 0 : index
    %16 = vector.load %arg4[%c0_12, %c0_13, %c0_14] : memref<5x32x32xf32, #tpu.memory_space<vmem>>, vector<1x32x32xf32>
    %17 = vector.shape_cast %16 : vector<1x32x32xf32> to vector<32x32xf32>
    %c0_15 = arith.constant 0 : index
    %c0_16 = arith.constant 0 : index
    %c0_17 = arith.constant 0 : index
    %18 = vector.load %arg1[%c0_15, %c0_16, %c0_17] : memref<5x8x32xf32, #tpu.memory_space<vmem>>, vector<1x8x32xf32>
    %19 = vector.shape_cast %18 : vector<1x8x32xf32> to vector<8x32xf32>
    %c1 = arith.constant 1 : index
    %c0_18 = arith.constant 0 : index
    %c0_19 = arith.constant 0 : index
    %20 = vector.load %arg3[%c1, %c0_18, %c0_19] : memref<5x32x32xf32, #tpu.memory_space<vmem>>, vector<1x32x32xf32>
    %21 = vector.shape_cast %20 : vector<1x32x32xf32> to vector<32x32xf32>
    %c1_20 = arith.constant 1 : index
    %c0_21 = arith.constant 0 : index
    %c0_22 = arith.constant 0 : index
    %22 = vector.load %arg5[%c1_20, %c0_21, %c0_22] : memref<5x1x32xf32, #tpu.memory_space<vmem>>, vector<1x1x32xf32>
    %23 = vector.shape_cast %22 : vector<1x1x32xf32> to vector<1x32xf32>
    %c0_23 = arith.constant 0 : index
    %c0_24 = arith.constant 0 : index
    %24 = vector.load %arg10[%c0_23, %c0_24] : memref<64x32xf32, #tpu.memory_space<vmem>>, vector<8x32xf32>
    %cst_25 = arith.constant dense<0.000000e+00> : vector<8x32xf32>
    %25 = tpu.matmul %19, %17, %cst_25 {dimension_numbers = #tpu.dot_dimension_numbers<[1], [0], [0], [1], [0, 0, 1, 1], [], []>} : vector<8x32xf32>, vector<32x32xf32>, vector<8x32xf32> -> vector<8x32xf32>
    %26 = arith.addf %24, %25 : vector<8x32xf32>
    %27 = math.tanh %26 : vector<8x32xf32>
    %cst_26 = arith.constant dense<0.000000e+00> : vector<8x32xf32>
    %28 = tpu.matmul %27, %21, %cst_26 {dimension_numbers = #tpu.dot_dimension_numbers<[1], [0], [0], [1], [0, 0, 1, 1], [], []>} : vector<8x32xf32>, vector<32x32xf32>, vector<8x32xf32> -> vector<8x32xf32>
    %29 = vector.broadcast %23 : vector<1x32xf32> to vector<8x32xf32>
    %30 = arith.addf %28, %29 : vector<8x32xf32>
    %c0_27 = arith.constant 0 : index
    %c0_28 = arith.constant 0 : index
    %31 = vector.load %arg11[%c0_27, %c0_28] : memref<64x32xf32, #tpu.memory_space<vmem>>, vector<8x32xf32>
    tpu.vector_store %arg11[%c0_27, %c0_28], %30 {strides = array<i32>} : memref<64x32xf32, #tpu.memory_space<vmem>>, vector<8x32xf32>,
    %c8 = arith.constant 8 : index
    %c0_29 = arith.constant 0 : index
    %32 = vector.load %arg10[%c8, %c0_29] : memref<64x32xf32, #tpu.memory_space<vmem>>, vector<8x32xf32>
    %cst_30 = arith.constant dense<0.000000e+00> : vector<8x32xf32>
    %33 = tpu.matmul %27, %17, %cst_30 {dimension_numbers = #tpu.dot_dimension_numbers<[1], [0], [0], [1], [0, 0, 1, 1], [], []>} : vector<8x32xf32>, vector<32x32xf32>, vector<8x32xf32> -> vector<8x32xf32>
    %34 = arith.addf %32, %33 : vector<8x32xf32>
    %35 = math.tanh %34 : vector<8x32xf32>
    %cst_31 = arith.constant dense<0.000000e+00> : vector<8x32xf32>
    %36 = tpu.matmul %35, %21, %cst_31 {dimension_numbers = #tpu.dot_dimension_numbers<[1], [0], [0], [1], [0, 0, 1, 1], [], []>} : vector<8x32xf32>, vector<32x32xf32>, vector<8x32xf32> -> vector<8x32xf32>
    %37 = vector.broadcast %23 : vector<1x32xf32> to vector<8x32xf32>
    %38 = arith.addf %36, %37 : vector<8x32xf32>
    %c8_32 = arith.constant 8 : index
    %c0_33 = arith.constant 0 : index
    %39 = vector.load %arg11[%c8_32, %c0_33] : memref<64x32xf32, #tpu.memory_space<vmem>>, vector<8x32xf32>
    tpu.vector_store %arg11[%c8_32, %c0_33], %38 {strides = array<i32>} : memref<64x32xf32, #tpu.memory_space<vmem>>, vector<8x32xf32>,
    %c16 = arith.constant 16 : index
    %c0_34 = arith.constant 0 : index
    %40 = vector.load %arg10[%c16, %c0_34] : memref<64x32xf32, #tpu.memory_space<vmem>>, vector<8x32xf32>
    %cst_35 = arith.constant dense<0.000000e+00> : vector<8x32xf32>
    %41 = tpu.matmul %35, %17, %cst_35 {dimension_numbers = #tpu.dot_dimension_numbers<[1], [0], [0], [1], [0, 0, 1, 1], [], []>} : vector<8x32xf32>, vector<32x32xf32>, vector<8x32xf32> -> vector<8x32xf32>
    %42 = arith.addf %40, %41 : vector<8x32xf32>
    %43 = math.tanh %42 : vector<8x32xf32>
    %cst_36 = arith.constant dense<0.000000e+00> : vector<8x32xf32>
    %44 = tpu.matmul %43, %21, %cst_36 {dimension_numbers = #tpu.dot_dimension_numbers<[1], [0], [0], [1], [0, 0, 1, 1], [], []>} : vector<8x32xf32>, vector<32x32xf32>, vector<8x32xf32> -> vector<8x32xf32>
    %45 = vector.broadcast %23 : vector<1x32xf32> to vector<8x32xf32>
    %46 = arith.addf %44, %45 : vector<8x32xf32>
    %c16_37 = arith.constant 16 : index
    %c0_38 = arith.constant 0 : index
    %47 = vector.load %arg11[%c16_37, %c0_38] : memref<64x32xf32, #tpu.memory_space<vmem>>, vector<8x32xf32>
    tpu.vector_store %arg11[%c16_37, %c0_38], %46 {strides = array<i32>} : memref<64x32xf32, #tpu.memory_space<vmem>>, vector<8x32xf32>,
    %c24 = arith.constant 24 : index
    %c0_39 = arith.constant 0 : index
    %48 = vector.load %arg10[%c24, %c0_39] : memref<64x32xf32, #tpu.memory_space<vmem>>, vector<8x32xf32>
    %cst_40 = arith.constant dense<0.000000e+00> : vector<8x32xf32>
    %49 = tpu.matmul %43, %17, %cst_40 {dimension_numbers = #tpu.dot_dimension_numbers<[1], [0], [0], [1], [0, 0, 1, 1], [], []>} : vector<8x32xf32>, vector<32x32xf32>, vector<8x32xf32> -> vector<8x32xf32>
    %50 = arith.addf %48, %49 : vector<8x32xf32>
    %51 = math.tanh %50 : vector<8x32xf32>
    %cst_41 = arith.constant dense<0.000000e+00> : vector<8x32xf32>
    %52 = tpu.matmul %51, %21, %cst_41 {dimension_numbers = #tpu.dot_dimension_numbers<[1], [0], [0], [1], [0, 0, 1, 1], [], []>} : vector<8x32xf32>, vector<32x32xf32>, vector<8x32xf32> -> vector<8x32xf32>
    %53 = vector.broadcast %23 : vector<1x32xf32> to vector<8x32xf32>
    %54 = arith.addf %52, %53 : vector<8x32xf32>
    %c24_42 = arith.constant 24 : index
    %c0_43 = arith.constant 0 : index
    %55 = vector.load %arg11[%c24_42, %c0_43] : memref<64x32xf32, #tpu.memory_space<vmem>>, vector<8x32xf32>
    tpu.vector_store %arg11[%c24_42, %c0_43], %54 {strides = array<i32>} : memref<64x32xf32, #tpu.memory_space<vmem>>, vector<8x32xf32>,
    %c32 = arith.constant 32 : index
    %c0_44 = arith.constant 0 : index
    %56 = vector.load %arg10[%c32, %c0_44] : memref<64x32xf32, #tpu.memory_space<vmem>>, vector<8x32xf32>
    %cst_45 = arith.constant dense<0.000000e+00> : vector<8x32xf32>
    %57 = tpu.matmul %51, %17, %cst_45 {dimension_numbers = #tpu.dot_dimension_numbers<[1], [0], [0], [1], [0, 0, 1, 1], [], []>} : vector<8x32xf32>, vector<32x32xf32>, vector<8x32xf32> -> vector<8x32xf32>
    %58 = arith.addf %56, %57 : vector<8x32xf32>
    %59 = math.tanh %58 : vector<8x32xf32>
    %cst_46 = arith.constant dense<0.000000e+00> : vector<8x32xf32>
    %60 = tpu.matmul %59, %21, %cst_46 {dimension_numbers = #tpu.dot_dimension_numbers<[1], [0], [0], [1], [0, 0, 1, 1], [], []>} : vector<8x32xf32>, vector<32x32xf32>, vector<8x32xf32> -> vector<8x32xf32>
    %61 = vector.broadcast %23 : vector<1x32xf32> to vector<8x32xf32>
    %62 = arith.addf %60, %61 : vector<8x32xf32>
    %c32_47 = arith.constant 32 : index
    %c0_48 = arith.constant 0 : index
    %63 = vector.load %arg11[%c32_47, %c0_48] : memref<64x32xf32, #tpu.memory_space<vmem>>, vector<8x32xf32>
    tpu.vector_store %arg11[%c32_47, %c0_48], %62 {strides = array<i32>} : memref<64x32xf32, #tpu.memory_space<vmem>>, vector<8x32xf32>,
    %c40 = arith.constant 40 : index
    %c0_49 = arith.constant 0 : index
    %64 = vector.load %arg10[%c40, %c0_49] : memref<64x32xf32, #tpu.memory_space<vmem>>, vector<8x32xf32>
    %cst_50 = arith.constant dense<0.000000e+00> : vector<8x32xf32>
    %65 = tpu.matmul %59, %17, %cst_50 {dimension_numbers = #tpu.dot_dimension_numbers<[1], [0], [0], [1], [0, 0, 1, 1], [], []>} : vector<8x32xf32>, vector<32x32xf32>, vector<8x32xf32> -> vector<8x32xf32>
    %66 = arith.addf %64, %65 : vector<8x32xf32>
    %67 = math.tanh %66 : vector<8x32xf32>
    %cst_51 = arith.constant dense<0.000000e+00> : vector<8x32xf32>
    %68 = tpu.matmul %67, %21, %cst_51 {dimension_numbers = #tpu.dot_dimension_numbers<[1], [0], [0], [1], [0, 0, 1, 1], [], []>} : vector<8x32xf32>, vector<32x32xf32>, vector<8x32xf32> -> vector<8x32xf32>
    %69 = vector.broadcast %23 : vector<1x32xf32> to vector<8x32xf32>
    %70 = arith.addf %68, %69 : vector<8x32xf32>
    %c40_52 = arith.constant 40 : index
    %c0_53 = arith.constant 0 : index
    %71 = vector.load %arg11[%c40_52, %c0_53] : memref<64x32xf32, #tpu.memory_space<vmem>>, vector<8x32xf32>
    tpu.vector_store %arg11[%c40_52, %c0_53], %70 {strides = array<i32>} : memref<64x32xf32, #tpu.memory_space<vmem>>, vector<8x32xf32>,
    %c48 = arith.constant 48 : index
    %c0_54 = arith.constant 0 : index
    %72 = vector.load %arg10[%c48, %c0_54] : memref<64x32xf32, #tpu.memory_space<vmem>>, vector<8x32xf32>
    %cst_55 = arith.constant dense<0.000000e+00> : vector<8x32xf32>
    %73 = tpu.matmul %67, %17, %cst_55 {dimension_numbers = #tpu.dot_dimension_numbers<[1], [0], [0], [1], [0, 0, 1, 1], [], []>} : vector<8x32xf32>, vector<32x32xf32>, vector<8x32xf32> -> vector<8x32xf32>
    %74 = arith.addf %72, %73 : vector<8x32xf32>
    %75 = math.tanh %74 : vector<8x32xf32>
    %cst_56 = arith.constant dense<0.000000e+00> : vector<8x32xf32>
    %76 = tpu.matmul %75, %21, %cst_56 {dimension_numbers = #tpu.dot_dimension_numbers<[1], [0], [0], [1], [0, 0, 1, 1], [], []>} : vector<8x32xf32>, vector<32x32xf32>, vector<8x32xf32> -> vector<8x32xf32>
    %77 = vector.broadcast %23 : vector<1x32xf32> to vector<8x32xf32>
    %78 = arith.addf %76, %77 : vector<8x32xf32>
    %c48_57 = arith.constant 48 : index
    %c0_58 = arith.constant 0 : index
    %79 = vector.load %arg11[%c48_57, %c0_58] : memref<64x32xf32, #tpu.memory_space<vmem>>, vector<8x32xf32>
    tpu.vector_store %arg11[%c48_57, %c0_58], %78 {strides = array<i32>} : memref<64x32xf32, #tpu.memory_space<vmem>>, vector<8x32xf32>,
    %c56 = arith.constant 56 : index
    %c0_59 = arith.constant 0 : index
    %80 = vector.load %arg10[%c56, %c0_59] : memref<64x32xf32, #tpu.memory_space<vmem>>, vector<8x32xf32>
    %cst_60 = arith.constant dense<0.000000e+00> : vector<8x32xf32>
    %81 = tpu.matmul %75, %17, %cst_60 {dimension_numbers = #tpu.dot_dimension_numbers<[1], [0], [0], [1], [0, 0, 1, 1], [], []>} : vector<8x32xf32>, vector<32x32xf32>, vector<8x32xf32> -> vector<8x32xf32>
    %82 = arith.addf %80, %81 : vector<8x32xf32>
    %83 = math.tanh %82 : vector<8x32xf32>
    %cst_61 = arith.constant dense<0.000000e+00> : vector<8x32xf32>
    %84 = tpu.matmul %83, %21, %cst_61 {dimension_numbers = #tpu.dot_dimension_numbers<[1], [0], [0], [1], [0, 0, 1, 1], [], []>} : vector<8x32xf32>, vector<32x32xf32>, vector<8x32xf32> -> vector<8x32xf32>
    %85 = vector.broadcast %23 : vector<1x32xf32> to vector<8x32xf32>
    %86 = arith.addf %84, %85 : vector<8x32xf32>
    %c56_62 = arith.constant 56 : index
    %c0_63 = arith.constant 0 : index
    %87 = vector.load %arg11[%c56_62, %c0_63] : memref<64x32xf32, #tpu.memory_space<vmem>>, vector<8x32xf32>
    tpu.vector_store %arg11[%c56_62, %c0_63], %86 {strides = array<i32>} : memref<64x32xf32, #tpu.memory_space<vmem>>, vector<8x32xf32>,
    %c0_64 = arith.constant 0 : index
    %c0_65 = arith.constant 0 : index
    %c0_66 = arith.constant 0 : index
    %88 = vector.load %arg9[%c0_64, %c0_65, %c0_66] : memref<5x8x32xf32, #tpu.memory_space<vmem>>, vector<1x8x32xf32>
    %89 = vector.shape_cast %88 : vector<1x8x32xf32> to vector<8x32xf32>
    %90 = vector.shape_cast %83 : vector<8x32xf32> to vector<1x8x32xf32>
    tpu.vector_store %arg9[%c0_64, %c0_65, %c0_66], %90 {strides = array<i32>} : memref<5x8x32xf32, #tpu.memory_space<vmem>>, vector<1x8x32xf32>,
    %c1_67 = arith.constant 1 : index
    %c0_68 = arith.constant 0 : index
    %c0_69 = arith.constant 0 : index
    %91 = vector.load %arg4[%c1_67, %c0_68, %c0_69] : memref<5x32x32xf32, #tpu.memory_space<vmem>>, vector<1x32x32xf32>
    %92 = vector.shape_cast %91 : vector<1x32x32xf32> to vector<32x32xf32>
    %c1_70 = arith.constant 1 : index
    %c0_71 = arith.constant 0 : index
    %c0_72 = arith.constant 0 : index
    %93 = vector.load %arg1[%c1_70, %c0_71, %c0_72] : memref<5x8x32xf32, #tpu.memory_space<vmem>>, vector<1x8x32xf32>
    %94 = vector.shape_cast %93 : vector<1x8x32xf32> to vector<8x32xf32>
    %c2 = arith.constant 2 : index
    %c0_73 = arith.constant 0 : index
    %c0_74 = arith.constant 0 : index
    %95 = vector.load %arg3[%c2, %c0_73, %c0_74] : memref<5x32x32xf32, #tpu.memory_space<vmem>>, vector<1x32x32xf32>
    %96 = vector.shape_cast %95 : vector<1x32x32xf32> to vector<32x32xf32>
    %c2_75 = arith.constant 2 : index
    %c0_76 = arith.constant 0 : index
    %c0_77 = arith.constant 0 : index
    %97 = vector.load %arg5[%c2_75, %c0_76, %c0_77] : memref<5x1x32xf32, #tpu.memory_space<vmem>>, vector<1x1x32xf32>
    %98 = vector.shape_cast %97 : vector<1x1x32xf32> to vector<1x32xf32>
    %c0_78 = arith.constant 0 : index
    %c0_79 = arith.constant 0 : index
    %99 = vector.load %arg11[%c0_78, %c0_79] : memref<64x32xf32, #tpu.memory_space<vmem>>, vector<8x32xf32>
    %cst_80 = arith.constant dense<0.000000e+00> : vector<8x32xf32>
    %100 = tpu.matmul %94, %92, %cst_80 {dimension_numbers = #tpu.dot_dimension_numbers<[1], [0], [0], [1], [0, 0, 1, 1], [], []>} : vector<8x32xf32>, vector<32x32xf32>, vector<8x32xf32> -> vector<8x32xf32>
    %101 = arith.addf %99, %100 : vector<8x32xf32>
    %102 = math.tanh %101 : vector<8x32xf32>
    %cst_81 = arith.constant dense<0.000000e+00> : vector<8x32xf32>
    %103 = tpu.matmul %102, %96, %cst_81 {dimension_numbers = #tpu.dot_dimension_numbers<[1], [0], [0], [1], [0, 0, 1, 1], [], []>} : vector<8x32xf32>, vector<32x32xf32>, vector<8x32xf32> -> vector<8x32xf32>
    %104 = vector.broadcast %98 : vector<1x32xf32> to vector<8x32xf32>
    %105 = arith.addf %103, %104 : vector<8x32xf32>
    %c0_82 = arith.constant 0 : index
    %c0_83 = arith.constant 0 : index
    %106 = vector.load %arg10[%c0_82, %c0_83] : memref<64x32xf32, #tpu.memory_space<vmem>>, vector<8x32xf32>
    tpu.vector_store %arg10[%c0_82, %c0_83], %105 {strides = array<i32>} : memref<64x32xf32, #tpu.memory_space<vmem>>, vector<8x32xf32>,
    %c8_84 = arith.constant 8 : index
    %c0_85 = arith.constant 0 : index
    %107 = vector.load %arg11[%c8_84, %c0_85] : memref<64x32xf32, #tpu.memory_space<vmem>>, vector<8x32xf32>
    %cst_86 = arith.constant dense<0.000000e+00> : vector<8x32xf32>
    %108 = tpu.matmul %102, %92, %cst_86 {dimension_numbers = #tpu.dot_dimension_numbers<[1], [0], [0], [1], [0, 0, 1, 1], [], []>} : vector<8x32xf32>, vector<32x32xf32>, vector<8x32xf32> -> vector<8x32xf32>
    %109 = arith.addf %107, %108 : vector<8x32xf32>
    %110 = math.tanh %109 : vector<8x32xf32>
    %cst_87 = arith.constant dense<0.000000e+00> : vector<8x32xf32>
    %111 = tpu.matmul %110, %96, %cst_87 {dimension_numbers = #tpu.dot_dimension_numbers<[1], [0], [0], [1], [0, 0, 1, 1], [], []>} : vector<8x32xf32>, vector<32x32xf32>, vector<8x32xf32> -> vector<8x32xf32>
    %112 = vector.broadcast %98 : vector<1x32xf32> to vector<8x32xf32>
    %113 = arith.addf %111, %112 : vector<8x32xf32>
    %c8_88 = arith.constant 8 : index
    %c0_89 = arith.constant 0 : index
    %114 = vector.load %arg10[%c8_88, %c0_89] : memref<64x32xf32, #tpu.memory_space<vmem>>, vector<8x32xf32>
    tpu.vector_store %arg10[%c8_88, %c0_89], %113 {strides = array<i32>} : memref<64x32xf32, #tpu.memory_space<vmem>>, vector<8x32xf32>,
    %c16_90 = arith.constant 16 : index
    %c0_91 = arith.constant 0 : index
    %115 = vector.load %arg11[%c16_90, %c0_91] : memref<64x32xf32, #tpu.memory_space<vmem>>, vector<8x32xf32>
    %cst_92 = arith.constant dense<0.000000e+00> : vector<8x32xf32>
    %116 = tpu.matmul %110, %92, %cst_92 {dimension_numbers = #tpu.dot_dimension_numbers<[1], [0], [0], [1], [0, 0, 1, 1], [], []>} : vector<8x32xf32>, vector<32x32xf32>, vector<8x32xf32> -> vector<8x32xf32>
    %117 = arith.addf %115, %116 : vector<8x32xf32>
    %118 = math.tanh %117 : vector<8x32xf32>
    %cst_93 = arith.constant dense<0.000000e+00> : vector<8x32xf32>
    %119 = tpu.matmul %118, %96, %cst_93 {dimension_numbers = #tpu.dot_dimension_numbers<[1], [0], [0], [1], [0, 0, 1, 1], [], []>} : vector<8x32xf32>, vector<32x32xf32>, vector<8x32xf32> -> vector<8x32xf32>
    %120 = vector.broadcast %98 : vector<1x32xf32> to vector<8x32xf32>
    %121 = arith.addf %119, %120 : vector<8x32xf32>
    %c16_94 = arith.constant 16 : index
    %c0_95 = arith.constant 0 : index
    %122 = vector.load %arg10[%c16_94, %c0_95] : memref<64x32xf32, #tpu.memory_space<vmem>>, vector<8x32xf32>
    tpu.vector_store %arg10[%c16_94, %c0_95], %121 {strides = array<i32>} : memref<64x32xf32, #tpu.memory_space<vmem>>, vector<8x32xf32>,
    %c24_96 = arith.constant 24 : index
    %c0_97 = arith.constant 0 : index
    %123 = vector.load %arg11[%c24_96, %c0_97] : memref<64x32xf32, #tpu.memory_space<vmem>>, vector<8x32xf32>
    %cst_98 = arith.constant dense<0.000000e+00> : vector<8x32xf32>
    %124 = tpu.matmul %118, %92, %cst_98 {dimension_numbers = #tpu.dot_dimension_numbers<[1], [0], [0], [1], [0, 0, 1, 1], [], []>} : vector<8x32xf32>, vector<32x32xf32>, vector<8x32xf32> -> vector<8x32xf32>
    %125 = arith.addf %123, %124 : vector<8x32xf32>
    %126 = math.tanh %125 : vector<8x32xf32>
    %cst_99 = arith.constant dense<0.000000e+00> : vector<8x32xf32>
    %127 = tpu.matmul %126, %96, %cst_99 {dimension_numbers = #tpu.dot_dimension_numbers<[1], [0], [0], [1], [0, 0, 1, 1], [], []>} : vector<8x32xf32>, vector<32x32xf32>, vector<8x32xf32> -> vector<8x32xf32>
    %128 = vector.broadcast %98 : vector<1x32xf32> to vector<8x32xf32>
    %129 = arith.addf %127, %128 : vector<8x32xf32>
    %c24_100 = arith.constant 24 : index
    %c0_101 = arith.constant 0 : index
    %130 = vector.load %arg10[%c24_100, %c0_101] : memref<64x32xf32, #tpu.memory_space<vmem>>, vector<8x32xf32>
    tpu.vector_store %arg10[%c24_100, %c0_101], %129 {strides = array<i32>} : memref<64x32xf32, #tpu.memory_space<vmem>>, vector<8x32xf32>,
    %c32_102 = arith.constant 32 : index
    %c0_103 = arith.constant 0 : index
    %131 = vector.load %arg11[%c32_102, %c0_103] : memref<64x32xf32, #tpu.memory_space<vmem>>, vector<8x32xf32>
    %cst_104 = arith.constant dense<0.000000e+00> : vector<8x32xf32>
    %132 = tpu.matmul %126, %92, %cst_104 {dimension_numbers = #tpu.dot_dimension_numbers<[1], [0], [0], [1], [0, 0, 1, 1], [], []>} : vector<8x32xf32>, vector<32x32xf32>, vector<8x32xf32> -> vector<8x32xf32>
    %133 = arith.addf %131, %132 : vector<8x32xf32>
    %134 = math.tanh %133 : vector<8x32xf32>
    %cst_105 = arith.constant dense<0.000000e+00> : vector<8x32xf32>
    %135 = tpu.matmul %134, %96, %cst_105 {dimension_numbers = #tpu.dot_dimension_numbers<[1], [0], [0], [1], [0, 0, 1, 1], [], []>} : vector<8x32xf32>, vector<32x32xf32>, vector<8x32xf32> -> vector<8x32xf32>
    %136 = vector.broadcast %98 : vector<1x32xf32> to vector<8x32xf32>
    %137 = arith.addf %135, %136 : vector<8x32xf32>
    %c32_106 = arith.constant 32 : index
    %c0_107 = arith.constant 0 : index
    %138 = vector.load %arg10[%c32_106, %c0_107] : memref<64x32xf32, #tpu.memory_space<vmem>>, vector<8x32xf32>
    tpu.vector_store %arg10[%c32_106, %c0_107], %137 {strides = array<i32>} : memref<64x32xf32, #tpu.memory_space<vmem>>, vector<8x32xf32>,
    %c40_108 = arith.constant 40 : index
    %c0_109 = arith.constant 0 : index
    %139 = vector.load %arg11[%c40_108, %c0_109] : memref<64x32xf32, #tpu.memory_space<vmem>>, vector<8x32xf32>
    %cst_110 = arith.constant dense<0.000000e+00> : vector<8x32xf32>
    %140 = tpu.matmul %134, %92, %cst_110 {dimension_numbers = #tpu.dot_dimension_numbers<[1], [0], [0], [1], [0, 0, 1, 1], [], []>} : vector<8x32xf32>, vector<32x32xf32>, vector<8x32xf32> -> vector<8x32xf32>
    %141 = arith.addf %139, %140 : vector<8x32xf32>
    %142 = math.tanh %141 : vector<8x32xf32>
    %cst_111 = arith.constant dense<0.000000e+00> : vector<8x32xf32>
    %143 = tpu.matmul %142, %96, %cst_111 {dimension_numbers = #tpu.dot_dimension_numbers<[1], [0], [0], [1], [0, 0, 1, 1], [], []>} : vector<8x32xf32>, vector<32x32xf32>, vector<8x32xf32> -> vector<8x32xf32>
    %144 = vector.broadcast %98 : vector<1x32xf32> to vector<8x32xf32>
    %145 = arith.addf %143, %144 : vector<8x32xf32>
    %c40_112 = arith.constant 40 : index
    %c0_113 = arith.constant 0 : index
    %146 = vector.load %arg10[%c40_112, %c0_113] : memref<64x32xf32, #tpu.memory_space<vmem>>, vector<8x32xf32>
    tpu.vector_store %arg10[%c40_112, %c0_113], %145 {strides = array<i32>} : memref<64x32xf32, #tpu.memory_space<vmem>>, vector<8x32xf32>,
    %c48_114 = arith.constant 48 : index
    %c0_115 = arith.constant 0 : index
    %147 = vector.load %arg11[%c48_114, %c0_115] : memref<64x32xf32, #tpu.memory_space<vmem>>, vector<8x32xf32>
    %cst_116 = arith.constant dense<0.000000e+00> : vector<8x32xf32>
    %148 = tpu.matmul %142, %92, %cst_116 {dimension_numbers = #tpu.dot_dimension_numbers<[1], [0], [0], [1], [0, 0, 1, 1], [], []>} : vector<8x32xf32>, vector<32x32xf32>, vector<8x32xf32> -> vector<8x32xf32>
    %149 = arith.addf %147, %148 : vector<8x32xf32>
    %150 = math.tanh %149 : vector<8x32xf32>
    %cst_117 = arith.constant dense<0.000000e+00> : vector<8x32xf32>
    %151 = tpu.matmul %150, %96, %cst_117 {dimension_numbers = #tpu.dot_dimension_numbers<[1], [0], [0], [1], [0, 0, 1, 1], [], []>} : vector<8x32xf32>, vector<32x32xf32>, vector<8x32xf32> -> vector<8x32xf32>
    %152 = vector.broadcast %98 : vector<1x32xf32> to vector<8x32xf32>
    %153 = arith.addf %151, %152 : vector<8x32xf32>
    %c48_118 = arith.constant 48 : index
    %c0_119 = arith.constant 0 : index
    %154 = vector.load %arg10[%c48_118, %c0_119] : memref<64x32xf32, #tpu.memory_space<vmem>>, vector<8x32xf32>
    tpu.vector_store %arg10[%c48_118, %c0_119], %153 {strides = array<i32>} : memref<64x32xf32, #tpu.memory_space<vmem>>, vector<8x32xf32>,
    %c56_120 = arith.constant 56 : index
    %c0_121 = arith.constant 0 : index
    %155 = vector.load %arg11[%c56_120, %c0_121] : memref<64x32xf32, #tpu.memory_space<vmem>>, vector<8x32xf32>
    %cst_122 = arith.constant dense<0.000000e+00> : vector<8x32xf32>
    %156 = tpu.matmul %150, %92, %cst_122 {dimension_numbers = #tpu.dot_dimension_numbers<[1], [0], [0], [1], [0, 0, 1, 1], [], []>} : vector<8x32xf32>, vector<32x32xf32>, vector<8x32xf32> -> vector<8x32xf32>
    %157 = arith.addf %155, %156 : vector<8x32xf32>
    %158 = math.tanh %157 : vector<8x32xf32>
    %cst_123 = arith.constant dense<0.000000e+00> : vector<8x32xf32>
    %159 = tpu.matmul %158, %96, %cst_123 {dimension_numbers = #tpu.dot_dimension_numbers<[1], [0], [0], [1], [0, 0, 1, 1], [], []>} : vector<8x32xf32>, vector<32x32xf32>, vector<8x32xf32> -> vector<8x32xf32>
    %160 = vector.broadcast %98 : vector<1x32xf32> to vector<8x32xf32>
    %161 = arith.addf %159, %160 : vector<8x32xf32>
    %c56_124 = arith.constant 56 : index
    %c0_125 = arith.constant 0 : index
    %162 = vector.load %arg10[%c56_124, %c0_125] : memref<64x32xf32, #tpu.memory_space<vmem>>, vector<8x32xf32>
    tpu.vector_store %arg10[%c56_124, %c0_125], %161 {strides = array<i32>} : memref<64x32xf32, #tpu.memory_space<vmem>>, vector<8x32xf32>,
    %c1_126 = arith.constant 1 : index
    %c0_127 = arith.constant 0 : index
    %c0_128 = arith.constant 0 : index
    %163 = vector.load %arg9[%c1_126, %c0_127, %c0_128] : memref<5x8x32xf32, #tpu.memory_space<vmem>>, vector<1x8x32xf32>
    %164 = vector.shape_cast %163 : vector<1x8x32xf32> to vector<8x32xf32>
    %165 = vector.shape_cast %158 : vector<8x32xf32> to vector<1x8x32xf32>
    tpu.vector_store %arg9[%c1_126, %c0_127, %c0_128], %165 {strides = array<i32>} : memref<5x8x32xf32, #tpu.memory_space<vmem>>, vector<1x8x32xf32>,
    %c2_129 = arith.constant 2 : index
    %c0_130 = arith.constant 0 : index
    %c0_131 = arith.constant 0 : index
    %166 = vector.load %arg4[%c2_129, %c0_130, %c0_131] : memref<5x32x32xf32, #tpu.memory_space<vmem>>, vector<1x32x32xf32>
    %167 = vector.shape_cast %166 : vector<1x32x32xf32> to vector<32x32xf32>
    %c2_132 = arith.constant 2 : index
    %c0_133 = arith.constant 0 : index
    %c0_134 = arith.constant 0 : index
    %168 = vector.load %arg1[%c2_132, %c0_133, %c0_134] : memref<5x8x32xf32, #tpu.memory_space<vmem>>, vector<1x8x32xf32>
    %169 = vector.shape_cast %168 : vector<1x8x32xf32> to vector<8x32xf32>
    %c3 = arith.constant 3 : index
    %c0_135 = arith.constant 0 : index
    %c0_136 = arith.constant 0 : index
    %170 = vector.load %arg3[%c3, %c0_135, %c0_136] : memref<5x32x32xf32, #tpu.memory_space<vmem>>, vector<1x32x32xf32>
    %171 = vector.shape_cast %170 : vector<1x32x32xf32> to vector<32x32xf32>
    %c3_137 = arith.constant 3 : index
    %c0_138 = arith.constant 0 : index
    %c0_139 = arith.constant 0 : index
    %172 = vector.load %arg5[%c3_137, %c0_138, %c0_139] : memref<5x1x32xf32, #tpu.memory_space<vmem>>, vector<1x1x32xf32>
    %173 = vector.shape_cast %172 : vector<1x1x32xf32> to vector<1x32xf32>
    %c0_140 = arith.constant 0 : index
    %c0_141 = arith.constant 0 : index
    %174 = vector.load %arg10[%c0_140, %c0_141] : memref<64x32xf32, #tpu.memory_space<vmem>>, vector<8x32xf32>
    %cst_142 = arith.constant dense<0.000000e+00> : vector<8x32xf32>
    %175 = tpu.matmul %169, %167, %cst_142 {dimension_numbers = #tpu.dot_dimension_numbers<[1], [0], [0], [1], [0, 0, 1, 1], [], []>} : vector<8x32xf32>, vector<32x32xf32>, vector<8x32xf32> -> vector<8x32xf32>
    %176 = arith.addf %174, %175 : vector<8x32xf32>
    %177 = math.tanh %176 : vector<8x32xf32>
    %cst_143 = arith.constant dense<0.000000e+00> : vector<8x32xf32>
    %178 = tpu.matmul %177, %171, %cst_143 {dimension_numbers = #tpu.dot_dimension_numbers<[1], [0], [0], [1], [0, 0, 1, 1], [], []>} : vector<8x32xf32>, vector<32x32xf32>, vector<8x32xf32> -> vector<8x32xf32>
    %179 = vector.broadcast %173 : vector<1x32xf32> to vector<8x32xf32>
    %180 = arith.addf %178, %179 : vector<8x32xf32>
    %c0_144 = arith.constant 0 : index
    %c0_145 = arith.constant 0 : index
    %181 = vector.load %arg11[%c0_144, %c0_145] : memref<64x32xf32, #tpu.memory_space<vmem>>, vector<8x32xf32>
    tpu.vector_store %arg11[%c0_144, %c0_145], %180 {strides = array<i32>} : memref<64x32xf32, #tpu.memory_space<vmem>>, vector<8x32xf32>,
    %c8_146 = arith.constant 8 : index
    %c0_147 = arith.constant 0 : index
    %182 = vector.load %arg10[%c8_146, %c0_147] : memref<64x32xf32, #tpu.memory_space<vmem>>, vector<8x32xf32>
    %cst_148 = arith.constant dense<0.000000e+00> : vector<8x32xf32>
    %183 = tpu.matmul %177, %167, %cst_148 {dimension_numbers = #tpu.dot_dimension_numbers<[1], [0], [0], [1], [0, 0, 1, 1], [], []>} : vector<8x32xf32>, vector<32x32xf32>, vector<8x32xf32> -> vector<8x32xf32>
    %184 = arith.addf %182, %183 : vector<8x32xf32>
    %185 = math.tanh %184 : vector<8x32xf32>
    %cst_149 = arith.constant dense<0.000000e+00> : vector<8x32xf32>
    %186 = tpu.matmul %185, %171, %cst_149 {dimension_numbers = #tpu.dot_dimension_numbers<[1], [0], [0], [1], [0, 0, 1, 1], [], []>} : vector<8x32xf32>, vector<32x32xf32>, vector<8x32xf32> -> vector<8x32xf32>
    %187 = vector.broadcast %173 : vector<1x32xf32> to vector<8x32xf32>
    %188 = arith.addf %186, %187 : vector<8x32xf32>
    %c8_150 = arith.constant 8 : index
    %c0_151 = arith.constant 0 : index
    %189 = vector.load %arg11[%c8_150, %c0_151] : memref<64x32xf32, #tpu.memory_space<vmem>>, vector<8x32xf32>
    tpu.vector_store %arg11[%c8_150, %c0_151], %188 {strides = array<i32>} : memref<64x32xf32, #tpu.memory_space<vmem>>, vector<8x32xf32>,
    %c16_152 = arith.constant 16 : index
    %c0_153 = arith.constant 0 : index
    %190 = vector.load %arg10[%c16_152, %c0_153] : memref<64x32xf32, #tpu.memory_space<vmem>>, vector<8x32xf32>
    %cst_154 = arith.constant dense<0.000000e+00> : vector<8x32xf32>
    %191 = tpu.matmul %185, %167, %cst_154 {dimension_numbers = #tpu.dot_dimension_numbers<[1], [0], [0], [1], [0, 0, 1, 1], [], []>} : vector<8x32xf32>, vector<32x32xf32>, vector<8x32xf32> -> vector<8x32xf32>
    %192 = arith.addf %190, %191 : vector<8x32xf32>
    %193 = math.tanh %192 : vector<8x32xf32>
    %cst_155 = arith.constant dense<0.000000e+00> : vector<8x32xf32>
    %194 = tpu.matmul %193, %171, %cst_155 {dimension_numbers = #tpu.dot_dimension_numbers<[1], [0], [0], [1], [0, 0, 1, 1], [], []>} : vector<8x32xf32>, vector<32x32xf32>, vector<8x32xf32> -> vector<8x32xf32>
    %195 = vector.broadcast %173 : vector<1x32xf32> to vector<8x32xf32>
    %196 = arith.addf %194, %195 : vector<8x32xf32>
    %c16_156 = arith.constant 16 : index
    %c0_157 = arith.constant 0 : index
    %197 = vector.load %arg11[%c16_156, %c0_157] : memref<64x32xf32, #tpu.memory_space<vmem>>, vector<8x32xf32>
    tpu.vector_store %arg11[%c16_156, %c0_157], %196 {strides = array<i32>} : memref<64x32xf32, #tpu.memory_space<vmem>>, vector<8x32xf32>,
    %c24_158 = arith.constant 24 : index
    %c0_159 = arith.constant 0 : index
    %198 = vector.load %arg10[%c24_158, %c0_159] : memref<64x32xf32, #tpu.memory_space<vmem>>, vector<8x32xf32>
    %cst_160 = arith.constant dense<0.000000e+00> : vector<8x32xf32>
    %199 = tpu.matmul %193, %167, %cst_160 {dimension_numbers = #tpu.dot_dimension_numbers<[1], [0], [0], [1], [0, 0, 1, 1], [], []>} : vector<8x32xf32>, vector<32x32xf32>, vector<8x32xf32> -> vector<8x32xf32>
    %200 = arith.addf %198, %199 : vector<8x32xf32>
    %201 = math.tanh %200 : vector<8x32xf32>
    %cst_161 = arith.constant dense<0.000000e+00> : vector<8x32xf32>
    %202 = tpu.matmul %201, %171, %cst_161 {dimension_numbers = #tpu.dot_dimension_numbers<[1], [0], [0], [1], [0, 0, 1, 1], [], []>} : vector<8x32xf32>, vector<32x32xf32>, vector<8x32xf32> -> vector<8x32xf32>
    %203 = vector.broadcast %173 : vector<1x32xf32> to vector<8x32xf32>
    %204 = arith.addf %202, %203 : vector<8x32xf32>
    %c24_162 = arith.constant 24 : index
    %c0_163 = arith.constant 0 : index
    %205 = vector.load %arg11[%c24_162, %c0_163] : memref<64x32xf32, #tpu.memory_space<vmem>>, vector<8x32xf32>
    tpu.vector_store %arg11[%c24_162, %c0_163], %204 {strides = array<i32>} : memref<64x32xf32, #tpu.memory_space<vmem>>, vector<8x32xf32>,
    %c32_164 = arith.constant 32 : index
    %c0_165 = arith.constant 0 : index
    %206 = vector.load %arg10[%c32_164, %c0_165] : memref<64x32xf32, #tpu.memory_space<vmem>>, vector<8x32xf32>
    %cst_166 = arith.constant dense<0.000000e+00> : vector<8x32xf32>
    %207 = tpu.matmul %201, %167, %cst_166 {dimension_numbers = #tpu.dot_dimension_numbers<[1], [0], [0], [1], [0, 0, 1, 1], [], []>} : vector<8x32xf32>, vector<32x32xf32>, vector<8x32xf32> -> vector<8x32xf32>
    %208 = arith.addf %206, %207 : vector<8x32xf32>
    %209 = math.tanh %208 : vector<8x32xf32>
    %cst_167 = arith.constant dense<0.000000e+00> : vector<8x32xf32>
    %210 = tpu.matmul %209, %171, %cst_167 {dimension_numbers = #tpu.dot_dimension_numbers<[1], [0], [0], [1], [0, 0, 1, 1], [], []>} : vector<8x32xf32>, vector<32x32xf32>, vector<8x32xf32> -> vector<8x32xf32>
    %211 = vector.broadcast %173 : vector<1x32xf32> to vector<8x32xf32>
    %212 = arith.addf %210, %211 : vector<8x32xf32>
    %c32_168 = arith.constant 32 : index
    %c0_169 = arith.constant 0 : index
    %213 = vector.load %arg11[%c32_168, %c0_169] : memref<64x32xf32, #tpu.memory_space<vmem>>, vector<8x32xf32>
    tpu.vector_store %arg11[%c32_168, %c0_169], %212 {strides = array<i32>} : memref<64x32xf32, #tpu.memory_space<vmem>>, vector<8x32xf32>,
    %c40_170 = arith.constant 40 : index
    %c0_171 = arith.constant 0 : index
    %214 = vector.load %arg10[%c40_170, %c0_171] : memref<64x32xf32, #tpu.memory_space<vmem>>, vector<8x32xf32>
    %cst_172 = arith.constant dense<0.000000e+00> : vector<8x32xf32>
    %215 = tpu.matmul %209, %167, %cst_172 {dimension_numbers = #tpu.dot_dimension_numbers<[1], [0], [0], [1], [0, 0, 1, 1], [], []>} : vector<8x32xf32>, vector<32x32xf32>, vector<8x32xf32> -> vector<8x32xf32>
    %216 = arith.addf %214, %215 : vector<8x32xf32>
    %217 = math.tanh %216 : vector<8x32xf32>
    %cst_173 = arith.constant dense<0.000000e+00> : vector<8x32xf32>
    %218 = tpu.matmul %217, %171, %cst_173 {dimension_numbers = #tpu.dot_dimension_numbers<[1], [0], [0], [1], [0, 0, 1, 1], [], []>} : vector<8x32xf32>, vector<32x32xf32>, vector<8x32xf32> -> vector<8x32xf32>
    %219 = vector.broadcast %173 : vector<1x32xf32> to vector<8x32xf32>
    %220 = arith.addf %218, %219 : vector<8x32xf32>
    %c40_174 = arith.constant 40 : index
    %c0_175 = arith.constant 0 : index
    %221 = vector.load %arg11[%c40_174, %c0_175] : memref<64x32xf32, #tpu.memory_space<vmem>>, vector<8x32xf32>
    tpu.vector_store %arg11[%c40_174, %c0_175], %220 {strides = array<i32>} : memref<64x32xf32, #tpu.memory_space<vmem>>, vector<8x32xf32>,
    %c48_176 = arith.constant 48 : index
    %c0_177 = arith.constant 0 : index
    %222 = vector.load %arg10[%c48_176, %c0_177] : memref<64x32xf32, #tpu.memory_space<vmem>>, vector<8x32xf32>
    %cst_178 = arith.constant dense<0.000000e+00> : vector<8x32xf32>
    %223 = tpu.matmul %217, %167, %cst_178 {dimension_numbers = #tpu.dot_dimension_numbers<[1], [0], [0], [1], [0, 0, 1, 1], [], []>} : vector<8x32xf32>, vector<32x32xf32>, vector<8x32xf32> -> vector<8x32xf32>
    %224 = arith.addf %222, %223 : vector<8x32xf32>
    %225 = math.tanh %224 : vector<8x32xf32>
    %cst_179 = arith.constant dense<0.000000e+00> : vector<8x32xf32>
    %226 = tpu.matmul %225, %171, %cst_179 {dimension_numbers = #tpu.dot_dimension_numbers<[1], [0], [0], [1], [0, 0, 1, 1], [], []>} : vector<8x32xf32>, vector<32x32xf32>, vector<8x32xf32> -> vector<8x32xf32>
    %227 = vector.broadcast %173 : vector<1x32xf32> to vector<8x32xf32>
    %228 = arith.addf %226, %227 : vector<8x32xf32>
    %c48_180 = arith.constant 48 : index
    %c0_181 = arith.constant 0 : index
    %229 = vector.load %arg11[%c48_180, %c0_181] : memref<64x32xf32, #tpu.memory_space<vmem>>, vector<8x32xf32>
    tpu.vector_store %arg11[%c48_180, %c0_181], %228 {strides = array<i32>} : memref<64x32xf32, #tpu.memory_space<vmem>>, vector<8x32xf32>,
    %c56_182 = arith.constant 56 : index
    %c0_183 = arith.constant 0 : index
    %230 = vector.load %arg10[%c56_182, %c0_183] : memref<64x32xf32, #tpu.memory_space<vmem>>, vector<8x32xf32>
    %cst_184 = arith.constant dense<0.000000e+00> : vector<8x32xf32>
    %231 = tpu.matmul %225, %167, %cst_184 {dimension_numbers = #tpu.dot_dimension_numbers<[1], [0], [0], [1], [0, 0, 1, 1], [], []>} : vector<8x32xf32>, vector<32x32xf32>, vector<8x32xf32> -> vector<8x32xf32>
    %232 = arith.addf %230, %231 : vector<8x32xf32>
    %233 = math.tanh %232 : vector<8x32xf32>
    %cst_185 = arith.constant dense<0.000000e+00> : vector<8x32xf32>
    %234 = tpu.matmul %233, %171, %cst_185 {dimension_numbers = #tpu.dot_dimension_numbers<[1], [0], [0], [1], [0, 0, 1, 1], [], []>} : vector<8x32xf32>, vector<32x32xf32>, vector<8x32xf32> -> vector<8x32xf32>
    %235 = vector.broadcast %173 : vector<1x32xf32> to vector<8x32xf32>
    %236 = arith.addf %234, %235 : vector<8x32xf32>
    %c56_186 = arith.constant 56 : index
    %c0_187 = arith.constant 0 : index
    %237 = vector.load %arg11[%c56_186, %c0_187] : memref<64x32xf32, #tpu.memory_space<vmem>>, vector<8x32xf32>
    tpu.vector_store %arg11[%c56_186, %c0_187], %236 {strides = array<i32>} : memref<64x32xf32, #tpu.memory_space<vmem>>, vector<8x32xf32>,
    %c2_188 = arith.constant 2 : index
    %c0_189 = arith.constant 0 : index
    %c0_190 = arith.constant 0 : index
    %238 = vector.load %arg9[%c2_188, %c0_189, %c0_190] : memref<5x8x32xf32, #tpu.memory_space<vmem>>, vector<1x8x32xf32>
    %239 = vector.shape_cast %238 : vector<1x8x32xf32> to vector<8x32xf32>
    %240 = vector.shape_cast %233 : vector<8x32xf32> to vector<1x8x32xf32>
    tpu.vector_store %arg9[%c2_188, %c0_189, %c0_190], %240 {strides = array<i32>} : memref<5x8x32xf32, #tpu.memory_space<vmem>>, vector<1x8x32xf32>,
    %c3_191 = arith.constant 3 : index
    %c0_192 = arith.constant 0 : index
    %c0_193 = arith.constant 0 : index
    %241 = vector.load %arg4[%c3_191, %c0_192, %c0_193] : memref<5x32x32xf32, #tpu.memory_space<vmem>>, vector<1x32x32xf32>
    %242 = vector.shape_cast %241 : vector<1x32x32xf32> to vector<32x32xf32>
    %c3_194 = arith.constant 3 : index
    %c0_195 = arith.constant 0 : index
    %c0_196 = arith.constant 0 : index
    %243 = vector.load %arg1[%c3_194, %c0_195, %c0_196] : memref<5x8x32xf32, #tpu.memory_space<vmem>>, vector<1x8x32xf32>
    %244 = vector.shape_cast %243 : vector<1x8x32xf32> to vector<8x32xf32>
    %c4 = arith.constant 4 : index
    %c0_197 = arith.constant 0 : index
    %c0_198 = arith.constant 0 : index
    %245 = vector.load %arg3[%c4, %c0_197, %c0_198] : memref<5x32x32xf32, #tpu.memory_space<vmem>>, vector<1x32x32xf32>
    %246 = vector.shape_cast %245 : vector<1x32x32xf32> to vector<32x32xf32>
    %c4_199 = arith.constant 4 : index
    %c0_200 = arith.constant 0 : index
    %c0_201 = arith.constant 0 : index
    %247 = vector.load %arg5[%c4_199, %c0_200, %c0_201] : memref<5x1x32xf32, #tpu.memory_space<vmem>>, vector<1x1x32xf32>
    %248 = vector.shape_cast %247 : vector<1x1x32xf32> to vector<1x32xf32>
    %c0_202 = arith.constant 0 : index
    %c0_203 = arith.constant 0 : index
    %249 = vector.load %arg11[%c0_202, %c0_203] : memref<64x32xf32, #tpu.memory_space<vmem>>, vector<8x32xf32>
    %cst_204 = arith.constant dense<0.000000e+00> : vector<8x32xf32>
    %250 = tpu.matmul %244, %242, %cst_204 {dimension_numbers = #tpu.dot_dimension_numbers<[1], [0], [0], [1], [0, 0, 1, 1], [], []>} : vector<8x32xf32>, vector<32x32xf32>, vector<8x32xf32> -> vector<8x32xf32>
    %251 = arith.addf %249, %250 : vector<8x32xf32>
    %252 = math.tanh %251 : vector<8x32xf32>
    %cst_205 = arith.constant dense<0.000000e+00> : vector<8x32xf32>
    %253 = tpu.matmul %252, %246, %cst_205 {dimension_numbers = #tpu.dot_dimension_numbers<[1], [0], [0], [1], [0, 0, 1, 1], [], []>} : vector<8x32xf32>, vector<32x32xf32>, vector<8x32xf32> -> vector<8x32xf32>
    %254 = vector.broadcast %248 : vector<1x32xf32> to vector<8x32xf32>
    %255 = arith.addf %253, %254 : vector<8x32xf32>
    %c0_206 = arith.constant 0 : index
    %c0_207 = arith.constant 0 : index
    %256 = vector.load %arg10[%c0_206, %c0_207] : memref<64x32xf32, #tpu.memory_space<vmem>>, vector<8x32xf32>
    tpu.vector_store %arg10[%c0_206, %c0_207], %255 {strides = array<i32>} : memref<64x32xf32, #tpu.memory_space<vmem>>, vector<8x32xf32>,
    %c8_208 = arith.constant 8 : index
    %c0_209 = arith.constant 0 : index
    %257 = vector.load %arg11[%c8_208, %c0_209] : memref<64x32xf32, #tpu.memory_space<vmem>>, vector<8x32xf32>
    %cst_210 = arith.constant dense<0.000000e+00> : vector<8x32xf32>
    %258 = tpu.matmul %252, %242, %cst_210 {dimension_numbers = #tpu.dot_dimension_numbers<[1], [0], [0], [1], [0, 0, 1, 1], [], []>} : vector<8x32xf32>, vector<32x32xf32>, vector<8x32xf32> -> vector<8x32xf32>
    %259 = arith.addf %257, %258 : vector<8x32xf32>
    %260 = math.tanh %259 : vector<8x32xf32>
    %cst_211 = arith.constant dense<0.000000e+00> : vector<8x32xf32>
    %261 = tpu.matmul %260, %246, %cst_211 {dimension_numbers = #tpu.dot_dimension_numbers<[1], [0], [0], [1], [0, 0, 1, 1], [], []>} : vector<8x32xf32>, vector<32x32xf32>, vector<8x32xf32> -> vector<8x32xf32>
    %262 = vector.broadcast %248 : vector<1x32xf32> to vector<8x32xf32>
    %263 = arith.addf %261, %262 : vector<8x32xf32>
    %c8_212 = arith.constant 8 : index
    %c0_213 = arith.constant 0 : index
    %264 = vector.load %arg10[%c8_212, %c0_213] : memref<64x32xf32, #tpu.memory_space<vmem>>, vector<8x32xf32>
    tpu.vector_store %arg10[%c8_212, %c0_213], %263 {strides = array<i32>} : memref<64x32xf32, #tpu.memory_space<vmem>>, vector<8x32xf32>,
    %c16_214 = arith.constant 16 : index
    %c0_215 = arith.constant 0 : index
    %265 = vector.load %arg11[%c16_214, %c0_215] : memref<64x32xf32, #tpu.memory_space<vmem>>, vector<8x32xf32>
    %cst_216 = arith.constant dense<0.000000e+00> : vector<8x32xf32>
    %266 = tpu.matmul %260, %242, %cst_216 {dimension_numbers = #tpu.dot_dimension_numbers<[1], [0], [0], [1], [0, 0, 1, 1], [], []>} : vector<8x32xf32>, vector<32x32xf32>, vector<8x32xf32> -> vector<8x32xf32>
    %267 = arith.addf %265, %266 : vector<8x32xf32>
    %268 = math.tanh %267 : vector<8x32xf32>
    %cst_217 = arith.constant dense<0.000000e+00> : vector<8x32xf32>
    %269 = tpu.matmul %268, %246, %cst_217 {dimension_numbers = #tpu.dot_dimension_numbers<[1], [0], [0], [1], [0, 0, 1, 1], [], []>} : vector<8x32xf32>, vector<32x32xf32>, vector<8x32xf32> -> vector<8x32xf32>
    %270 = vector.broadcast %248 : vector<1x32xf32> to vector<8x32xf32>
    %271 = arith.addf %269, %270 : vector<8x32xf32>
    %c16_218 = arith.constant 16 : index
    %c0_219 = arith.constant 0 : index
    %272 = vector.load %arg10[%c16_218, %c0_219] : memref<64x32xf32, #tpu.memory_space<vmem>>, vector<8x32xf32>
    tpu.vector_store %arg10[%c16_218, %c0_219], %271 {strides = array<i32>} : memref<64x32xf32, #tpu.memory_space<vmem>>, vector<8x32xf32>,
    %c24_220 = arith.constant 24 : index
    %c0_221 = arith.constant 0 : index
    %273 = vector.load %arg11[%c24_220, %c0_221] : memref<64x32xf32, #tpu.memory_space<vmem>>, vector<8x32xf32>
    %cst_222 = arith.constant dense<0.000000e+00> : vector<8x32xf32>
    %274 = tpu.matmul %268, %242, %cst_222 {dimension_numbers = #tpu.dot_dimension_numbers<[1], [0], [0], [1], [0, 0, 1, 1], [], []>} : vector<8x32xf32>, vector<32x32xf32>, vector<8x32xf32> -> vector<8x32xf32>
    %275 = arith.addf %273, %274 : vector<8x32xf32>
    %276 = math.tanh %275 : vector<8x32xf32>
    %cst_223 = arith.constant dense<0.000000e+00> : vector<8x32xf32>
    %277 = tpu.matmul %276, %246, %cst_223 {dimension_numbers = #tpu.dot_dimension_numbers<[1], [0], [0], [1], [0, 0, 1, 1], [], []>} : vector<8x32xf32>, vector<32x32xf32>, vector<8x32xf32> -> vector<8x32xf32>
    %278 = vector.broadcast %248 : vector<1x32xf32> to vector<8x32xf32>
    %279 = arith.addf %277, %278 : vector<8x32xf32>
    %c24_224 = arith.constant 24 : index
    %c0_225 = arith.constant 0 : index
    %280 = vector.load %arg10[%c24_224, %c0_225] : memref<64x32xf32, #tpu.memory_space<vmem>>, vector<8x32xf32>
    tpu.vector_store %arg10[%c24_224, %c0_225], %279 {strides = array<i32>} : memref<64x32xf32, #tpu.memory_space<vmem>>, vector<8x32xf32>,
    %c32_226 = arith.constant 32 : index
    %c0_227 = arith.constant 0 : index
    %281 = vector.load %arg11[%c32_226, %c0_227] : memref<64x32xf32, #tpu.memory_space<vmem>>, vector<8x32xf32>
    %cst_228 = arith.constant dense<0.000000e+00> : vector<8x32xf32>
    %282 = tpu.matmul %276, %242, %cst_228 {dimension_numbers = #tpu.dot_dimension_numbers<[1], [0], [0], [1], [0, 0, 1, 1], [], []>} : vector<8x32xf32>, vector<32x32xf32>, vector<8x32xf32> -> vector<8x32xf32>
    %283 = arith.addf %281, %282 : vector<8x32xf32>
    %284 = math.tanh %283 : vector<8x32xf32>
    %cst_229 = arith.constant dense<0.000000e+00> : vector<8x32xf32>
    %285 = tpu.matmul %284, %246, %cst_229 {dimension_numbers = #tpu.dot_dimension_numbers<[1], [0], [0], [1], [0, 0, 1, 1], [], []>} : vector<8x32xf32>, vector<32x32xf32>, vector<8x32xf32> -> vector<8x32xf32>
    %286 = vector.broadcast %248 : vector<1x32xf32> to vector<8x32xf32>
    %287 = arith.addf %285, %286 : vector<8x32xf32>
    %c32_230 = arith.constant 32 : index
    %c0_231 = arith.constant 0 : index
    %288 = vector.load %arg10[%c32_230, %c0_231] : memref<64x32xf32, #tpu.memory_space<vmem>>, vector<8x32xf32>
    tpu.vector_store %arg10[%c32_230, %c0_231], %287 {strides = array<i32>} : memref<64x32xf32, #tpu.memory_space<vmem>>, vector<8x32xf32>,
    %c40_232 = arith.constant 40 : index
    %c0_233 = arith.constant 0 : index
    %289 = vector.load %arg11[%c40_232, %c0_233] : memref<64x32xf32, #tpu.memory_space<vmem>>, vector<8x32xf32>
    %cst_234 = arith.constant dense<0.000000e+00> : vector<8x32xf32>
    %290 = tpu.matmul %284, %242, %cst_234 {dimension_numbers = #tpu.dot_dimension_numbers<[1], [0], [0], [1], [0, 0, 1, 1], [], []>} : vector<8x32xf32>, vector<32x32xf32>, vector<8x32xf32> -> vector<8x32xf32>
    %291 = arith.addf %289, %290 : vector<8x32xf32>
    %292 = math.tanh %291 : vector<8x32xf32>
    %cst_235 = arith.constant dense<0.000000e+00> : vector<8x32xf32>
    %293 = tpu.matmul %292, %246, %cst_235 {dimension_numbers = #tpu.dot_dimension_numbers<[1], [0], [0], [1], [0, 0, 1, 1], [], []>} : vector<8x32xf32>, vector<32x32xf32>, vector<8x32xf32> -> vector<8x32xf32>
    %294 = vector.broadcast %248 : vector<1x32xf32> to vector<8x32xf32>
    %295 = arith.addf %293, %294 : vector<8x32xf32>
    %c40_236 = arith.constant 40 : index
    %c0_237 = arith.constant 0 : index
    %296 = vector.load %arg10[%c40_236, %c0_237] : memref<64x32xf32, #tpu.memory_space<vmem>>, vector<8x32xf32>
    tpu.vector_store %arg10[%c40_236, %c0_237], %295 {strides = array<i32>} : memref<64x32xf32, #tpu.memory_space<vmem>>, vector<8x32xf32>,
    %c48_238 = arith.constant 48 : index
    %c0_239 = arith.constant 0 : index
    %297 = vector.load %arg11[%c48_238, %c0_239] : memref<64x32xf32, #tpu.memory_space<vmem>>, vector<8x32xf32>
    %cst_240 = arith.constant dense<0.000000e+00> : vector<8x32xf32>
    %298 = tpu.matmul %292, %242, %cst_240 {dimension_numbers = #tpu.dot_dimension_numbers<[1], [0], [0], [1], [0, 0, 1, 1], [], []>} : vector<8x32xf32>, vector<32x32xf32>, vector<8x32xf32> -> vector<8x32xf32>
    %299 = arith.addf %297, %298 : vector<8x32xf32>
    %300 = math.tanh %299 : vector<8x32xf32>
    %cst_241 = arith.constant dense<0.000000e+00> : vector<8x32xf32>
    %301 = tpu.matmul %300, %246, %cst_241 {dimension_numbers = #tpu.dot_dimension_numbers<[1], [0], [0], [1], [0, 0, 1, 1], [], []>} : vector<8x32xf32>, vector<32x32xf32>, vector<8x32xf32> -> vector<8x32xf32>
    %302 = vector.broadcast %248 : vector<1x32xf32> to vector<8x32xf32>
    %303 = arith.addf %301, %302 : vector<8x32xf32>
    %c48_242 = arith.constant 48 : index
    %c0_243 = arith.constant 0 : index
    %304 = vector.load %arg10[%c48_242, %c0_243] : memref<64x32xf32, #tpu.memory_space<vmem>>, vector<8x32xf32>
    tpu.vector_store %arg10[%c48_242, %c0_243], %303 {strides = array<i32>} : memref<64x32xf32, #tpu.memory_space<vmem>>, vector<8x32xf32>,
    %c56_244 = arith.constant 56 : index
    %c0_245 = arith.constant 0 : index
    %305 = vector.load %arg11[%c56_244, %c0_245] : memref<64x32xf32, #tpu.memory_space<vmem>>, vector<8x32xf32>
    %cst_246 = arith.constant dense<0.000000e+00> : vector<8x32xf32>
    %306 = tpu.matmul %300, %242, %cst_246 {dimension_numbers = #tpu.dot_dimension_numbers<[1], [0], [0], [1], [0, 0, 1, 1], [], []>} : vector<8x32xf32>, vector<32x32xf32>, vector<8x32xf32> -> vector<8x32xf32>
    %307 = arith.addf %305, %306 : vector<8x32xf32>
    %308 = math.tanh %307 : vector<8x32xf32>
    %cst_247 = arith.constant dense<0.000000e+00> : vector<8x32xf32>
    %309 = tpu.matmul %308, %246, %cst_247 {dimension_numbers = #tpu.dot_dimension_numbers<[1], [0], [0], [1], [0, 0, 1, 1], [], []>} : vector<8x32xf32>, vector<32x32xf32>, vector<8x32xf32> -> vector<8x32xf32>
    %310 = vector.broadcast %248 : vector<1x32xf32> to vector<8x32xf32>
    %311 = arith.addf %309, %310 : vector<8x32xf32>
    %c56_248 = arith.constant 56 : index
    %c0_249 = arith.constant 0 : index
    %312 = vector.load %arg10[%c56_248, %c0_249] : memref<64x32xf32, #tpu.memory_space<vmem>>, vector<8x32xf32>
    tpu.vector_store %arg10[%c56_248, %c0_249], %311 {strides = array<i32>} : memref<64x32xf32, #tpu.memory_space<vmem>>, vector<8x32xf32>,
    %c3_250 = arith.constant 3 : index
    %c0_251 = arith.constant 0 : index
    %c0_252 = arith.constant 0 : index
    %313 = vector.load %arg9[%c3_250, %c0_251, %c0_252] : memref<5x8x32xf32, #tpu.memory_space<vmem>>, vector<1x8x32xf32>
    %314 = vector.shape_cast %313 : vector<1x8x32xf32> to vector<8x32xf32>
    %315 = vector.shape_cast %308 : vector<8x32xf32> to vector<1x8x32xf32>
    tpu.vector_store %arg9[%c3_250, %c0_251, %c0_252], %315 {strides = array<i32>} : memref<5x8x32xf32, #tpu.memory_space<vmem>>, vector<1x8x32xf32>,
    %c4_253 = arith.constant 4 : index
    %c0_254 = arith.constant 0 : index
    %c0_255 = arith.constant 0 : index
    %316 = vector.load %arg4[%c4_253, %c0_254, %c0_255] : memref<5x32x32xf32, #tpu.memory_space<vmem>>, vector<1x32x32xf32>
    %317 = vector.shape_cast %316 : vector<1x32x32xf32> to vector<32x32xf32>
    %c4_256 = arith.constant 4 : index
    %c0_257 = arith.constant 0 : index
    %c0_258 = arith.constant 0 : index
    %318 = vector.load %arg1[%c4_256, %c0_257, %c0_258] : memref<5x8x32xf32, #tpu.memory_space<vmem>>, vector<1x8x32xf32>
    %319 = vector.shape_cast %318 : vector<1x8x32xf32> to vector<8x32xf32>
    %c0_259 = arith.constant 0 : index
    %c0_260 = arith.constant 0 : index
    %320 = vector.load %arg10[%c0_259, %c0_260] : memref<64x32xf32, #tpu.memory_space<vmem>>, vector<8x32xf32>
    %cst_261 = arith.constant dense<0.000000e+00> : vector<8x32xf32>
    %321 = tpu.matmul %319, %317, %cst_261 {dimension_numbers = #tpu.dot_dimension_numbers<[1], [0], [0], [1], [0, 0, 1, 1], [], []>} : vector<8x32xf32>, vector<32x32xf32>, vector<8x32xf32> -> vector<8x32xf32>
    %322 = arith.addf %320, %321 : vector<8x32xf32>
    %323 = math.tanh %322 : vector<8x32xf32>
    %c0_262 = arith.constant 0 : index
    %c0_263 = arith.constant 0 : index
    %324 = vector.load %arg6[%c0_262, %c0_263] : memref<32x128xf32, #tpu.memory_space<vmem>>, vector<32x128xf32>
    %cst_264 = arith.constant dense<0.000000e+00> : vector<8x128xf32>
    %325 = tpu.matmul %323, %324, %cst_264 {dimension_numbers = #tpu.dot_dimension_numbers<[1], [0], [0], [1], [0, 0, 1, 1], [], []>} : vector<8x32xf32>, vector<32x128xf32>, vector<8x128xf32> -> vector<8x128xf32>
    %c0_265 = arith.constant 0 : index
    %c0_266 = arith.constant 0 : index
    %326 = vector.load %arg7[%c0_265, %c0_266] : memref<1x128xf32, #tpu.memory_space<vmem>>, vector<1x128xf32>
    %327 = vector.broadcast %326 : vector<1x128xf32> to vector<8x128xf32>
    %328 = arith.addf %325, %327 : vector<8x128xf32>
    %c0_267 = arith.constant 0 : index
    %c0_268 = arith.constant 0 : index
    %c0_269 = arith.constant 0 : index
    %329 = vector.load %arg8[%c0_267, %c0_268, %c0_269] : memref<8x8x128xf32, #tpu.memory_space<vmem>>, vector<1x8x128xf32>
    %330 = vector.shape_cast %329 : vector<1x8x128xf32> to vector<8x128xf32>
    %331 = vector.shape_cast %328 : vector<8x128xf32> to vector<1x8x128xf32>
    tpu.vector_store %arg8[%c0_267, %c0_268, %c0_269], %331 {strides = array<i32>} : memref<8x8x128xf32, #tpu.memory_space<vmem>>, vector<1x8x128xf32>,
    %c8_270 = arith.constant 8 : index
    %c0_271 = arith.constant 0 : index
    %332 = vector.load %arg10[%c8_270, %c0_271] : memref<64x32xf32, #tpu.memory_space<vmem>>, vector<8x32xf32>
    %cst_272 = arith.constant dense<0.000000e+00> : vector<8x32xf32>
    %333 = tpu.matmul %323, %317, %cst_272 {dimension_numbers = #tpu.dot_dimension_numbers<[1], [0], [0], [1], [0, 0, 1, 1], [], []>} : vector<8x32xf32>, vector<32x32xf32>, vector<8x32xf32> -> vector<8x32xf32>
    %334 = arith.addf %332, %333 : vector<8x32xf32>
    %335 = math.tanh %334 : vector<8x32xf32>
    %c0_273 = arith.constant 0 : index
    %c0_274 = arith.constant 0 : index
    %336 = vector.load %arg6[%c0_273, %c0_274] : memref<32x128xf32, #tpu.memory_space<vmem>>, vector<32x128xf32>
    %cst_275 = arith.constant dense<0.000000e+00> : vector<8x128xf32>
    %337 = tpu.matmul %335, %336, %cst_275 {dimension_numbers = #tpu.dot_dimension_numbers<[1], [0], [0], [1], [0, 0, 1, 1], [], []>} : vector<8x32xf32>, vector<32x128xf32>, vector<8x128xf32> -> vector<8x128xf32>
    %c0_276 = arith.constant 0 : index
    %c0_277 = arith.constant 0 : index
    %338 = vector.load %arg7[%c0_276, %c0_277] : memref<1x128xf32, #tpu.memory_space<vmem>>, vector<1x128xf32>
    %339 = vector.broadcast %338 : vector<1x128xf32> to vector<8x128xf32>
    %340 = arith.addf %337, %339 : vector<8x128xf32>
    %c1_278 = arith.constant 1 : index
    %c0_279 = arith.constant 0 : index
    %c0_280 = arith.constant 0 : index
    %341 = vector.load %arg8[%c1_278, %c0_279, %c0_280] : memref<8x8x128xf32, #tpu.memory_space<vmem>>, vector<1x8x128xf32>
    %342 = vector.shape_cast %341 : vector<1x8x128xf32> to vector<8x128xf32>
    %343 = vector.shape_cast %340 : vector<8x128xf32> to vector<1x8x128xf32>
    tpu.vector_store %arg8[%c1_278, %c0_279, %c0_280], %343 {strides = array<i32>} : memref<8x8x128xf32, #tpu.memory_space<vmem>>, vector<1x8x128xf32>,
    %c16_281 = arith.constant 16 : index
    %c0_282 = arith.constant 0 : index
    %344 = vector.load %arg10[%c16_281, %c0_282] : memref<64x32xf32, #tpu.memory_space<vmem>>, vector<8x32xf32>
    %cst_283 = arith.constant dense<0.000000e+00> : vector<8x32xf32>
    %345 = tpu.matmul %335, %317, %cst_283 {dimension_numbers = #tpu.dot_dimension_numbers<[1], [0], [0], [1], [0, 0, 1, 1], [], []>} : vector<8x32xf32>, vector<32x32xf32>, vector<8x32xf32> -> vector<8x32xf32>
    %346 = arith.addf %344, %345 : vector<8x32xf32>
    %347 = math.tanh %346 : vector<8x32xf32>
    %c0_284 = arith.constant 0 : index
    %c0_285 = arith.constant 0 : index
    %348 = vector.load %arg6[%c0_284, %c0_285] : memref<32x128xf32, #tpu.memory_space<vmem>>, vector<32x128xf32>
    %cst_286 = arith.constant dense<0.000000e+00> : vector<8x128xf32>
    %349 = tpu.matmul %347, %348, %cst_286 {dimension_numbers = #tpu.dot_dimension_numbers<[1], [0], [0], [1], [0, 0, 1, 1], [], []>} : vector<8x32xf32>, vector<32x128xf32>, vector<8x128xf32> -> vector<8x128xf32>
    %c0_287 = arith.constant 0 : index
    %c0_288 = arith.constant 0 : index
    %350 = vector.load %arg7[%c0_287, %c0_288] : memref<1x128xf32, #tpu.memory_space<vmem>>, vector<1x128xf32>
    %351 = vector.broadcast %350 : vector<1x128xf32> to vector<8x128xf32>
    %352 = arith.addf %349, %351 : vector<8x128xf32>
    %c2_289 = arith.constant 2 : index
    %c0_290 = arith.constant 0 : index
    %c0_291 = arith.constant 0 : index
    %353 = vector.load %arg8[%c2_289, %c0_290, %c0_291] : memref<8x8x128xf32, #tpu.memory_space<vmem>>, vector<1x8x128xf32>
    %354 = vector.shape_cast %353 : vector<1x8x128xf32> to vector<8x128xf32>
    %355 = vector.shape_cast %352 : vector<8x128xf32> to vector<1x8x128xf32>
    tpu.vector_store %arg8[%c2_289, %c0_290, %c0_291], %355 {strides = array<i32>} : memref<8x8x128xf32, #tpu.memory_space<vmem>>, vector<1x8x128xf32>,
    %c24_292 = arith.constant 24 : index
    %c0_293 = arith.constant 0 : index
    %356 = vector.load %arg10[%c24_292, %c0_293] : memref<64x32xf32, #tpu.memory_space<vmem>>, vector<8x32xf32>
    %cst_294 = arith.constant dense<0.000000e+00> : vector<8x32xf32>
    %357 = tpu.matmul %347, %317, %cst_294 {dimension_numbers = #tpu.dot_dimension_numbers<[1], [0], [0], [1], [0, 0, 1, 1], [], []>} : vector<8x32xf32>, vector<32x32xf32>, vector<8x32xf32> -> vector<8x32xf32>
    %358 = arith.addf %356, %357 : vector<8x32xf32>
    %359 = math.tanh %358 : vector<8x32xf32>
    %c0_295 = arith.constant 0 : index
    %c0_296 = arith.constant 0 : index
    %360 = vector.load %arg6[%c0_295, %c0_296] : memref<32x128xf32, #tpu.memory_space<vmem>>, vector<32x128xf32>
    %cst_297 = arith.constant dense<0.000000e+00> : vector<8x128xf32>
    %361 = tpu.matmul %359, %360, %cst_297 {dimension_numbers = #tpu.dot_dimension_numbers<[1], [0], [0], [1], [0, 0, 1, 1], [], []>} : vector<8x32xf32>, vector<32x128xf32>, vector<8x128xf32> -> vector<8x128xf32>
    %c0_298 = arith.constant 0 : index
    %c0_299 = arith.constant 0 : index
    %362 = vector.load %arg7[%c0_298, %c0_299] : memref<1x128xf32, #tpu.memory_space<vmem>>, vector<1x128xf32>
    %363 = vector.broadcast %362 : vector<1x128xf32> to vector<8x128xf32>
    %364 = arith.addf %361, %363 : vector<8x128xf32>
    %c3_300 = arith.constant 3 : index
    %c0_301 = arith.constant 0 : index
    %c0_302 = arith.constant 0 : index
    %365 = vector.load %arg8[%c3_300, %c0_301, %c0_302] : memref<8x8x128xf32, #tpu.memory_space<vmem>>, vector<1x8x128xf32>
    %366 = vector.shape_cast %365 : vector<1x8x128xf32> to vector<8x128xf32>
    %367 = vector.shape_cast %364 : vector<8x128xf32> to vector<1x8x128xf32>
    tpu.vector_store %arg8[%c3_300, %c0_301, %c0_302], %367 {strides = array<i32>} : memref<8x8x128xf32, #tpu.memory_space<vmem>>, vector<1x8x128xf32>,
    %c32_303 = arith.constant 32 : index
    %c0_304 = arith.constant 0 : index
    %368 = vector.load %arg10[%c32_303, %c0_304] : memref<64x32xf32, #tpu.memory_space<vmem>>, vector<8x32xf32>
    %cst_305 = arith.constant dense<0.000000e+00> : vector<8x32xf32>
    %369 = tpu.matmul %359, %317, %cst_305 {dimension_numbers = #tpu.dot_dimension_numbers<[1], [0], [0], [1], [0, 0, 1, 1], [], []>} : vector<8x32xf32>, vector<32x32xf32>, vector<8x32xf32> -> vector<8x32xf32>
    %370 = arith.addf %368, %369 : vector<8x32xf32>
    %371 = math.tanh %370 : vector<8x32xf32>
    %c0_306 = arith.constant 0 : index
    %c0_307 = arith.constant 0 : index
    %372 = vector.load %arg6[%c0_306, %c0_307] : memref<32x128xf32, #tpu.memory_space<vmem>>, vector<32x128xf32>
    %cst_308 = arith.constant dense<0.000000e+00> : vector<8x128xf32>
    %373 = tpu.matmul %371, %372, %cst_308 {dimension_numbers = #tpu.dot_dimension_numbers<[1], [0], [0], [1], [0, 0, 1, 1], [], []>} : vector<8x32xf32>, vector<32x128xf32>, vector<8x128xf32> -> vector<8x128xf32>
    %c0_309 = arith.constant 0 : index
    %c0_310 = arith.constant 0 : index
    %374 = vector.load %arg7[%c0_309, %c0_310] : memref<1x128xf32, #tpu.memory_space<vmem>>, vector<1x128xf32>
    %375 = vector.broadcast %374 : vector<1x128xf32> to vector<8x128xf32>
    %376 = arith.addf %373, %375 : vector<8x128xf32>
    %c4_311 = arith.constant 4 : index
    %c0_312 = arith.constant 0 : index
    %c0_313 = arith.constant 0 : index
    %377 = vector.load %arg8[%c4_311, %c0_312, %c0_313] : memref<8x8x128xf32, #tpu.memory_space<vmem>>, vector<1x8x128xf32>
    %378 = vector.shape_cast %377 : vector<1x8x128xf32> to vector<8x128xf32>
    %379 = vector.shape_cast %376 : vector<8x128xf32> to vector<1x8x128xf32>
    tpu.vector_store %arg8[%c4_311, %c0_312, %c0_313], %379 {strides = array<i32>} : memref<8x8x128xf32, #tpu.memory_space<vmem>>, vector<1x8x128xf32>,
    %c40_314 = arith.constant 40 : index
    %c0_315 = arith.constant 0 : index
    %380 = vector.load %arg10[%c40_314, %c0_315] : memref<64x32xf32, #tpu.memory_space<vmem>>, vector<8x32xf32>
    %cst_316 = arith.constant dense<0.000000e+00> : vector<8x32xf32>
    %381 = tpu.matmul %371, %317, %cst_316 {dimension_numbers = #tpu.dot_dimension_numbers<[1], [0], [0], [1], [0, 0, 1, 1], [], []>} : vector<8x32xf32>, vector<32x32xf32>, vector<8x32xf32> -> vector<8x32xf32>
    %382 = arith.addf %380, %381 : vector<8x32xf32>
    %383 = math.tanh %382 : vector<8x32xf32>
    %c0_317 = arith.constant 0 : index
    %c0_318 = arith.constant 0 : index
    %384 = vector.load %arg6[%c0_317, %c0_318] : memref<32x128xf32, #tpu.memory_space<vmem>>, vector<32x128xf32>
    %cst_319 = arith.constant dense<0.000000e+00> : vector<8x128xf32>
    %385 = tpu.matmul %383, %384, %cst_319 {dimension_numbers = #tpu.dot_dimension_numbers<[1], [0], [0], [1], [0, 0, 1, 1], [], []>} : vector<8x32xf32>, vector<32x128xf32>, vector<8x128xf32> -> vector<8x128xf32>
    %c0_320 = arith.constant 0 : index
    %c0_321 = arith.constant 0 : index
    %386 = vector.load %arg7[%c0_320, %c0_321] : memref<1x128xf32, #tpu.memory_space<vmem>>, vector<1x128xf32>
    %387 = vector.broadcast %386 : vector<1x128xf32> to vector<8x128xf32>
    %388 = arith.addf %385, %387 : vector<8x128xf32>
    %c5 = arith.constant 5 : index
    %c0_322 = arith.constant 0 : index
    %c0_323 = arith.constant 0 : index
    %389 = vector.load %arg8[%c5, %c0_322, %c0_323] : memref<8x8x128xf32, #tpu.memory_space<vmem>>, vector<1x8x128xf32>
    %390 = vector.shape_cast %389 : vector<1x8x128xf32> to vector<8x128xf32>
    %391 = vector.shape_cast %388 : vector<8x128xf32> to vector<1x8x128xf32>
    tpu.vector_store %arg8[%c5, %c0_322, %c0_323], %391 {strides = array<i32>} : memref<8x8x128xf32, #tpu.memory_space<vmem>>, vector<1x8x128xf32>,
    %c48_324 = arith.constant 48 : index
    %c0_325 = arith.constant 0 : index
    %392 = vector.load %arg10[%c48_324, %c0_325] : memref<64x32xf32, #tpu.memory_space<vmem>>, vector<8x32xf32>
    %cst_326 = arith.constant dense<0.000000e+00> : vector<8x32xf32>
    %393 = tpu.matmul %383, %317, %cst_326 {dimension_numbers = #tpu.dot_dimension_numbers<[1], [0], [0], [1], [0, 0, 1, 1], [], []>} : vector<8x32xf32>, vector<32x32xf32>, vector<8x32xf32> -> vector<8x32xf32>
    %394 = arith.addf %392, %393 : vector<8x32xf32>
    %395 = math.tanh %394 : vector<8x32xf32>
    %c0_327 = arith.constant 0 : index
    %c0_328 = arith.constant 0 : index
    %396 = vector.load %arg6[%c0_327, %c0_328] : memref<32x128xf32, #tpu.memory_space<vmem>>, vector<32x128xf32>
    %cst_329 = arith.constant dense<0.000000e+00> : vector<8x128xf32>
    %397 = tpu.matmul %395, %396, %cst_329 {dimension_numbers = #tpu.dot_dimension_numbers<[1], [0], [0], [1], [0, 0, 1, 1], [], []>} : vector<8x32xf32>, vector<32x128xf32>, vector<8x128xf32> -> vector<8x128xf32>
    %c0_330 = arith.constant 0 : index
    %c0_331 = arith.constant 0 : index
    %398 = vector.load %arg7[%c0_330, %c0_331] : memref<1x128xf32, #tpu.memory_space<vmem>>, vector<1x128xf32>
    %399 = vector.broadcast %398 : vector<1x128xf32> to vector<8x128xf32>
    %400 = arith.addf %397, %399 : vector<8x128xf32>
    %c6 = arith.constant 6 : index
    %c0_332 = arith.constant 0 : index
    %c0_333 = arith.constant 0 : index
    %401 = vector.load %arg8[%c6, %c0_332, %c0_333] : memref<8x8x128xf32, #tpu.memory_space<vmem>>, vector<1x8x128xf32>
    %402 = vector.shape_cast %401 : vector<1x8x128xf32> to vector<8x128xf32>
    %403 = vector.shape_cast %400 : vector<8x128xf32> to vector<1x8x128xf32>
    tpu.vector_store %arg8[%c6, %c0_332, %c0_333], %403 {strides = array<i32>} : memref<8x8x128xf32, #tpu.memory_space<vmem>>, vector<1x8x128xf32>,
    %c56_334 = arith.constant 56 : index
    %c0_335 = arith.constant 0 : index
    %404 = vector.load %arg10[%c56_334, %c0_335] : memref<64x32xf32, #tpu.memory_space<vmem>>, vector<8x32xf32>
    %cst_336 = arith.constant dense<0.000000e+00> : vector<8x32xf32>
    %405 = tpu.matmul %395, %317, %cst_336 {dimension_numbers = #tpu.dot_dimension_numbers<[1], [0], [0], [1], [0, 0, 1, 1], [], []>} : vector<8x32xf32>, vector<32x32xf32>, vector<8x32xf32> -> vector<8x32xf32>
    %406 = arith.addf %404, %405 : vector<8x32xf32>
    %407 = math.tanh %406 : vector<8x32xf32>
    %c0_337 = arith.constant 0 : index
    %c0_338 = arith.constant 0 : index
    %408 = vector.load %arg6[%c0_337, %c0_338] : memref<32x128xf32, #tpu.memory_space<vmem>>, vector<32x128xf32>
    %cst_339 = arith.constant dense<0.000000e+00> : vector<8x128xf32>
    %409 = tpu.matmul %407, %408, %cst_339 {dimension_numbers = #tpu.dot_dimension_numbers<[1], [0], [0], [1], [0, 0, 1, 1], [], []>} : vector<8x32xf32>, vector<32x128xf32>, vector<8x128xf32> -> vector<8x128xf32>
    %c0_340 = arith.constant 0 : index
    %c0_341 = arith.constant 0 : index
    %410 = vector.load %arg7[%c0_340, %c0_341] : memref<1x128xf32, #tpu.memory_space<vmem>>, vector<1x128xf32>
    %411 = vector.broadcast %410 : vector<1x128xf32> to vector<8x128xf32>
    %412 = arith.addf %409, %411 : vector<8x128xf32>
    %c7 = arith.constant 7 : index
    %c0_342 = arith.constant 0 : index
    %c0_343 = arith.constant 0 : index
    %413 = vector.load %arg8[%c7, %c0_342, %c0_343] : memref<8x8x128xf32, #tpu.memory_space<vmem>>, vector<1x8x128xf32>
    %414 = vector.shape_cast %413 : vector<1x8x128xf32> to vector<8x128xf32>
    %415 = vector.shape_cast %412 : vector<8x128xf32> to vector<1x8x128xf32>
    tpu.vector_store %arg8[%c7, %c0_342, %c0_343], %415 {strides = array<i32>} : memref<8x8x128xf32, #tpu.memory_space<vmem>>, vector<1x8x128xf32>,
    %c4_344 = arith.constant 4 : index
    %c0_345 = arith.constant 0 : index
    %c0_346 = arith.constant 0 : index
    %416 = vector.load %arg9[%c4_344, %c0_345, %c0_346] : memref<5x8x32xf32, #tpu.memory_space<vmem>>, vector<1x8x32xf32>
    %417 = vector.shape_cast %416 : vector<1x8x32xf32> to vector<8x32xf32>
    %418 = vector.shape_cast %407 : vector<8x32xf32> to vector<1x8x32xf32>
    tpu.vector_store %arg9[%c4_344, %c0_345, %c0_346], %418 {strides = array<i32>} : memref<5x8x32xf32, #tpu.memory_space<vmem>>, vector<1x8x32xf32>,
    return
  }
}

</mosaic_0001>

<bundles_post_ra>
// kernel: char_rnn_forward.1
= control target key start
LH: loop header
LB: loop body
LE: loop exit
PB: predicated region body
PF: predicated region fallthrough
CT: control target
= control target key end

     0   :  { %15 = vsyncpa [#allocation5], 0  ;;  %s9487_s0 = inlined_call_operand.vmem [shape: s32[64,1], index: 0, kind: input, shape index: {}]   ;;  %s9488_s1 = inlined_call_operand.vmem [shape: f32[5,8,32], index: 1, kind: input, shape index: {}]   ;;  %s9489_s2 = inlined_call_operand.hbm [shape: f32[16,32], index: 2, kind: input, shape index: {}]   ;;  %s9490_s3 = inlined_call_operand.hbm [shape: f32[5,32,32], index: 3, kind: input, shape index: {}]   ;;  %s9491_s4 = inlined_call_operand.vmem [shape: f32[5,32,32], index: 4, kind: input, shape index: {}]   ;;  %s9492_s5 = inlined_call_operand.hbm [shape: f32[5,1,32], index: 5, kind: input, shape index: {}]   ;;  %s9493_s6 = inlined_call_operand.hbm [shape: f32[32,128], index: 6, kind: input, shape index: {}]   ;;  %s9494_s7 = inlined_call_operand.vmem [shape: f32[1,128], index: 7, kind: input, shape index: {}]   ;;  %s9495_s8 = inlined_call_operand.vmem [shape: f32[8,8,128], index: 8, kind: output, shape index: {0}]   ;;  %s9496_s9 = inlined_call_operand.vmem [shape: f32[5,8,32], index: 9, kind: output, shape index: {1}]  }
   0x1   :  { %16 = vsyncpa [#allocation7], 0 }
   0x2   :  { %17 = vsyncpa [#allocation10], 0  ;;  %s8185_s30 = smov [#allocation6]   ;;  %s8186_s11 = smov [#allocation4]  }
   0x3   :  { %s39_s10 = sshll.u32 %s8185_s30, 4  ;;  %s27_s12 = sshll.u32 %s8186_s11, 4  ;;  %s40_s10 = int_to_ptr.vmem [resolvable:$true] %s39_s10  ;;  %s28_s12 = int_to_ptr.vmem [resolvable:$true] %s27_s12 }
   0x4   :  { %s8107_s13 = scalar_lea.vmem %s40_s10, 2560  ;;  %p8112_p1 = scmp.lt.s32.totalorder %s40_s10, %s40_s10 }
   0x5   :  { %p8108_p0 = scmp.ne.s32.totalorder %s40_s10, %s8107_s13  ;;  %p8113_p2 = scmp.lt.s32.totalorder %s8107_s13, %s8107_s13 }
   0x7   :  { %p8114_p3 = por %p8113_p2, %p8112_p1 }
   0x9   :  { %p8115_p4 = pnand %p8114_p3, %p8108_p0 }
   0xb   :  { %8118 = shalt.err (!%p8115_p4)
}
   0xc   :  { %s8187_s14 = smov 128   ;;  %s8188_s15 = smov 8  }
   0xd   :  { %45 = dma.hbm_to_vmem [thread:$0]  %s9490_s3, 2560, %s40_s10, [#allocation7], %s8187_s14, %s8187_s14, %s8188_s15  }
   0xe   :  { %s8127_s18 = scalar_lea.vmem %s28_s12, 256  ;;  %p8132_p6 = scmp.lt.s32.totalorder %s28_s12, %s28_s12 }
   0xf   :  { %p8128_p5 = scmp.ne.s32.totalorder %s28_s12, %s8127_s18  ;;  %p8133_p7 = scmp.lt.s32.totalorder %s8127_s18, %s8127_s18 }
  0x11   :  { %p8134_p8 = por %p8133_p7, %p8132_p6 }
  0x13   :  { %p8135_p9 = pnand %p8134_p8, %p8128_p5 }
  0x15   :  { %8138 = shalt.err (!%p8135_p9)
}
  0x16   :  { %33 = dma.hbm_to_vmem [thread:$0]  %s9489_s2, 256, %s28_s12, [#allocation5], %s8187_s14, %s8187_s14, %s8188_s15  }
  0x17   :  { %s8189_s21 = smov [#allocation8]  }
  0x18   :  { %s53_s22 = sshll.u32 %s8189_s21, 4  ;;  %s54_s22 = int_to_ptr.vmem [resolvable:$true] %s53_s22 }
  0x19   :  { %s8147_s23 = scalar_lea.vmem %s54_s22, 80  ;;  %s8151_s3 = scalar_lea.vmem %s54_s22, 96 }
  0x1a   :  { %p8148_p10 = scmp.ne.s32.totalorder %s54_s22, %s8147_s23  ;;  %p8152_p11 = scmp.lt.s32.totalorder %s54_s22, %s54_s22 }
  0x1b   :  { %p8153_p12 = scmp.lt.s32.totalorder %s8151_s3, %s8147_s23 }
  0x1d   :  { %p8154_p13 = por %p8153_p12, %p8152_p11 }
  0x1f   :  { %p8155_p0 = pnand %p8154_p13, %p8148_p10 }
  0x21   :  { %8158 = shalt.err (!%p8155_p0)
}
  0x22   :  { %s8190_s24 = smov 16   ;;  %s8191_s25 = smov 1  }
  0x23   :  { %59 = dma.hbm_to_vmem [thread:$0]  %s9492_s5, 80, %s54_s22, [#allocation7], %s8190_s24, %s8190_s24, %s8191_s25  }
  0x24   :  { %s8192_s28 = smov [#allocation9]  }
  0x25   :  { %s65_s29 = sshll.u32 %s8192_s28, 4  ;;  %s66_s29 = int_to_ptr.vmem [resolvable:$true] %s65_s29 }
  0x26   :  { %s8167_s2 = scalar_lea.vmem %s66_s29, 512  ;;  %p8172_p2 = scmp.lt.s32.totalorder %s66_s29, %s66_s29 }
  0x27   :  { %p8168_p1 = scmp.ne.s32.totalorder %s66_s29, %s8167_s2  ;;  %p8173_p3 = scmp.lt.s32.totalorder %s8167_s2, %s8167_s2 }
  0x29   :  { %p8174_p4 = por %p8173_p3, %p8172_p2 }
  0x2b   :  { %p8175_p5 = pnand %p8174_p4, %p8168_p1 }
  0x2d   :  { %8178 = shalt.err (!%p8175_p5)
}
  0x2e   :  { %71 = dma.hbm_to_vmem [thread:$0]  %s9493_s6, 512, %s66_s29, [#allocation10], %s8187_s14, %s8187_s14, %s8188_s15  }
  0x2f   :  { %8179 = dma.done.wait [#allocation5], 256  }
  0x30   :  { %8180 = vsyncadd [#allocation5], 4294967040 }
  0x31   :  { %8181 = dma.done.wait [#allocation7], 2640  }
  0x32   :  { %8182 = vsyncadd [#allocation7], 4294964656 }
  0x33   :  { %8183 = dma.done.wait [#allocation10], 512  }
  0x34   :  { %8184 = vsyncadd [#allocation10], 4294966784  ;;  %v8193_v0 = vmov 0   ;;  %v86_v1 = vld [vmem:[%s9487_s0] sm:$0xff]  ;;  %v88_v2 = vld [vmem:[%s9487_s0 + $0x10] sm:$0xff]  ;;  %v8194_v9 = vmov 0.0   ;;  %v94_v14 = vlaneseq }
  0x35   :  { %8017 = vset.pattern.permute.xlu0 %v8193_v0  ;;  %8018 = vset.pattern.permute.xlu1 %v8193_v0  ;;  %v87_v3 = vld [vmem:[%s9487_s0 + $0x8] sm:$0xff]  ;;  %v89_v4 = vld [vmem:[%s9487_s0 + $0x18] sm:$0xff]  ;;  %v144_v6 = vld [vmem:[#allocation4] sm:$0xff]  ;;  %vm146_vm0 = vcmask 130048   ;;  %vm8195_vm9 = vmmov 0   ;;  %vm287_vm10 = vcmask 261120  }
  0x36   :  { %97 = vperm.xlu0 %8017, %v86_v1   ;;  %103 = vperm.xlu1 %8018, %v88_v2   ;;  %v145_v5 = vld [vmem:[#allocation4 + $0x8] sm:$0xff]  ;;  %v90_v7 = vld [vmem:[%s9487_s0 + $0x20] sm:$0xff]  ;;  %v92_v10 = vld [vmem:[%s9487_s0 + $0x30] sm:$0xff]  ;;  %v95_v15 = vand.u32 127, %v94_v14 }
  0x37   :  { %7090 = vmatprep.subr.mxu0 %v145_v5  ;;  %v91_v8 = vld [vmem:[%s9487_s0 + $0x28] sm:$0xff]  ;;  %v93_v11 = vld [vmem:[%s9487_s0 + $0x38] sm:$0xff]  ;;  %v278_v13 = vld [vmem:[#allocation6 + $0x10] sm:$0xff] }
  0x38   :  { %7091 = vmatpush3.msra.mxu0 %v145_v5  ;;  %v279_v12 = vld [vmem:[#allocation6 + $0x18] sm:$0xff]  ;;  %v277_v32 = vld [vmem:[#allocation6 + $0x8] sm:$0xff]  ;;  %v276_v34 = vld [vmem:[#allocation6] sm:$0xff] }
  0x39   :  { %7092 = vmatprep.subr.mxu0 %v144_v6  ;;  %7106 = vmatprep.subr.mxu1 %v279_v12  ;;  %v8311_v33 = vld [vmem:[%s9491_s4 + $0x18] sm:$0xff]  ;;  %v8318_v35 = vld [vmem:[%s9491_s4 + $0x10] sm:$0xff]  ;;  %v8323_v36 = vld [vmem:[%s9491_s4 + $0x8] sm:$0xff] }
  0x3a   :  { %100 = vperm.xlu0 %8017, %v87_v3   ;;  %106 = vperm.xlu1 %8018, %v89_v4   ;;  %v8333_v37 = vld [vmem:[%s9491_s4] sm:$0xff]  ;;  %v8363_v49 = vld [vmem:[#allocation6 + $0x38] sm:$0xff]  ;;  %v8369_v51 = vld [vmem:[#allocation6 + $0x28] sm:$0xff] }
  0x3b   :  { %7093 = vmatpush3.msra.mxu0 %v144_v6  ;;  %7107 = vmatpush3.msra.mxu1 %v279_v12  ;;  %v429_v38 = vld [vmem:[%s9488_s1] sm:$0xff]  ;;  %v8373_v52 = vld [vmem:[#allocation6 + $0x20] sm:$0xff] }
  0x3c   :  { %7126 = vmatprep.subr.mxu0 %v8194_v9  ;;  %7108 = vmatprep.subr.mxu1 %v278_v13  ;;  %v8365_v50 = vld [vmem:[#allocation6 + $0x30] sm:$0xff]  ;;  %v6536_v53 = vld [vmem:[#allocation8] ss:$0 sm:$0xff] }
  0x3d   :  { %7109 = vmatpush3.msra.mxu1 %v278_v13 }
  0x3e   :  { %109 = vperm.xlu0 %8017, %v90_v7   ;;  %112 = vperm.xlu1 %8018, %v91_v8  }
  0x3f   :  { %7110 = vmatprep.subr.mxu1 %v277_v32 }
  0x40   :  { %7111 = vmatpush3.msra.mxu1 %v277_v32 }
  0x41   :  { %7112 = vmatprep.subr.mxu1 %v276_v34 }
  0x42   :  { %115 = vperm.xlu0 %8017, %v92_v10   ;;  %118 = vperm.xlu1 %8018, %v93_v11   ;;  %v8409_v10 = vld [vmem:[#allocation8 + $0x1] ss:$0 sm:$0xff] }
  0x43   :  { %7113 = vmatpush3.msra.mxu1 %v276_v34 }
  0x44   :  { %7137 = vmatprep.subr.mxu1 %v8194_v9 }
  0xb1   :  { %v98_v16 = vpop.permute.xlu0 %97  ;;  %v104_v17 = vpop.permute.xlu1 %103 }
  0xb2   :  { %vm120_vm1 = vcmp.eq.s32.totalorder %v95_v15, %v98_v16  ;;  %vm122_vm2 = vcmp.eq.s32.totalorder %v95_v15, %v104_v17 }
  0xb3   :  { %v6520_v18 = vsel %vm120_vm1, 1.0, %v8194_v9  ;;  %v6522_v21 = vsel %vm122_vm2, 1.0, %v8194_v9 }
  0xb4   :  { %7094 = vmatprep.mubr.msk.f32.mxu0 %vm146_vm0, %v6520_v18 }
  0xb5   :  { %v101_v19 = vpop.permute.xlu0 %100  ;;  %v107_v20 = vpop.permute.xlu1 %106 }
  0xb6   :  { %vm121_vm3 = vcmp.eq.s32.totalorder %v95_v15, %v101_v19  ;;  %vm123_vm4 = vcmp.eq.s32.totalorder %v95_v15, %v107_v20 }
  0xb7   :  { %v6521_v22 = vsel %vm121_vm3, 1.0, %v8194_v9  ;;  %v6523_v23 = vsel %vm123_vm4, 1.0, %v8194_v9 }
  0xb8   :  { %7095 = vmatmul.mubr.msk.f32.vlgmr.msra.gmra.mxu0 %vm146_vm0, %v6521_v22 }
  0xb9   :  { %v110_v24 = vpop.permute.xlu0 %109  ;;  %7097 = vmatprep.mubr.msk.f32.mxu0 %vm146_vm0, %v6522_v21  ;;  %v113_v25 = vpop.permute.xlu1 %112  ;;  %7127 = vmatpush3.msra.mxu0 %v8311_v33 }
  0xba   :  { %vm124_vm5 = vcmp.eq.s32.totalorder %v95_v15, %v110_v24  ;;  %vm125_vm6 = vcmp.eq.s32.totalorder %v95_v15, %v113_v25  ;;  %7128 = vmatprep.subr.mxu0 %v8194_v9 }
  0xbb   :  { %v6524_v26 = vsel %vm124_vm5, 1.0, %v8194_v9  ;;  %v6525_v27 = vsel %vm125_vm6, 1.0, %v8194_v9  ;;  %7129 = vmatpush3.msra.mxu0 %v8318_v35 }
  0xbc   :  { %7098 = vmatmul.mubr.msk.f32.gmra.mxu0 %vm146_vm0, %v6523_v23  ;;  %7130 = vmatprep.subr.mxu0 %v8194_v9 }
  0xbd   :  { %7100 = vmatprep.mubr.msk.f32.mxu0 %vm146_vm0, %v6524_v26  ;;  %v116_v28 = vpop.permute.xlu0 %115  ;;  %v119_v29 = vpop.permute.xlu1 %118  ;;  %7131 = vmatpush3.msra.mxu0 %v8323_v36 }
  0xbe   :  { %vm126_vm7 = vcmp.eq.s32.totalorder %v95_v15, %v116_v28  ;;  %vm127_vm8 = vcmp.eq.s32.totalorder %v95_v15, %v119_v29  ;;  %7132 = vmatprep.subr.mxu0 %v8194_v9 }
  0xbf   :  { %v6526_v30 = vsel %vm126_vm7, 1.0, %v8194_v9  ;;  %v6527_v31 = vsel %vm127_vm8, 1.0, %v8194_v9  ;;  %7133 = vmatpush3.msra.mxu0 %v8333_v37 }
  0xc0   :  { %7101 = vmatmul.mubr.msk.f32.gmra.mxu0 %vm146_vm0, %v6525_v27  ;;  %7148 = vmatprep.subr.mxu0 %v8194_v9 }
  0xc1   :  { %7103 = vmatprep.mubr.msk.f32.mxu0 %vm146_vm0, %v6526_v30 }
  0xc4   :  { %7104 = vmatmul.mubr.msk.f32.gmra.mxu0 %vm146_vm0, %v6527_v31 }
  0xc5   :  { %7134 = vmatprep.mubr.msk.f32.mxu0 %vm8195_vm9, %v8194_v9 }
  0xc8   :  { %7135 = vmatmul.mubr.msk.f32.vlgmr.msra.gmra.mxu0 %vm287_vm10, %v429_v38 }
  0xc9   :  { %7149 = vmatpush3.msra.mxu0 %v8311_v33  ;;  %7156 = vmatprep.mubr.msk.f32.mxu0 %vm8195_vm9, %v8194_v9 }
  0xca   :  { %7150 = vmatprep.subr.mxu0 %v8194_v9 }
  0xcb   :  { %7151 = vmatpush3.msra.mxu0 %v8318_v35 }
  0xcc   :  { %7152 = vmatprep.subr.mxu0 %v8194_v9 }
  0xcd   :  { %7153 = vmatpush3.msra.mxu0 %v8323_v36 }
  0xce   :  { %7154 = vmatprep.subr.mxu0 %v8194_v9 }
  0xcf   :  { %7155 = vmatpush3.msra.mxu0 %v8333_v37 }
  0xd0   :  { %7170 = vmatprep.subr.mxu0 %v8194_v9 }
 0x178   :  { %v7096_v39 = vpop.f32.mrf.mxu0 }
 0x17a   :  { %v237_v40 = vpop.f32.mrf.mxu0 }
 0x17b   :  { %7114 = vmatprep.mubr.msk.f32.mxu1 %vm287_vm10, %v237_v40 }
 0x17c   :  { %7115 = vmatmul.mubr.msk.f32.vlgmr.msra.gmra.mxu1 %vm287_vm10, %v7096_v39  ;;  %v7099_v41 = vpop.f32.mrf.mxu0 }
 0x17d   :  { %7138 = vmatpush3.msra.mxu1 %v8363_v49 }
 0x17e   :  { %v247_v42 = vpop.f32.mrf.mxu0  ;;  %7139 = vmatprep.subr.mxu1 %v8194_v9 }
 0x17f   :  { %7117 = vmatprep.mubr.msk.f32.mxu1 %vm287_vm10, %v247_v42  ;;  %7140 = vmatpush3.msra.mxu1 %v8365_v50 }
 0x180   :  { %v7102_v43 = vpop.f32.mrf.mxu0  ;;  %7118 = vmatmul.mubr.msk.f32.gmra.mxu1 %vm287_vm10, %v7099_v41  ;;  %7141 = vmatprep.subr.mxu1 %v8194_v9 }
 0x181   :  { %7142 = vmatpush3.msra.mxu1 %v8369_v51 }
 0x182   :  { %v257_v44 = vpop.f32.mrf.mxu0  ;;  %7143 = vmatprep.subr.mxu1 %v8194_v9 }
 0x183   :  { %7120 = vmatprep.mubr.msk.f32.mxu1 %vm287_vm10, %v257_v44  ;;  %7144 = vmatpush3.msra.mxu1 %v8373_v52 }
 0x184   :  { %v7105_v45 = vpop.f32.mrf.mxu0  ;;  %7121 = vmatmul.mubr.msk.f32.gmra.mxu1 %vm287_vm10, %v7102_v43  ;;  %7159 = vmatprep.subr.mxu1 %v8194_v9 }
 0x186   :  { %v267_v46 = vpop.f32.mrf.mxu0 }
 0x187   :  { %7123 = vmatprep.mubr.msk.f32.mxu1 %vm287_vm10, %v267_v46 }
 0x188   :  { %7124 = vmatmul.mubr.msk.f32.gmra.mxu1 %vm287_vm10, %v7105_v45  ;;  %v507_v47 = vpop.f32.mrf.mxu0 }
 0x189   :  { %7145 = vmatprep.mubr.msk.f32.mxu1 %vm8195_vm9, %v8194_v9 }
 0x18a   :  { %v7136_v48 = vpop.f32.mrf.mxu0 }
 0x23c   :  { %v7116_v54 = vpop.f32.mrf.mxu1 }
 0x23d   :  { %v384_v55 = vadd.f32 %v7116_v54, %v6536_v53 }
 0x23e   :  { %v378_v56 = vpop.f32.mrf.mxu1 }
 0x23f   :  { %418 = vst.msk [vmem:[#allocation2 + $0x8] sm:$0xff] %vm287_vm10, %v384_v55  ;;  %v379_v57 = vadd.f32 %v6536_v53, %v378_v56 }
 0x240   :  { %v7119_v58 = vpop.f32.mrf.mxu1 }
 0x241   :  { %417 = vst.msk [vmem:[#allocation2] sm:$0xff] %vm287_vm10, %v379_v57  ;;  %v394_v59 = vadd.f32 %v7119_v58, %v6536_v53 }
 0x242   :  { %v388_v60 = vpop.f32.mrf.mxu1 }
 0x243   :  { %420 = vst.msk [vmem:[#allocation2 + $0x18] sm:$0xff] %vm287_vm10, %v394_v59  ;;  %v389_v61 = vadd.f32 %v6536_v53, %v388_v60 }
 0x244   :  { %v7122_v62 = vpop.f32.mrf.mxu1 }
 0x245   :  { %419 = vst.msk [vmem:[#allocation2 + $0x10] sm:$0xff] %vm287_vm10, %v389_v61  ;;  %v404_v63 = vadd.f32 %v7122_v62, %v6536_v53  ;;  %v8536_v62 = vld [vmem:[%s9491_s4 + $0x38] sm:$0xff] }
 0x246   :  { %v398_v0 = vpop.f32.mrf.mxu1  ;;  %v593_v12 = vld [vmem:[#allocation2 + $0x8] sm:$0xff] }
 0x247   :  { %422 = vst.msk [vmem:[#allocation2 + $0x28] sm:$0xff] %vm287_vm10, %v404_v63  ;;  %v399_v1 = vadd.f32 %v6536_v53, %v398_v0  ;;  %v8543_v0 = vld [vmem:[%s9491_s4 + $0x30] sm:$0xff] }
 0x248   :  { %v437_v2 = vld [vmem:[#allocation2] sm:$0xff]  ;;  %v7125_v3 = vpop.f32.mrf.mxu1 }
 0x249   :  { %v511_v4 = vadd.f32 %v507_v47, %v437_v2  ;;  %421 = vst.msk [vmem:[#allocation2 + $0x20] sm:$0xff] %vm287_vm10, %v399_v1  ;;  %v414_v5 = vadd.f32 %v7125_v3, %v6536_v53  ;;  %v8552_v1 = vld [vmem:[%s9491_s4 + $0x28] sm:$0xff]  ;;  %v8561_v2 = vld [vmem:[%s9491_s4 + $0x20] sm:$0xff] }
 0x24a   :  { %v408_v6 = vpop.f32.mrf.mxu1  ;;  %v887_v28 = vld [vmem:[#allocation2 + $0x18] sm:$0xff]  ;;  %v6566_v3 = vld [vmem:[%s9488_s1 + $0x8] sm:$0xff] }
 0x24b   :  { %8019 = vtanh.f32 %v511_v4  ;;  %424 = vst.msk [vmem:[#allocation2 + $0x38] sm:$0xff] %vm287_vm10, %v414_v5  ;;  %v409_v7 = vadd.f32 %v6536_v53, %v408_v6 }
 0x24c   :  { %v740_v20 = vld [vmem:[#allocation2 + $0x10] sm:$0xff] }
 0x24d   :  { %423 = vst.msk [vmem:[#allocation2 + $0x30] sm:$0xff] %vm287_vm10, %v409_v7 }
 0x24e   :  { %v1181_v48 = vld [vmem:[#allocation2 + $0x28] sm:$0xff] }
 0x250   :  { %v1034_v40 = vld [vmem:[#allocation2 + $0x20] sm:$0xff] }
 0x258   :  { %v8020_v8 = vpop.eup %8019 }
 0x259   :  { %7146 = vmatmul.mubr.msk.f32.vlgmr.msra.gmra.mxu1 %vm287_vm10, %v8020_v8  ;;  %7157 = vmatmul.mubr.msk.f32.vlgmr.msra.gmra.mxu0 %vm287_vm10, %v8020_v8 }
 0x25a   :  { %7160 = vmatpush3.msra.mxu1 %v8363_v49  ;;  %7171 = vmatpush3.msra.mxu0 %v8311_v33 }
 0x25b   :  { %7161 = vmatprep.subr.mxu1 %v8194_v9  ;;  %7172 = vmatprep.subr.mxu0 %v8194_v9 }
 0x25c   :  { %7162 = vmatpush3.msra.mxu1 %v8365_v50  ;;  %7173 = vmatpush3.msra.mxu0 %v8318_v35 }
 0x25d   :  { %7163 = vmatprep.subr.mxu1 %v8194_v9  ;;  %7174 = vmatprep.subr.mxu0 %v8194_v9 }
 0x25e   :  { %7164 = vmatpush3.msra.mxu1 %v8369_v51  ;;  %7175 = vmatpush3.msra.mxu0 %v8323_v36 }
 0x25f   :  { %7165 = vmatprep.subr.mxu1 %v8194_v9  ;;  %7176 = vmatprep.subr.mxu0 %v8194_v9 }
 0x260   :  { %7166 = vmatpush3.msra.mxu1 %v8373_v52  ;;  %7167 = vmatprep.mubr.msk.f32.mxu1 %vm8195_vm9, %v8194_v9 }
 0x261   :  { %7177 = vmatpush3.msra.mxu0 %v8333_v37  ;;  %7178 = vmatprep.mubr.msk.f32.mxu0 %vm8195_vm9, %v8194_v9 }
 0x262   :  { %7181 = vmatprep.subr.mxu1 %v8194_v9  ;;  %7192 = vmatprep.subr.mxu0 %v8194_v9 }
 0x319   :  { %v588_v11 = vpop.f32.mrf.mxu1  ;;  %v660_v13 = vpop.f32.mrf.mxu0 }
 0x31a   :  { %v589_v14 = vadd.f32 %v8409_v10, %v588_v11  ;;  %v664_v15 = vadd.f32 %v660_v13, %v593_v12  ;;  %v8591_v13 = vld [vmem:[#allocation6 + $0x58] sm:$0xff] }
 0x31b   :  { %v7147_v16 = vpop.f32.mrf.mxu1  ;;  %v7158_v17 = vpop.f32.mrf.mxu0 }
 0x31c   :  { %592 = vst.msk [vmem:[#allocation3] sm:$0xff] %vm287_vm10, %v589_v14  ;;  %8021 = vtanh.f32 %v664_v15  ;;  %v8598_v15 = vld [vmem:[#allocation6 + $0x50] sm:$0xff]  ;;  %v8604_v16 = vld [vmem:[#allocation6 + $0x48] sm:$0xff]  ;;  %v8608_v17 = vld [vmem:[#allocation6 + $0x40] sm:$0xff] }
 0x323   :  { %v1637_v7 = vld [vmem:[#allocation3] sm:$0xff] }
 0x329   :  { %v8022_v18 = vpop.eup %8021 }
 0x32a   :  { %7168 = vmatmul.mubr.msk.f32.vlgmr.msra.gmra.mxu1 %vm287_vm10, %v8022_v18  ;;  %7179 = vmatmul.mubr.msk.f32.vlgmr.msra.gmra.mxu0 %vm287_vm10, %v8022_v18 }
 0x32b   :  { %7182 = vmatpush3.msra.mxu1 %v8363_v49  ;;  %7193 = vmatpush3.msra.mxu0 %v8311_v33 }
 0x32c   :  { %7183 = vmatprep.subr.mxu1 %v8194_v9  ;;  %7194 = vmatprep.subr.mxu0 %v8194_v9 }
 0x32d   :  { %7184 = vmatpush3.msra.mxu1 %v8365_v50  ;;  %7195 = vmatpush3.msra.mxu0 %v8318_v35 }
 0x32e   :  { %7185 = vmatprep.subr.mxu1 %v8194_v9  ;;  %7196 = vmatprep.subr.mxu0 %v8194_v9 }
 0x32f   :  { %7186 = vmatpush3.msra.mxu1 %v8369_v51  ;;  %7197 = vmatpush3.msra.mxu0 %v8323_v36 }
 0x330   :  { %7187 = vmatprep.subr.mxu1 %v8194_v9  ;;  %7198 = vmatprep.subr.mxu0 %v8194_v9 }
 0x331   :  { %7188 = vmatpush3.msra.mxu1 %v8373_v52  ;;  %7189 = vmatprep.mubr.msk.f32.mxu1 %vm8195_vm9, %v8194_v9 }
 0x332   :  { %7199 = vmatpush3.msra.mxu0 %v8333_v37  ;;  %7200 = vmatprep.mubr.msk.f32.mxu0 %vm8195_vm9, %v8194_v9 }
 0x333   :  { %7203 = vmatprep.subr.mxu1 %v8194_v9  ;;  %7214 = vmatprep.subr.mxu0 %v8194_v9 }
 0x3ea   :  { %v735_v19 = vpop.f32.mrf.mxu1  ;;  %v807_v21 = vpop.f32.mrf.mxu0 }
 0x3eb   :  { %v736_v22 = vadd.f32 %v8409_v10, %v735_v19  ;;  %v811_v23 = vadd.f32 %v807_v21, %v740_v20 }
 0x3ec   :  { %v7169_v24 = vpop.f32.mrf.mxu1  ;;  %v7180_v25 = vpop.f32.mrf.mxu0 }
 0x3ed   :  { %739 = vst.msk [vmem:[#allocation3 + $0x8] sm:$0xff] %vm287_vm10, %v736_v22  ;;  %8023 = vtanh.f32 %v811_v23  ;;  %v8638_v22 = vld [vmem:[#allocation8 + $0x2] ss:$0 sm:$0xff] }
 0x3f4   :  { %v1793_v24 = vld [vmem:[#allocation3 + $0x8] sm:$0xff] }
 0x3fa   :  { %v8024_v26 = vpop.eup %8023 }
 0x3fb   :  { %7190 = vmatmul.mubr.msk.f32.vlgmr.msra.gmra.mxu1 %vm287_vm10, %v8024_v26  ;;  %7201 = vmatmul.mubr.msk.f32.vlgmr.msra.gmra.mxu0 %vm287_vm10, %v8024_v26 }
 0x3fc   :  { %7204 = vmatpush3.msra.mxu1 %v8363_v49  ;;  %7215 = vmatpush3.msra.mxu0 %v8311_v33 }
 0x3fd   :  { %7205 = vmatprep.subr.mxu1 %v8194_v9  ;;  %7216 = vmatprep.subr.mxu0 %v8194_v9 }
 0x3fe   :  { %7206 = vmatpush3.msra.mxu1 %v8365_v50  ;;  %7217 = vmatpush3.msra.mxu0 %v8318_v35 }
 0x3ff   :  { %7207 = vmatprep.subr.mxu1 %v8194_v9  ;;  %7218 = vmatprep.subr.mxu0 %v8194_v9 }
 0x400   :  { %7208 = vmatpush3.msra.mxu1 %v8369_v51  ;;  %7219 = vmatpush3.msra.mxu0 %v8323_v36 }
 0x401   :  { %7209 = vmatprep.subr.mxu1 %v8194_v9  ;;  %7220 = vmatprep.subr.mxu0 %v8194_v9 }
 0x402   :  { %7210 = vmatpush3.msra.mxu1 %v8373_v52  ;;  %7211 = vmatprep.mubr.msk.f32.mxu1 %vm8195_vm9, %v8194_v9 }
 0x403   :  { %7221 = vmatpush3.msra.mxu0 %v8333_v37  ;;  %7222 = vmatprep.mubr.msk.f32.mxu0 %vm8195_vm9, %v8194_v9 }
 0x404   :  { %7225 = vmatprep.subr.mxu1 %v8194_v9  ;;  %7236 = vmatprep.subr.mxu0 %v8194_v9 }
 0x4bb   :  { %v882_v27 = vpop.f32.mrf.mxu1  ;;  %v954_v29 = vpop.f32.mrf.mxu0 }
 0x4bc   :  { %v883_v30 = vadd.f32 %v8409_v10, %v882_v27  ;;  %v958_v31 = vadd.f32 %v954_v29, %v887_v28 }
 0x4bd   :  { %v7191_v32 = vpop.f32.mrf.mxu1  ;;  %v7202_v34 = vpop.f32.mrf.mxu0 }
 0x4be   :  { %886 = vst.msk [vmem:[#allocation3 + $0x10] sm:$0xff] %vm287_vm10, %v883_v30  ;;  %8025 = vtanh.f32 %v958_v31 }
 0x4c5   :  { %v1940_v31 = vld [vmem:[#allocation3 + $0x10] sm:$0xff] }
 0x4cb   :  { %v8026_v38 = vpop.eup %8025 }
 0x4cc   :  { %7212 = vmatmul.mubr.msk.f32.vlgmr.msra.gmra.mxu1 %vm287_vm10, %v8026_v38  ;;  %7223 = vmatmul.mubr.msk.f32.vlgmr.msra.gmra.mxu0 %vm287_vm10, %v8026_v38 }
 0x4cd   :  { %7226 = vmatpush3.msra.mxu1 %v8363_v49  ;;  %7237 = vmatpush3.msra.mxu0 %v8311_v33 }
 0x4ce   :  { %7227 = vmatprep.subr.mxu1 %v8194_v9  ;;  %7238 = vmatprep.subr.mxu0 %v8194_v9 }
 0x4cf   :  { %7228 = vmatpush3.msra.mxu1 %v8365_v50  ;;  %7239 = vmatpush3.msra.mxu0 %v8318_v35 }
 0x4d0   :  { %7229 = vmatprep.subr.mxu1 %v8194_v9  ;;  %7240 = vmatprep.subr.mxu0 %v8194_v9 }
 0x4d1   :  { %7230 = vmatpush3.msra.mxu1 %v8369_v51  ;;  %7241 = vmatpush3.msra.mxu0 %v8323_v36 }
 0x4d2   :  { %7231 = vmatprep.subr.mxu1 %v8194_v9  ;;  %7242 = vmatprep.subr.mxu0 %v8194_v9 }
 0x4d3   :  { %7232 = vmatpush3.msra.mxu1 %v8373_v52  ;;  %7233 = vmatprep.mubr.msk.f32.mxu1 %vm8195_vm9, %v8194_v9 }
 0x4d4   :  { %7243 = vmatpush3.msra.mxu0 %v8333_v37  ;;  %7244 = vmatprep.mubr.msk.f32.mxu0 %vm8195_vm9, %v8194_v9 }
 0x4d5   :  { %7247 = vmatprep.subr.mxu1 %v8194_v9  ;;  %7258 = vmatprep.subr.mxu0 %v8194_v9 }
 0x58c   :  { %v1029_v39 = vpop.f32.mrf.mxu1  ;;  %v1101_v41 = vpop.f32.mrf.mxu0 }
 0x58d   :  { %v1030_v42 = vadd.f32 %v8409_v10, %v1029_v39  ;;  %v1105_v43 = vadd.f32 %v1101_v41, %v1034_v40 }
 0x58e   :  { %v7213_v44 = vpop.f32.mrf.mxu1  ;;  %v7224_v45 = vpop.f32.mrf.mxu0 }
 0x58f   :  { %1033 = vst.msk [vmem:[#allocation3 + $0x18] sm:$0xff] %vm287_vm10, %v1030_v42  ;;  %8027 = vtanh.f32 %v1105_v43 }
 0x596   :  { %v2087_v43 = vld [vmem:[#allocation3 + $0x18] sm:$0xff] }
 0x59c   :  { %v8028_v46 = vpop.eup %8027 }
 0x59d   :  { %7234 = vmatmul.mubr.msk.f32.vlgmr.msra.gmra.mxu1 %vm287_vm10, %v8028_v46  ;;  %7245 = vmatmul.mubr.msk.f32.vlgmr.msra.gmra.mxu0 %vm287_vm10, %v8028_v46 }
 0x59e   :  { %7248 = vmatpush3.msra.mxu1 %v8363_v49  ;;  %7259 = vmatpush3.msra.mxu0 %v8311_v33 }
 0x59f   :  { %7249 = vmatprep.subr.mxu1 %v8194_v9  ;;  %7260 = vmatprep.subr.mxu0 %v8194_v9 }
 0x5a0   :  { %7250 = vmatpush3.msra.mxu1 %v8365_v50  ;;  %7261 = vmatpush3.msra.mxu0 %v8318_v35 }
 0x5a1   :  { %7251 = vmatprep.subr.mxu1 %v8194_v9  ;;  %7262 = vmatprep.subr.mxu0 %v8194_v9 }
 0x5a2   :  { %7252 = vmatpush3.msra.mxu1 %v8369_v51  ;;  %7263 = vmatpush3.msra.mxu0 %v8323_v36 }
 0x5a3   :  { %7253 = vmatprep.subr.mxu1 %v8194_v9  ;;  %7264 = vmatprep.subr.mxu0 %v8194_v9 }
 0x5a4   :  { %7254 = vmatpush3.msra.mxu1 %v8373_v52  ;;  %7255 = vmatprep.mubr.msk.f32.mxu1 %vm8195_vm9, %v8194_v9 }
 0x5a5   :  { %7265 = vmatpush3.msra.mxu0 %v8333_v37  ;;  %7266 = vmatprep.mubr.msk.f32.mxu0 %vm8195_vm9, %v8194_v9 }
 0x5a6   :  { %7280 = vmatprep.subr.mxu0 %v8194_v9  ;;  %7269 = vmatprep.subr.mxu1 %v8194_v9 }
 0x65d   :  { %v1176_v47 = vpop.f32.mrf.mxu1  ;;  %v1248_v53 = vpop.f32.mrf.mxu0 }
 0x65e   :  { %v1177_v54 = vadd.f32 %v8409_v10, %v1176_v47  ;;  %v1252_v55 = vadd.f32 %v1248_v53, %v1181_v48 }
 0x65f   :  { %v7235_v56 = vpop.f32.mrf.mxu1  ;;  %v7246_v57 = vpop.f32.mrf.mxu0 }
 0x660   :  { %1180 = vst.msk [vmem:[#allocation3 + $0x20] sm:$0xff] %vm287_vm10, %v1177_v54  ;;  %8029 = vtanh.f32 %v1252_v55 }
 0x667   :  { %v2234_v55 = vld [vmem:[#allocation3 + $0x20] sm:$0xff] }
 0x66d   :  { %v8030_v58 = vpop.eup %8029 }
 0x66e   :  { %7256 = vmatmul.mubr.msk.f32.vlgmr.msra.gmra.mxu1 %vm287_vm10, %v8030_v58  ;;  %7267 = vmatmul.mubr.msk.f32.vlgmr.msra.gmra.mxu0 %vm287_vm10, %v8030_v58 }
 0x66f   :  { %7281 = vmatpush3.msra.mxu0 %v8311_v33  ;;  %7270 = vmatpush3.msra.mxu1 %v8363_v49 }
 0x670   :  { %7282 = vmatprep.subr.mxu0 %v8194_v9  ;;  %7271 = vmatprep.subr.mxu1 %v8194_v9 }
 0x671   :  { %7283 = vmatpush3.msra.mxu0 %v8318_v35  ;;  %7272 = vmatpush3.msra.mxu1 %v8365_v50  ;;  %v1328_v35 = vld [vmem:[#allocation2 + $0x30] sm:$0xff] }
 0x672   :  { %7284 = vmatprep.subr.mxu0 %v8194_v9  ;;  %7273 = vmatprep.subr.mxu1 %v8194_v9 }
 0x673   :  { %7285 = vmatpush3.msra.mxu0 %v8323_v36  ;;  %7274 = vmatpush3.msra.mxu1 %v8369_v51 }
 0x674   :  { %7286 = vmatprep.subr.mxu0 %v8194_v9  ;;  %7275 = vmatprep.subr.mxu1 %v8194_v9 }
 0x675   :  { %7287 = vmatpush3.msra.mxu0 %v8333_v37  ;;  %7276 = vmatpush3.msra.mxu1 %v8373_v52 }
 0x676   :  { %7277 = vmatprep.mubr.msk.f32.mxu1 %vm8195_vm9, %v8194_v9  ;;  %7288 = vmatprep.mubr.msk.f32.mxu0 %vm8195_vm9, %v8194_v9 }
 0x677   :  { %7302 = vmatprep.subr.mxu0 %v8194_v9  ;;  %7291 = vmatprep.subr.mxu1 %v8194_v9 }
 0x72e   :  { %v1323_v33 = vpop.f32.mrf.mxu1  ;;  %v1395_v36 = vpop.f32.mrf.mxu0 }
 0x72f   :  { %v1324_v59 = vadd.f32 %v8409_v10, %v1323_v33  ;;  %v1399_v60 = vadd.f32 %v1395_v36, %v1328_v35 }
 0x730   :  { %v7257_v61 = vpop.f32.mrf.mxu1  ;;  %v7268_v37 = vpop.f32.mrf.mxu0 }
 0x731   :  { %1327 = vst.msk [vmem:[#allocation3 + $0x28] sm:$0xff] %vm287_vm10, %v1324_v59  ;;  %8031 = vtanh.f32 %v1399_v60 }
 0x738   :  { %v2381_v60 = vld [vmem:[#allocation3 + $0x28] sm:$0xff] }
 0x73e   :  { %v8032_v63 = vpop.eup %8031 }
 0x73f   :  { %7278 = vmatmul.mubr.msk.f32.vlgmr.msra.gmra.mxu1 %vm287_vm10, %v8032_v63  ;;  %7289 = vmatmul.mubr.msk.f32.vlgmr.msra.gmra.mxu0 %vm287_vm10, %v8032_v63 }
 0x740   :  { %7303 = vmatpush3.msra.mxu0 %v8536_v62  ;;  %7310 = vmatprep.mubr.msk.f32.mxu0 %vm8195_vm9, %v8194_v9 }
 0x741   :  { %7304 = vmatprep.subr.mxu0 %v8194_v9  ;;  %7292 = vmatpush3.msra.mxu1 %v8363_v49 }
 0x742   :  { %7305 = vmatpush3.msra.mxu0 %v8543_v0  ;;  %7293 = vmatprep.subr.mxu1 %v8194_v9 }
 0x743   :  { %7306 = vmatprep.subr.mxu0 %v8194_v9  ;;  %7294 = vmatpush3.msra.mxu1 %v8365_v50  ;;  %v1475_v50 = vld [vmem:[#allocation2 + $0x38] sm:$0xff] }
 0x744   :  { %7307 = vmatpush3.msra.mxu0 %v8552_v1  ;;  %7295 = vmatprep.subr.mxu1 %v8194_v9 }
 0x745   :  { %7308 = vmatprep.subr.mxu0 %v8194_v9  ;;  %7296 = vmatpush3.msra.mxu1 %v8369_v51 }
 0x746   :  { %7309 = vmatpush3.msra.mxu0 %v8561_v2  ;;  %7297 = vmatprep.subr.mxu1 %v8194_v9 }
 0x747   :  { %7311 = vmatmul.mubr.msk.f32.vlgmr.msra.gmra.mxu0 %vm287_vm10, %v6566_v3  ;;  %7298 = vmatpush3.msra.mxu1 %v8373_v52 }
 0x748   :  { %7299 = vmatprep.mubr.msk.f32.mxu1 %vm8195_vm9, %v8194_v9  ;;  %7313 = vmatprep.subr.mxu1 %v8194_v9 }
 0x749   :  { %7324 = vmatprep.subr.mxu0 %v8194_v9  ;;  %7332 = vmatprep.mubr.msk.f32.mxu0 %vm8195_vm9, %v8194_v9 }
 0x74a   :  { %7325 = vmatpush3.msra.mxu0 %v8536_v62 }
 0x74b   :  { %7326 = vmatprep.subr.mxu0 %v8194_v9 }
 0x74c   :  { %7327 = vmatpush3.msra.mxu0 %v8543_v0 }
 0x74d   :  { %7328 = vmatprep.subr.mxu0 %v8194_v9 }
 0x74e   :  { %7329 = vmatpush3.msra.mxu0 %v8552_v1 }
 0x74f   :  { %7330 = vmatprep.subr.mxu0 %v8194_v9 }
 0x750   :  { %7331 = vmatpush3.msra.mxu0 %v8561_v2 }
 0x751   :  { %7346 = vmatprep.subr.mxu0 %v8194_v9 }
 0x7ff   :  { %v1470_v49 = vpop.f32.mrf.mxu1  ;;  %v1542_v51 = vpop.f32.mrf.mxu0 }
 0x800   :  { %v1471_v52 = vadd.f32 %v8409_v10, %v1470_v49  ;;  %v1546_v4 = vadd.f32 %v1542_v51, %v1475_v50 }
 0x801   :  { %v7279_v5 = vpop.f32.mrf.mxu1  ;;  %v7290_v6 = vpop.f32.mrf.mxu0 }
 0x802   :  { %1474 = vst.msk [vmem:[#allocation3 + $0x30] sm:$0xff] %vm287_vm10, %v1471_v52  ;;  %8033 = vtanh.f32 %v1546_v4  ;;  %v8765_v5 = vld [vmem:[%s9491_s4 + $0x58] sm:$0xff] }
 0x807   :  { %v1707_v8 = vpop.f32.mrf.mxu0 }
 0x808   :  { %v1711_v11 = vadd.f32 %v1707_v8, %v1637_v7  ;;  %v8772_v7 = vld [vmem:[%s9491_s4 + $0x50] sm:$0xff]  ;;  %v8781_v8 = vld [vmem:[%s9491_s4 + $0x48] sm:$0xff] }
 0x809   :  { %v7312_v12 = vpop.f32.mrf.mxu0 }
 0x80a   :  { %8035 = vtanh.f32 %v1711_v11  ;;  %v8790_v11 = vld [vmem:[%s9491_s4 + $0x40] sm:$0xff]  ;;  %v6589_v12 = vld [vmem:[%s9488_s1 + $0x10] sm:$0xff] }
 0x80f   :  { %v8034_v14 = vpop.eup %8033 }
 0x810   :  { %1622 = vst.msk [vmem:[%s9496_s9] sm:$0xff] %vm287_vm10, %v8034_v14  ;;  %7300 = vmatmul.mubr.msk.f32.vlgmr.msra.gmra.mxu1 %vm287_vm10, %v8034_v14 }
 0x811   :  { %7314 = vmatpush3.msra.mxu1 %v8591_v13  ;;  %7321 = vmatprep.mubr.msk.f32.mxu1 %vm8195_vm9, %v8194_v9 }
 0x812   :  { %7315 = vmatprep.subr.mxu1 %v8194_v9 }
 0x813   :  { %7316 = vmatpush3.msra.mxu1 %v8598_v15 }
 0x814   :  { %7317 = vmatprep.subr.mxu1 %v8194_v9 }
 0x815   :  { %7318 = vmatpush3.msra.mxu1 %v8604_v16 }
 0x816   :  { %7319 = vmatprep.subr.mxu1 %v8194_v9 }
 0x817   :  { %v8036_v18 = vpop.eup %8035  ;;  %7320 = vmatpush3.msra.mxu1 %v8608_v17 }
 0x818   :  { %7322 = vmatmul.mubr.msk.f32.vlgmr.msra.gmra.mxu1 %vm287_vm10, %v8036_v18  ;;  %7333 = vmatmul.mubr.msk.f32.vlgmr.msra.gmra.mxu0 %vm287_vm10, %v8036_v18 }
 0x819   :  { %7335 = vmatprep.subr.mxu1 %v8194_v9  ;;  %7347 = vmatpush3.msra.mxu0 %v8536_v62 }
 0x81a   :  { %7336 = vmatpush3.msra.mxu1 %v8591_v13  ;;  %7348 = vmatprep.subr.mxu0 %v8194_v9 }
 0x81b   :  { %7337 = vmatprep.subr.mxu1 %v8194_v9  ;;  %7349 = vmatpush3.msra.mxu0 %v8543_v0 }
 0x81c   :  { %7338 = vmatpush3.msra.mxu1 %v8598_v15  ;;  %7350 = vmatprep.subr.mxu0 %v8194_v9 }
 0x81d   :  { %7339 = vmatprep.subr.mxu1 %v8194_v9  ;;  %7351 = vmatpush3.msra.mxu0 %v8552_v1 }
 0x81e   :  { %7340 = vmatpush3.msra.mxu1 %v8604_v16  ;;  %7352 = vmatprep.subr.mxu0 %v8194_v9 }
 0x81f   :  { %7341 = vmatprep.subr.mxu1 %v8194_v9  ;;  %7343 = vmatprep.mubr.msk.f32.mxu1 %vm8195_vm9, %v8194_v9 }
 0x820   :  { %7342 = vmatpush3.msra.mxu1 %v8608_v17  ;;  %7353 = vmatpush3.msra.mxu0 %v8561_v2 }
 0x821   :  { %7354 = vmatprep.mubr.msk.f32.mxu0 %vm8195_vm9, %v8194_v9  ;;  %7357 = vmatprep.subr.mxu1 %v8194_v9 }
 0x822   :  { %7368 = vmatprep.subr.mxu0 %v8194_v9 }
 0x8d0   :  { %v1617_v19 = vpop.f32.mrf.mxu1 }
 0x8d1   :  { %v1618_v20 = vadd.f32 %v8409_v10, %v1617_v19 }
 0x8d2   :  { %v7301_v21 = vpop.f32.mrf.mxu1 }
 0x8d3   :  { %1621 = vst.msk [vmem:[#allocation3 + $0x38] sm:$0xff] %vm287_vm10, %v1618_v20 }
 0x8d8   :  { %v1788_v23 = vpop.f32.mrf.mxu1  ;;  %v1860_v25 = vpop.f32.mrf.mxu0 }
 0x8d9   :  { %v1789_v26 = vadd.f32 %v8638_v22, %v1788_v23  ;;  %v1864_v27 = vadd.f32 %v1860_v25, %v1793_v24  ;;  %v8820_v25 = vld [vmem:[#allocation6 + $0x78] sm:$0xff] }
 0x8da   :  { %v7323_v28 = vpop.f32.mrf.mxu1  ;;  %v7334_v29 = vpop.f32.mrf.mxu0  ;;  %v2675_v14 = vld [vmem:[#allocation3 + $0x38] sm:$0xff] }
 0x8db   :  { %1792 = vst.msk [vmem:[#allocation2] sm:$0xff] %vm287_vm10, %v1789_v26  ;;  %8037 = vtanh.f32 %v1864_v27  ;;  %v8827_v27 = vld [vmem:[#allocation6 + $0x70] sm:$0xff]  ;;  %v8833_v28 = vld [vmem:[#allocation6 + $0x68] sm:$0xff]  ;;  %v8837_v29 = vld [vmem:[#allocation6 + $0x60] sm:$0xff] }
 0x8e2   :  { %v2838_v20 = vld [vmem:[#allocation2] sm:$0xff] }
 0x8e8   :  { %v8038_v30 = vpop.eup %8037 }
 0x8e9   :  { %7344 = vmatmul.mubr.msk.f32.vlgmr.msra.gmra.mxu1 %vm287_vm10, %v8038_v30  ;;  %7355 = vmatmul.mubr.msk.f32.vlgmr.msra.gmra.mxu0 %vm287_vm10, %v8038_v30 }
 0x8ea   :  { %7358 = vmatpush3.msra.mxu1 %v8591_v13  ;;  %7369 = vmatpush3.msra.mxu0 %v8536_v62 }
 0x8eb   :  { %7359 = vmatprep.subr.mxu1 %v8194_v9  ;;  %7370 = vmatprep.subr.mxu0 %v8194_v9 }
 0x8ec   :  { %7360 = vmatpush3.msra.mxu1 %v8598_v15  ;;  %7371 = vmatpush3.msra.mxu0 %v8543_v0 }
 0x8ed   :  { %7361 = vmatprep.subr.mxu1 %v8194_v9  ;;  %7372 = vmatprep.subr.mxu0 %v8194_v9 }
 0x8ee   :  { %7362 = vmatpush3.msra.mxu1 %v8604_v16  ;;  %7373 = vmatpush3.msra.mxu0 %v8552_v1 }
 0x8ef   :  { %7363 = vmatprep.subr.mxu1 %v8194_v9  ;;  %7374 = vmatprep.subr.mxu0 %v8194_v9 }
 0x8f0   :  { %7364 = vmatpush3.msra.mxu1 %v8608_v17  ;;  %7365 = vmatprep.mubr.msk.f32.mxu1 %vm8195_vm9, %v8194_v9 }
 0x8f1   :  { %7375 = vmatpush3.msra.mxu0 %v8561_v2  ;;  %7376 = vmatprep.mubr.msk.f32.mxu0 %vm8195_vm9, %v8194_v9 }
 0x8f2   :  { %7379 = vmatprep.subr.mxu1 %v8194_v9  ;;  %7390 = vmatprep.subr.mxu0 %v8194_v9 }
 0x9a9   :  { %v1935_v10 = vpop.f32.mrf.mxu1  ;;  %v2007_v32 = vpop.f32.mrf.mxu0 }
 0x9aa   :  { %v1936_v34 = vadd.f32 %v8638_v22, %v1935_v10  ;;  %v2011_v38 = vadd.f32 %v2007_v32, %v1940_v31 }
 0x9ab   :  { %v7345_v39 = vpop.f32.mrf.mxu1  ;;  %v7356_v40 = vpop.f32.mrf.mxu0 }
 0x9ac   :  { %1939 = vst.msk [vmem:[#allocation2 + $0x8] sm:$0xff] %vm287_vm10, %v1936_v34  ;;  %8039 = vtanh.f32 %v2011_v38  ;;  %v8867_v34 = vld [vmem:[#allocation8 + $0x3] ss:$0 sm:$0xff] }
 0x9b3   :  { %v2994_v39 = vld [vmem:[#allocation2 + $0x8] sm:$0xff] }
 0x9b9   :  { %v8040_v41 = vpop.eup %8039 }
 0x9ba   :  { %7366 = vmatmul.mubr.msk.f32.vlgmr.msra.gmra.mxu1 %vm287_vm10, %v8040_v41  ;;  %7377 = vmatmul.mubr.msk.f32.vlgmr.msra.gmra.mxu0 %vm287_vm10, %v8040_v41 }
 0x9bb   :  { %7380 = vmatpush3.msra.mxu1 %v8591_v13  ;;  %7391 = vmatpush3.msra.mxu0 %v8536_v62 }
 0x9bc   :  { %7381 = vmatprep.subr.mxu1 %v8194_v9  ;;  %7392 = vmatprep.subr.mxu0 %v8194_v9 }
 0x9bd   :  { %7382 = vmatpush3.msra.mxu1 %v8598_v15  ;;  %7393 = vmatpush3.msra.mxu0 %v8543_v0 }
 0x9be   :  { %7383 = vmatprep.subr.mxu1 %v8194_v9  ;;  %7394 = vmatprep.subr.mxu0 %v8194_v9 }
 0x9bf   :  { %7384 = vmatpush3.msra.mxu1 %v8604_v16  ;;  %7395 = vmatpush3.msra.mxu0 %v8552_v1 }
 0x9c0   :  { %7385 = vmatprep.subr.mxu1 %v8194_v9  ;;  %7396 = vmatprep.subr.mxu0 %v8194_v9 }
 0x9c1   :  { %7386 = vmatpush3.msra.mxu1 %v8608_v17  ;;  %7387 = vmatprep.mubr.msk.f32.mxu1 %vm8195_vm9, %v8194_v9 }
 0x9c2   :  { %7397 = vmatpush3.msra.mxu0 %v8561_v2  ;;  %7398 = vmatprep.mubr.msk.f32.mxu0 %vm8195_vm9, %v8194_v9 }
 0x9c3   :  { %7401 = vmatprep.subr.mxu1 %v8194_v9  ;;  %7412 = vmatprep.subr.mxu0 %v8194_v9 }
 0xa7a   :  { %v2082_v42 = vpop.f32.mrf.mxu1  ;;  %v2154_v44 = vpop.f32.mrf.mxu0 }
 0xa7b   :  { %v2083_v45 = vadd.f32 %v8638_v22, %v2082_v42  ;;  %v2158_v46 = vadd.f32 %v2154_v44, %v2087_v43 }
 0xa7c   :  { %v7367_v47 = vpop.f32.mrf.mxu1  ;;  %v7378_v48 = vpop.f32.mrf.mxu0 }
 0xa7d   :  { %2086 = vst.msk [vmem:[#allocation2 + $0x10] sm:$0xff] %vm287_vm10, %v2083_v45  ;;  %8041 = vtanh.f32 %v2158_v46 }
 0xa84   :  { %v3141_v46 = vld [vmem:[#allocation2 + $0x10] sm:$0xff] }
 0xa8a   :  { %v8042_v53 = vpop.eup %8041 }
 0xa8b   :  { %7388 = vmatmul.mubr.msk.f32.vlgmr.msra.gmra.mxu1 %vm287_vm10, %v8042_v53  ;;  %7399 = vmatmul.mubr.msk.f32.vlgmr.msra.gmra.mxu0 %vm287_vm10, %v8042_v53 }
 0xa8c   :  { %7402 = vmatpush3.msra.mxu1 %v8591_v13  ;;  %7413 = vmatpush3.msra.mxu0 %v8536_v62 }
 0xa8d   :  { %7403 = vmatprep.subr.mxu1 %v8194_v9  ;;  %7414 = vmatprep.subr.mxu0 %v8194_v9 }
 0xa8e   :  { %7404 = vmatpush3.msra.mxu1 %v8598_v15  ;;  %7415 = vmatpush3.msra.mxu0 %v8543_v0 }
 0xa8f   :  { %7405 = vmatprep.subr.mxu1 %v8194_v9  ;;  %7416 = vmatprep.subr.mxu0 %v8194_v9 }
 0xa90   :  { %7406 = vmatpush3.msra.mxu1 %v8604_v16  ;;  %7417 = vmatpush3.msra.mxu0 %v8552_v1 }
 0xa91   :  { %7407 = vmatprep.subr.mxu1 %v8194_v9  ;;  %7418 = vmatprep.subr.mxu0 %v8194_v9 }
 0xa92   :  { %7408 = vmatpush3.msra.mxu1 %v8608_v17  ;;  %7409 = vmatprep.mubr.msk.f32.mxu1 %vm8195_vm9, %v8194_v9 }
 0xa93   :  { %7419 = vmatpush3.msra.mxu0 %v8561_v2  ;;  %7420 = vmatprep.mubr.msk.f32.mxu0 %vm8195_vm9, %v8194_v9 }
 0xa94   :  { %7423 = vmatprep.subr.mxu1 %v8194_v9  ;;  %7434 = vmatprep.subr.mxu0 %v8194_v9 }
 0xb4b   :  { %v2229_v54 = vpop.f32.mrf.mxu1  ;;  %v2301_v56 = vpop.f32.mrf.mxu0 }
 0xb4c   :  { %v2230_v57 = vadd.f32 %v8638_v22, %v2229_v54  ;;  %v2305_v58 = vadd.f32 %v2301_v56, %v2234_v55 }
 0xb4d   :  { %v7389_v33 = vpop.f32.mrf.mxu1  ;;  %v7400_v35 = vpop.f32.mrf.mxu0 }
 0xb4e   :  { %2233 = vst.msk [vmem:[#allocation2 + $0x18] sm:$0xff] %vm287_vm10, %v2230_v57  ;;  %8043 = vtanh.f32 %v2305_v58 }
 0xb55   :  { %v3288_v58 = vld [vmem:[#allocation2 + $0x18] sm:$0xff] }
 0xb5b   :  { %v8044_v36 = vpop.eup %8043 }
 0xb5c   :  { %7410 = vmatmul.mubr.msk.f32.vlgmr.msra.gmra.mxu1 %vm287_vm10, %v8044_v36  ;;  %7421 = vmatmul.mubr.msk.f32.vlgmr.msra.gmra.mxu0 %vm287_vm10, %v8044_v36 }
 0xb5d   :  { %7424 = vmatpush3.msra.mxu1 %v8591_v13  ;;  %7435 = vmatpush3.msra.mxu0 %v8536_v62 }
 0xb5e   :  { %7425 = vmatprep.subr.mxu1 %v8194_v9  ;;  %7436 = vmatprep.subr.mxu0 %v8194_v9 }
 0xb5f   :  { %7426 = vmatpush3.msra.mxu1 %v8598_v15  ;;  %7437 = vmatpush3.msra.mxu0 %v8543_v0 }
 0xb60   :  { %7427 = vmatprep.subr.mxu1 %v8194_v9  ;;  %7438 = vmatprep.subr.mxu0 %v8194_v9 }
 0xb61   :  { %7428 = vmatpush3.msra.mxu1 %v8604_v16  ;;  %7439 = vmatpush3.msra.mxu0 %v8552_v1 }
 0xb62   :  { %7429 = vmatprep.subr.mxu1 %v8194_v9  ;;  %7440 = vmatprep.subr.mxu0 %v8194_v9 }
 0xb63   :  { %7430 = vmatpush3.msra.mxu1 %v8608_v17  ;;  %7431 = vmatprep.mubr.msk.f32.mxu1 %vm8195_vm9, %v8194_v9 }
 0xb64   :  { %7441 = vmatpush3.msra.mxu0 %v8561_v2  ;;  %7442 = vmatprep.mubr.msk.f32.mxu0 %vm8195_vm9, %v8194_v9 }
 0xb65   :  { %7456 = vmatprep.subr.mxu0 %v8194_v9  ;;  %7445 = vmatprep.subr.mxu1 %v8194_v9 }
 0xc1c   :  { %v2376_v59 = vpop.f32.mrf.mxu1  ;;  %v2448_v61 = vpop.f32.mrf.mxu0 }
 0xc1d   :  { %v2377_v37 = vadd.f32 %v8638_v22, %v2376_v59  ;;  %v2452_v63 = vadd.f32 %v2448_v61, %v2381_v60 }
 0xc1e   :  { %v7411_v3 = vpop.f32.mrf.mxu1  ;;  %v7422_v49 = vpop.f32.mrf.mxu0 }
 0xc1f   :  { %2380 = vst.msk [vmem:[#allocation2 + $0x20] sm:$0xff] %vm287_vm10, %v2377_v37  ;;  %8045 = vtanh.f32 %v2452_v63 }
 0xc26   :  { %v3435_v63 = vld [vmem:[#allocation2 + $0x20] sm:$0xff] }
 0xc2c   :  { %v8046_v50 = vpop.eup %8045 }
 0xc2d   :  { %7432 = vmatmul.mubr.msk.f32.vlgmr.msra.gmra.mxu1 %vm287_vm10, %v8046_v50  ;;  %7443 = vmatmul.mubr.msk.f32.vlgmr.msra.gmra.mxu0 %vm287_vm10, %v8046_v50 }
 0xc2e   :  { %7457 = vmatpush3.msra.mxu0 %v8536_v62  ;;  %7446 = vmatpush3.msra.mxu1 %v8591_v13 }
 0xc2f   :  { %7458 = vmatprep.subr.mxu0 %v8194_v9  ;;  %7447 = vmatprep.subr.mxu1 %v8194_v9 }
 0xc30   :  { %7459 = vmatpush3.msra.mxu0 %v8543_v0  ;;  %7448 = vmatpush3.msra.mxu1 %v8598_v15  ;;  %v2528_v0 = vld [vmem:[#allocation3 + $0x30] sm:$0xff] }
 0xc31   :  { %7460 = vmatprep.subr.mxu0 %v8194_v9  ;;  %7449 = vmatprep.subr.mxu1 %v8194_v9 }
 0xc32   :  { %7461 = vmatpush3.msra.mxu0 %v8552_v1  ;;  %7450 = vmatpush3.msra.mxu1 %v8604_v16 }
 0xc33   :  { %7462 = vmatprep.subr.mxu0 %v8194_v9  ;;  %7451 = vmatprep.subr.mxu1 %v8194_v9 }
 0xc34   :  { %7463 = vmatpush3.msra.mxu0 %v8561_v2  ;;  %7452 = vmatpush3.msra.mxu1 %v8608_v17 }
 0xc35   :  { %7453 = vmatprep.mubr.msk.f32.mxu1 %vm8195_vm9, %v8194_v9  ;;  %7464 = vmatprep.mubr.msk.f32.mxu0 %vm8195_vm9, %v8194_v9 }
 0xc36   :  { %7478 = vmatprep.subr.mxu0 %v8194_v9  ;;  %7467 = vmatprep.subr.mxu1 %v8194_v9 }
 0xced   :  { %v2523_v62 = vpop.f32.mrf.mxu1  ;;  %v2595_v1 = vpop.f32.mrf.mxu0 }
 0xcee   :  { %v2524_v51 = vadd.f32 %v8638_v22, %v2523_v62  ;;  %v2599_v52 = vadd.f32 %v2595_v1, %v2528_v0 }
 0xcef   :  { %v7433_v4 = vpop.f32.mrf.mxu1  ;;  %v7444_v2 = vpop.f32.mrf.mxu0 }
 0xcf0   :  { %2527 = vst.msk [vmem:[#allocation2 + $0x28] sm:$0xff] %vm287_vm10, %v2524_v51  ;;  %8047 = vtanh.f32 %v2599_v52 }
 0xcf7   :  { %v3582_v52 = vld [vmem:[#allocation2 + $0x28] sm:$0xff] }
 0xcfd   :  { %v8048_v6 = vpop.eup %8047 }
 0xcfe   :  { %7454 = vmatmul.mubr.msk.f32.vlgmr.msra.gmra.mxu1 %vm287_vm10, %v8048_v6  ;;  %7465 = vmatmul.mubr.msk.f32.vlgmr.msra.gmra.mxu0 %vm287_vm10, %v8048_v6 }
 0xcff   :  { %7479 = vmatpush3.msra.mxu0 %v8765_v5  ;;  %7486 = vmatprep.mubr.msk.f32.mxu0 %vm8195_vm9, %v8194_v9 }
 0xd00   :  { %7480 = vmatprep.subr.mxu0 %v8194_v9  ;;  %7468 = vmatpush3.msra.mxu1 %v8591_v13 }
 0xd01   :  { %7481 = vmatpush3.msra.mxu0 %v8772_v7  ;;  %7469 = vmatprep.subr.mxu1 %v8194_v9 }
 0xd02   :  { %7482 = vmatprep.subr.mxu0 %v8194_v9  ;;  %7470 = vmatpush3.msra.mxu1 %v8598_v15 }
 0xd03   :  { %7483 = vmatpush3.msra.mxu0 %v8781_v8  ;;  %7471 = vmatprep.subr.mxu1 %v8194_v9 }
 0xd04   :  { %7484 = vmatprep.subr.mxu0 %v8194_v9  ;;  %7472 = vmatpush3.msra.mxu1 %v8604_v16 }
 0xd05   :  { %7485 = vmatpush3.msra.mxu0 %v8790_v11  ;;  %7473 = vmatprep.subr.mxu1 %v8194_v9 }
 0xd06   :  { %7487 = vmatmul.mubr.msk.f32.vlgmr.msra.gmra.mxu0 %vm287_vm10, %v6589_v12  ;;  %7474 = vmatpush3.msra.mxu1 %v8608_v17 }
 0xd07   :  { %7475 = vmatprep.mubr.msk.f32.mxu1 %vm8195_vm9, %v8194_v9  ;;  %7489 = vmatprep.subr.mxu1 %v8194_v9 }
 0xd08   :  { %7500 = vmatprep.subr.mxu0 %v8194_v9  ;;  %7508 = vmatprep.mubr.msk.f32.mxu0 %vm8195_vm9, %v8194_v9 }
 0xd09   :  { %7501 = vmatpush3.msra.mxu0 %v8765_v5 }
 0xd0a   :  { %7502 = vmatprep.subr.mxu0 %v8194_v9 }
 0xd0b   :  { %7503 = vmatpush3.msra.mxu0 %v8772_v7 }
 0xd0c   :  { %7504 = vmatprep.subr.mxu0 %v8194_v9 }
 0xd0d   :  { %7505 = vmatpush3.msra.mxu0 %v8781_v8 }
 0xd0e   :  { %7506 = vmatprep.subr.mxu0 %v8194_v9 }
 0xd0f   :  { %7507 = vmatpush3.msra.mxu0 %v8790_v11 }
 0xd10   :  { %7522 = vmatprep.subr.mxu0 %v8194_v9 }
 0xdbe   :  { %v2670_v13 = vpop.f32.mrf.mxu1  ;;  %v2742_v15 = vpop.f32.mrf.mxu0 }
 0xdbf   :  { %v2671_v16 = vadd.f32 %v8638_v22, %v2670_v13  ;;  %v2746_v17 = vadd.f32 %v2742_v15, %v2675_v14 }
 0xdc0   :  { %v7455_v18 = vpop.f32.mrf.mxu1  ;;  %v7466_v19 = vpop.f32.mrf.mxu0 }
 0xdc1   :  { %2674 = vst.msk [vmem:[#allocation2 + $0x30] sm:$0xff] %vm287_vm10, %v2671_v16  ;;  %8049 = vtanh.f32 %v2746_v17  ;;  %v8994_v18 = vld [vmem:[%s9491_s4 + $0x78] sm:$0xff] }
 0xdc6   :  { %v2908_v21 = vpop.f32.mrf.mxu0 }
 0xdc7   :  { %v2912_v23 = vadd.f32 %v2908_v21, %v2838_v20  ;;  %v9001_v20 = vld [vmem:[%s9491_s4 + $0x70] sm:$0xff]  ;;  %v9010_v21 = vld [vmem:[%s9491_s4 + $0x68] sm:$0xff] }
 0xdc8   :  { %v7488_v24 = vpop.f32.mrf.mxu0 }
 0xdc9   :  { %8051 = vtanh.f32 %v2912_v23  ;;  %v9019_v23 = vld [vmem:[%s9491_s4 + $0x60] sm:$0xff]  ;;  %v6612_v24 = vld [vmem:[%s9488_s1 + $0x18] sm:$0xff] }
 0xdce   :  { %v8050_v26 = vpop.eup %8049 }
 0xdcf   :  { %6584 = vst.msk [vmem:[%s9496_s9 + $0x8] sm:$0xff] %vm287_vm10, %v8050_v26  ;;  %7476 = vmatmul.mubr.msk.f32.vlgmr.msra.gmra.mxu1 %vm287_vm10, %v8050_v26 }
 0xdd0   :  { %7490 = vmatpush3.msra.mxu1 %v8820_v25  ;;  %7497 = vmatprep.mubr.msk.f32.mxu1 %vm8195_vm9, %v8194_v9 }
 0xdd1   :  { %7491 = vmatprep.subr.mxu1 %v8194_v9 }
 0xdd2   :  { %7492 = vmatpush3.msra.mxu1 %v8827_v27 }
 0xdd3   :  { %7493 = vmatprep.subr.mxu1 %v8194_v9 }
 0xdd4   :  { %7494 = vmatpush3.msra.mxu1 %v8833_v28 }
 0xdd5   :  { %7495 = vmatprep.subr.mxu1 %v8194_v9 }
 0xdd6   :  { %v8052_v30 = vpop.eup %8051  ;;  %7496 = vmatpush3.msra.mxu1 %v8837_v29 }
 0xdd7   :  { %7498 = vmatmul.mubr.msk.f32.vlgmr.msra.gmra.mxu1 %vm287_vm10, %v8052_v30  ;;  %7509 = vmatmul.mubr.msk.f32.vlgmr.msra.gmra.mxu0 %vm287_vm10, %v8052_v30 }
 0xdd8   :  { %7511 = vmatprep.subr.mxu1 %v8194_v9  ;;  %7523 = vmatpush3.msra.mxu0 %v8765_v5 }
 0xdd9   :  { %7512 = vmatpush3.msra.mxu1 %v8820_v25  ;;  %7524 = vmatprep.subr.mxu0 %v8194_v9 }
 0xdda   :  { %7513 = vmatprep.subr.mxu1 %v8194_v9  ;;  %7525 = vmatpush3.msra.mxu0 %v8772_v7 }
 0xddb   :  { %7514 = vmatpush3.msra.mxu1 %v8827_v27  ;;  %7526 = vmatprep.subr.mxu0 %v8194_v9 }
 0xddc   :  { %7515 = vmatprep.subr.mxu1 %v8194_v9  ;;  %7527 = vmatpush3.msra.mxu0 %v8781_v8 }
 0xddd   :  { %7516 = vmatpush3.msra.mxu1 %v8833_v28  ;;  %7528 = vmatprep.subr.mxu0 %v8194_v9 }
 0xdde   :  { %7517 = vmatprep.subr.mxu1 %v8194_v9  ;;  %7519 = vmatprep.mubr.msk.f32.mxu1 %vm8195_vm9, %v8194_v9 }
 0xddf   :  { %7518 = vmatpush3.msra.mxu1 %v8837_v29  ;;  %7529 = vmatpush3.msra.mxu0 %v8790_v11 }
 0xde0   :  { %7530 = vmatprep.mubr.msk.f32.mxu0 %vm8195_vm9, %v8194_v9  ;;  %7533 = vmatprep.subr.mxu1 %v8194_v9 }
 0xde1   :  { %7544 = vmatprep.subr.mxu0 %v8194_v9 }
 0xe8f   :  { %v2817_v10 = vpop.f32.mrf.mxu1 }
 0xe90   :  { %v2818_v31 = vadd.f32 %v8638_v22, %v2817_v10 }
 0xe91   :  { %v7477_v32 = vpop.f32.mrf.mxu1 }
 0xe92   :  { %2821 = vst.msk [vmem:[#allocation2 + $0x38] sm:$0xff] %vm287_vm10, %v2818_v31 }
 0xe97   :  { %v2989_v38 = vpop.f32.mrf.mxu1  ;;  %v3061_v40 = vpop.f32.mrf.mxu0 }
 0xe98   :  { %v2990_v41 = vadd.f32 %v8867_v34, %v2989_v38  ;;  %v3065_v42 = vadd.f32 %v3061_v40, %v2994_v39  ;;  %v9049_v40 = vld [vmem:[#allocation6 + $0x98] sm:$0xff] }
 0xe99   :  { %v7499_v43 = vpop.f32.mrf.mxu1  ;;  %v7510_v44 = vpop.f32.mrf.mxu0  ;;  %v3876_v26 = vld [vmem:[#allocation2 + $0x38] sm:$0xff] }
 0xe9a   :  { %2993 = vst.msk [vmem:[#allocation3] sm:$0xff] %vm287_vm10, %v2990_v41  ;;  %8053 = vtanh.f32 %v3065_v42  ;;  %v9056_v42 = vld [vmem:[#allocation6 + $0x90] sm:$0xff]  ;;  %v9062_v43 = vld [vmem:[#allocation6 + $0x88] sm:$0xff]  ;;  %v9066_v44 = vld [vmem:[#allocation6 + $0x80] sm:$0xff] }
 0xea1   :  { %v4039_v31 = vld [vmem:[#allocation3] sm:$0xff] }
 0xea7   :  { %v8054_v45 = vpop.eup %8053 }
 0xea8   :  { %7520 = vmatmul.mubr.msk.f32.vlgmr.msra.gmra.mxu1 %vm287_vm10, %v8054_v45  ;;  %7531 = vmatmul.mubr.msk.f32.vlgmr.msra.gmra.mxu0 %vm287_vm10, %v8054_v45 }
 0xea9   :  { %7534 = vmatpush3.msra.mxu1 %v8820_v25  ;;  %7545 = vmatpush3.msra.mxu0 %v8765_v5 }
 0xeaa   :  { %7535 = vmatprep.subr.mxu1 %v8194_v9  ;;  %7546 = vmatprep.subr.mxu0 %v8194_v9 }
 0xeab   :  { %7536 = vmatpush3.msra.mxu1 %v8827_v27  ;;  %7547 = vmatpush3.msra.mxu0 %v8772_v7 }
 0xeac   :  { %7537 = vmatprep.subr.mxu1 %v8194_v9  ;;  %7548 = vmatprep.subr.mxu0 %v8194_v9 }
 0xead   :  { %7538 = vmatpush3.msra.mxu1 %v8833_v28  ;;  %7549 = vmatpush3.msra.mxu0 %v8781_v8 }
 0xeae   :  { %7539 = vmatprep.subr.mxu1 %v8194_v9  ;;  %7550 = vmatprep.subr.mxu0 %v8194_v9 }
 0xeaf   :  { %7540 = vmatpush3.msra.mxu1 %v8837_v29  ;;  %7541 = vmatprep.mubr.msk.f32.mxu1 %vm8195_vm9, %v8194_v9 }
 0xeb0   :  { %7551 = vmatpush3.msra.mxu0 %v8790_v11  ;;  %7552 = vmatprep.mubr.msk.f32.mxu0 %vm8195_vm9, %v8194_v9 }
 0xeb1   :  { %7555 = vmatprep.subr.mxu1 %v8194_v9  ;;  %7566 = vmatprep.subr.mxu0 %v8194_v9 }
 0xf68   :  { %v3136_v22 = vpop.f32.mrf.mxu1  ;;  %v3208_v47 = vpop.f32.mrf.mxu0 }
 0xf69   :  { %v3137_v48 = vadd.f32 %v8867_v34, %v3136_v22  ;;  %v3212_v53 = vadd.f32 %v3208_v47, %v3141_v46 }
 0xf6a   :  { %v7521_v54 = vpop.f32.mrf.mxu1  ;;  %v7532_v55 = vpop.f32.mrf.mxu0 }
 0xf6b   :  { %3140 = vst.msk [vmem:[#allocation3 + $0x8] sm:$0xff] %vm287_vm10, %v3137_v48  ;;  %8055 = vtanh.f32 %v3212_v53  ;;  %v9096_v48 = vld [vmem:[#allocation8 + $0x4] ss:$0 sm:$0xff] }
 0xf72   :  { %v4195_v54 = vld [vmem:[#allocation3 + $0x8] sm:$0xff] }
 0xf78   :  { %v8056_v56 = vpop.eup %8055 }
 0xf79   :  { %7542 = vmatmul.mubr.msk.f32.vlgmr.msra.gmra.mxu1 %vm287_vm10, %v8056_v56  ;;  %7553 = vmatmul.mubr.msk.f32.vlgmr.msra.gmra.mxu0 %vm287_vm10, %v8056_v56 }
 0xf7a   :  { %7556 = vmatpush3.msra.mxu1 %v8820_v25  ;;  %7567 = vmatpush3.msra.mxu0 %v8765_v5 }
 0xf7b   :  { %7557 = vmatprep.subr.mxu1 %v8194_v9  ;;  %7568 = vmatprep.subr.mxu0 %v8194_v9 }
 0xf7c   :  { %7558 = vmatpush3.msra.mxu1 %v8827_v27  ;;  %7569 = vmatpush3.msra.mxu0 %v8772_v7 }
 0xf7d   :  { %7559 = vmatprep.subr.mxu1 %v8194_v9  ;;  %7570 = vmatprep.subr.mxu0 %v8194_v9 }
 0xf7e   :  { %7560 = vmatpush3.msra.mxu1 %v8833_v28  ;;  %7571 = vmatpush3.msra.mxu0 %v8781_v8 }
 0xf7f   :  { %7561 = vmatprep.subr.mxu1 %v8194_v9  ;;  %7572 = vmatprep.subr.mxu0 %v8194_v9 }
 0xf80   :  { %7562 = vmatpush3.msra.mxu1 %v8837_v29  ;;  %7563 = vmatprep.mubr.msk.f32.mxu1 %vm8195_vm9, %v8194_v9 }
 0xf81   :  { %7573 = vmatpush3.msra.mxu0 %v8790_v11  ;;  %7574 = vmatprep.mubr.msk.f32.mxu0 %vm8195_vm9, %v8194_v9 }
 0xf82   :  { %7577 = vmatprep.subr.mxu1 %v8194_v9  ;;  %7588 = vmatprep.subr.mxu0 %v8194_v9 }
0x1039   :  { %v3283_v57 = vpop.f32.mrf.mxu1  ;;  %v3355_v33 = vpop.f32.mrf.mxu0 }
0x103a   :  { %v3284_v35 = vadd.f32 %v8867_v34, %v3283_v57  ;;  %v3359_v36 = vadd.f32 %v3355_v33, %v3288_v58 }
0x103b   :  { %v7543_v59 = vpop.f32.mrf.mxu1  ;;  %v7554_v60 = vpop.f32.mrf.mxu0 }
0x103c   :  { %3287 = vst.msk [vmem:[#allocation3 + $0x10] sm:$0xff] %vm287_vm10, %v3284_v35  ;;  %8057 = vtanh.f32 %v3359_v36 }
0x1043   :  { %v4342_v36 = vld [vmem:[#allocation3 + $0x10] sm:$0xff] }
0x1049   :  { %v8058_v61 = vpop.eup %8057 }
0x104a   :  { %7564 = vmatmul.mubr.msk.f32.vlgmr.msra.gmra.mxu1 %vm287_vm10, %v8058_v61  ;;  %7575 = vmatmul.mubr.msk.f32.vlgmr.msra.gmra.mxu0 %vm287_vm10, %v8058_v61 }
0x104b   :  { %7578 = vmatpush3.msra.mxu1 %v8820_v25  ;;  %7589 = vmatpush3.msra.mxu0 %v8765_v5 }
0x104c   :  { %7579 = vmatprep.subr.mxu1 %v8194_v9  ;;  %7590 = vmatprep.subr.mxu0 %v8194_v9 }
0x104d   :  { %7580 = vmatpush3.msra.mxu1 %v8827_v27  ;;  %7591 = vmatpush3.msra.mxu0 %v8772_v7 }
0x104e   :  { %7581 = vmatprep.subr.mxu1 %v8194_v9  ;;  %7592 = vmatprep.subr.mxu0 %v8194_v9 }
0x104f   :  { %7582 = vmatpush3.msra.mxu1 %v8833_v28  ;;  %7593 = vmatpush3.msra.mxu0 %v8781_v8 }
0x1050   :  { %7583 = vmatprep.subr.mxu1 %v8194_v9  ;;  %7594 = vmatprep.subr.mxu0 %v8194_v9 }
0x1051   :  { %7584 = vmatpush3.msra.mxu1 %v8837_v29  ;;  %7585 = vmatprep.mubr.msk.f32.mxu1 %vm8195_vm9, %v8194_v9 }
0x1052   :  { %7595 = vmatpush3.msra.mxu0 %v8790_v11  ;;  %7596 = vmatprep.mubr.msk.f32.mxu0 %vm8195_vm9, %v8194_v9 }
0x1053   :  { %7599 = vmatprep.subr.mxu1 %v8194_v9  ;;  %7610 = vmatprep.subr.mxu0 %v8194_v9 }
0x110a   :  { %v3430_v37 = vpop.f32.mrf.mxu1  ;;  %v3502_v3 = vpop.f32.mrf.mxu0 }
0x110b   :  { %v3431_v49 = vadd.f32 %v8867_v34, %v3430_v37  ;;  %v3506_v50 = vadd.f32 %v3502_v3, %v3435_v63 }
0x110c   :  { %v7565_v62 = vpop.f32.mrf.mxu1  ;;  %v7576_v0 = vpop.f32.mrf.mxu0 }
0x110d   :  { %3434 = vst.msk [vmem:[#allocation3 + $0x18] sm:$0xff] %vm287_vm10, %v3431_v49  ;;  %8059 = vtanh.f32 %v3506_v50 }
0x1114   :  { %v4489_v50 = vld [vmem:[#allocation3 + $0x18] sm:$0xff] }
0x111a   :  { %v8060_v1 = vpop.eup %8059 }
0x111b   :  { %7586 = vmatmul.mubr.msk.f32.vlgmr.msra.gmra.mxu1 %vm287_vm10, %v8060_v1  ;;  %7597 = vmatmul.mubr.msk.f32.vlgmr.msra.gmra.mxu0 %vm287_vm10, %v8060_v1 }
0x111c   :  { %7600 = vmatpush3.msra.mxu1 %v8820_v25  ;;  %7611 = vmatpush3.msra.mxu0 %v8765_v5 }
0x111d   :  { %7601 = vmatprep.subr.mxu1 %v8194_v9  ;;  %7612 = vmatprep.subr.mxu0 %v8194_v9 }
0x111e   :  { %7602 = vmatpush3.msra.mxu1 %v8827_v27  ;;  %7613 = vmatpush3.msra.mxu0 %v8772_v7 }
0x111f   :  { %7603 = vmatprep.subr.mxu1 %v8194_v9  ;;  %7614 = vmatprep.subr.mxu0 %v8194_v9 }
0x1120   :  { %7604 = vmatpush3.msra.mxu1 %v8833_v28  ;;  %7615 = vmatpush3.msra.mxu0 %v8781_v8 }
0x1121   :  { %7605 = vmatprep.subr.mxu1 %v8194_v9  ;;  %7616 = vmatprep.subr.mxu0 %v8194_v9 }
0x1122   :  { %7606 = vmatpush3.msra.mxu1 %v8837_v29  ;;  %7607 = vmatprep.mubr.msk.f32.mxu1 %vm8195_vm9, %v8194_v9 }
0x1123   :  { %7617 = vmatpush3.msra.mxu0 %v8790_v11  ;;  %7618 = vmatprep.mubr.msk.f32.mxu0 %vm8195_vm9, %v8194_v9 }
0x1124   :  { %7632 = vmatprep.subr.mxu0 %v8194_v9  ;;  %7621 = vmatprep.subr.mxu1 %v8194_v9 }
0x11db   :  { %v3577_v51 = vpop.f32.mrf.mxu1  ;;  %v3649_v4 = vpop.f32.mrf.mxu0 }
0x11dc   :  { %v3578_v2 = vadd.f32 %v8867_v34, %v3577_v51  ;;  %v3653_v6 = vadd.f32 %v3649_v4, %v3582_v52 }
0x11dd   :  { %v7587_v12 = vpop.f32.mrf.mxu1  ;;  %v7598_v13 = vpop.f32.mrf.mxu0 }
0x11de   :  { %3581 = vst.msk [vmem:[#allocation3 + $0x20] sm:$0xff] %vm287_vm10, %v3578_v2  ;;  %8061 = vtanh.f32 %v3653_v6 }
0x11e5   :  { %v4636_v6 = vld [vmem:[#allocation3 + $0x20] sm:$0xff] }
0x11eb   :  { %v8062_v14 = vpop.eup %8061 }
0x11ec   :  { %7608 = vmatmul.mubr.msk.f32.vlgmr.msra.gmra.mxu1 %vm287_vm10, %v8062_v14  ;;  %7619 = vmatmul.mubr.msk.f32.vlgmr.msra.gmra.mxu0 %vm287_vm10, %v8062_v14 }
0x11ed   :  { %7633 = vmatpush3.msra.mxu0 %v8765_v5  ;;  %7622 = vmatpush3.msra.mxu1 %v8820_v25 }
0x11ee   :  { %7634 = vmatprep.subr.mxu0 %v8194_v9  ;;  %7623 = vmatprep.subr.mxu1 %v8194_v9 }
0x11ef   :  { %7635 = vmatpush3.msra.mxu0 %v8772_v7  ;;  %7624 = vmatpush3.msra.mxu1 %v8827_v27  ;;  %v3729_v7 = vld [vmem:[#allocation2 + $0x30] sm:$0xff] }
0x11f0   :  { %7636 = vmatprep.subr.mxu0 %v8194_v9  ;;  %7625 = vmatprep.subr.mxu1 %v8194_v9 }
0x11f1   :  { %7637 = vmatpush3.msra.mxu0 %v8781_v8  ;;  %7626 = vmatpush3.msra.mxu1 %v8833_v28 }
0x11f2   :  { %7638 = vmatprep.subr.mxu0 %v8194_v9  ;;  %7627 = vmatprep.subr.mxu1 %v8194_v9 }
0x11f3   :  { %7639 = vmatpush3.msra.mxu0 %v8790_v11  ;;  %7628 = vmatpush3.msra.mxu1 %v8837_v29 }
0x11f4   :  { %7629 = vmatprep.mubr.msk.f32.mxu1 %vm8195_vm9, %v8194_v9  ;;  %7640 = vmatprep.mubr.msk.f32.mxu0 %vm8195_vm9, %v8194_v9 }
0x11f5   :  { %7654 = vmatprep.subr.mxu0 %v8194_v9  ;;  %7643 = vmatprep.subr.mxu1 %v8194_v9 }
0x12ac   :  { %v3724_v5 = vpop.f32.mrf.mxu1  ;;  %v3796_v8 = vpop.f32.mrf.mxu0 }
0x12ad   :  { %v3725_v15 = vadd.f32 %v8867_v34, %v3724_v5  ;;  %v3800_v16 = vadd.f32 %v3796_v8, %v3729_v7 }
0x12ae   :  { %v7609_v17 = vpop.f32.mrf.mxu1  ;;  %v7620_v11 = vpop.f32.mrf.mxu0 }
0x12af   :  { %3728 = vst.msk [vmem:[#allocation3 + $0x28] sm:$0xff] %vm287_vm10, %v3725_v15  ;;  %8063 = vtanh.f32 %v3800_v16 }
0x12b6   :  { %v4783_v16 = vld [vmem:[#allocation3 + $0x28] sm:$0xff] }
0x12bc   :  { %v8064_v19 = vpop.eup %8063 }
0x12bd   :  { %7630 = vmatmul.mubr.msk.f32.vlgmr.msra.gmra.mxu1 %vm287_vm10, %v8064_v19  ;;  %7641 = vmatmul.mubr.msk.f32.vlgmr.msra.gmra.mxu0 %vm287_vm10, %v8064_v19 }
0x12be   :  { %7655 = vmatpush3.msra.mxu0 %v8994_v18  ;;  %7662 = vmatprep.mubr.msk.f32.mxu0 %vm8195_vm9, %v8194_v9 }
0x12bf   :  { %7656 = vmatprep.subr.mxu0 %v8194_v9  ;;  %7644 = vmatpush3.msra.mxu1 %v8820_v25 }
0x12c0   :  { %7657 = vmatpush3.msra.mxu0 %v9001_v20  ;;  %7645 = vmatprep.subr.mxu1 %v8194_v9 }
0x12c1   :  { %7658 = vmatprep.subr.mxu0 %v8194_v9  ;;  %7646 = vmatpush3.msra.mxu1 %v8827_v27 }
0x12c2   :  { %7659 = vmatpush3.msra.mxu0 %v9010_v21  ;;  %7647 = vmatprep.subr.mxu1 %v8194_v9 }
0x12c3   :  { %7660 = vmatprep.subr.mxu0 %v8194_v9  ;;  %7648 = vmatpush3.msra.mxu1 %v8833_v28 }
0x12c4   :  { %7661 = vmatpush3.msra.mxu0 %v9019_v23  ;;  %7649 = vmatprep.subr.mxu1 %v8194_v9 }
0x12c5   :  { %7663 = vmatmul.mubr.msk.f32.vlgmr.msra.gmra.mxu0 %vm287_vm10, %v6612_v24  ;;  %7650 = vmatpush3.msra.mxu1 %v8837_v29 }
0x12c6   :  { %7651 = vmatprep.mubr.msk.f32.mxu1 %vm8195_vm9, %v8194_v9  ;;  %7665 = vmatprep.subr.mxu1 %v8194_v9 }
0x12c7   :  { %7676 = vmatprep.subr.mxu0 %v8194_v9  ;;  %7684 = vmatprep.mubr.msk.f32.mxu0 %vm8195_vm9, %v8194_v9 }
0x12c8   :  { %7677 = vmatpush3.msra.mxu0 %v8994_v18 }
0x12c9   :  { %7678 = vmatprep.subr.mxu0 %v8194_v9 }
0x12ca   :  { %7679 = vmatpush3.msra.mxu0 %v9001_v20 }
0x12cb   :  { %7680 = vmatprep.subr.mxu0 %v8194_v9 }
0x12cc   :  { %7681 = vmatpush3.msra.mxu0 %v9010_v21 }
0x12cd   :  { %7682 = vmatprep.subr.mxu0 %v8194_v9 }
0x12ce   :  { %7683 = vmatpush3.msra.mxu0 %v9019_v23 }
0x12cf   :  { %7698 = vmatprep.subr.mxu0 %v8194_v9 }
0x137d   :  { %v3871_v25 = vpop.f32.mrf.mxu1  ;;  %v3943_v27 = vpop.f32.mrf.mxu0 }
0x137e   :  { %v3872_v28 = vadd.f32 %v8867_v34, %v3871_v25  ;;  %v3947_v29 = vadd.f32 %v3943_v27, %v3876_v26 }
0x137f   :  { %v7631_v30 = vpop.f32.mrf.mxu1  ;;  %v7642_v10 = vpop.f32.mrf.mxu0 }
0x1380   :  { %3875 = vst.msk [vmem:[#allocation3 + $0x30] sm:$0xff] %vm287_vm10, %v3872_v28  ;;  %8065 = vtanh.f32 %v3947_v29  ;;  %v9223_v30 = vld [vmem:[%s9491_s4 + $0x98] sm:$0xff] }
0x1385   :  { %v4109_v32 = vpop.f32.mrf.mxu0 }
0x1386   :  { %v4113_v38 = vadd.f32 %v4109_v32, %v4039_v31  ;;  %v9230_v31 = vld [vmem:[%s9491_s4 + $0x90] sm:$0xff]  ;;  %v9239_v32 = vld [vmem:[%s9491_s4 + $0x88] sm:$0xff] }
0x1387   :  { %v7664_v39 = vpop.f32.mrf.mxu0 }
0x1388   :  { %8067 = vtanh.f32 %v4113_v38  ;;  %v9248_v38 = vld [vmem:[%s9491_s4 + $0x80] sm:$0xff] }
0x1389   :  { %v6635_v39 = vld [vmem:[%s9488_s1 + $0x20] sm:$0xff] }
0x138d   :  { %v8066_v41 = vpop.eup %8065 }
0x138e   :  { %6607 = vst.msk [vmem:[%s9496_s9 + $0x10] sm:$0xff] %vm287_vm10, %v8066_v41  ;;  %7652 = vmatmul.mubr.msk.f32.vlgmr.msra.gmra.mxu1 %vm287_vm10, %v8066_v41 }
0x138f   :  { %7666 = vmatpush3.msra.mxu1 %v9049_v40  ;;  %7673 = vmatprep.mubr.msk.f32.mxu1 %vm8195_vm9, %v8194_v9 }
0x1390   :  { %7667 = vmatprep.subr.mxu1 %v8194_v9 }
0x1391   :  { %7668 = vmatpush3.msra.mxu1 %v9056_v42 }
0x1392   :  { %7669 = vmatprep.subr.mxu1 %v8194_v9 }
0x1393   :  { %7670 = vmatpush3.msra.mxu1 %v9062_v43 }
0x1394   :  { %7671 = vmatprep.subr.mxu1 %v8194_v9 }
0x1395   :  { %v8068_v45 = vpop.eup %8067  ;;  %7672 = vmatpush3.msra.mxu1 %v9066_v44 }
0x1396   :  { %7674 = vmatmul.mubr.msk.f32.vlgmr.msra.gmra.mxu1 %vm287_vm10, %v8068_v45  ;;  %7685 = vmatmul.mubr.msk.f32.vlgmr.msra.gmra.mxu0 %vm287_vm10, %v8068_v45 }
0x1397   :  { %7687 = vmatprep.subr.mxu1 %v8194_v9  ;;  %7699 = vmatpush3.msra.mxu0 %v8994_v18 }
0x1398   :  { %7688 = vmatpush3.msra.mxu1 %v9049_v40  ;;  %7700 = vmatprep.subr.mxu0 %v8194_v9 }
0x1399   :  { %7689 = vmatprep.subr.mxu1 %v8194_v9  ;;  %7701 = vmatpush3.msra.mxu0 %v9001_v20 }
0x139a   :  { %7690 = vmatpush3.msra.mxu1 %v9056_v42  ;;  %7702 = vmatprep.subr.mxu0 %v8194_v9 }
0x139b   :  { %7691 = vmatprep.subr.mxu1 %v8194_v9  ;;  %7703 = vmatpush3.msra.mxu0 %v9010_v21 }
0x139c   :  { %7692 = vmatpush3.msra.mxu1 %v9062_v43  ;;  %7704 = vmatprep.subr.mxu0 %v8194_v9 }
0x139d   :  { %7693 = vmatprep.subr.mxu1 %v8194_v9  ;;  %7695 = vmatprep.mubr.msk.f32.mxu1 %vm8195_vm9, %v8194_v9 }
0x139e   :  { %7694 = vmatpush3.msra.mxu1 %v9066_v44  ;;  %7705 = vmatpush3.msra.mxu0 %v9019_v23 }
0x139f   :  { %7706 = vmatprep.mubr.msk.f32.mxu0 %vm8195_vm9, %v8194_v9  ;;  %7709 = vmatprep.subr.mxu1 %v8194_v9 }
0x13a0   :  { %7720 = vmatprep.subr.mxu0 %v8194_v9 }
0x144e   :  { %v4018_v22 = vpop.f32.mrf.mxu1 }
0x144f   :  { %v4019_v46 = vadd.f32 %v8867_v34, %v4018_v22 }
0x1450   :  { %v7653_v47 = vpop.f32.mrf.mxu1 }
0x1451   :  { %4022 = vst.msk [vmem:[#allocation3 + $0x38] sm:$0xff] %vm287_vm10, %v4019_v46 }
0x1456   :  { %v4190_v53 = vpop.f32.mrf.mxu1  ;;  %v4262_v55 = vpop.f32.mrf.mxu0 }
0x1457   :  { %v4191_v56 = vadd.f32 %v9096_v48, %v4190_v53  ;;  %v4266_v57 = vadd.f32 %v4262_v55, %v4195_v54  ;;  %v9278_v55 = vld [vmem:[#allocation9 + $0x18] sm:$0xff] }
0x1458   :  { %v7675_v58 = vpop.f32.mrf.mxu1  ;;  %v7686_v33 = vpop.f32.mrf.mxu0  ;;  %v5077_v41 = vld [vmem:[#allocation3 + $0x38] sm:$0xff] }
0x1459   :  { %4194 = vst.msk [vmem:[#allocation2] sm:$0xff] %vm287_vm10, %v4191_v56  ;;  %8069 = vtanh.f32 %v4266_v57  ;;  %v9285_v57 = vld [vmem:[#allocation9 + $0x10] sm:$0xff]  ;;  %v9291_v58 = vld [vmem:[#allocation9 + $0x8] sm:$0xff]  ;;  %v9295_v33 = vld [vmem:[#allocation9] sm:$0xff] }
0x1460   :  { %v5233_v46 = vld [vmem:[#allocation2] sm:$0xff] }
0x1466   :  { %v8070_v35 = vpop.eup %8069 }
0x1467   :  { %7696 = vmatmul.mubr.msk.f32.vlgmr.msra.gmra.mxu1 %vm287_vm10, %v8070_v35  ;;  %7707 = vmatmul.mubr.msk.f32.vlgmr.msra.gmra.mxu0 %vm287_vm10, %v8070_v35 }
0x1468   :  { %7710 = vmatpush3.msra.mxu1 %v9049_v40  ;;  %7721 = vmatpush3.msra.mxu0 %v8994_v18 }
0x1469   :  { %7711 = vmatprep.subr.mxu1 %v8194_v9  ;;  %7722 = vmatprep.subr.mxu0 %v8194_v9 }
0x146a   :  { %7712 = vmatpush3.msra.mxu1 %v9056_v42  ;;  %7723 = vmatpush3.msra.mxu0 %v9001_v20 }
0x146b   :  { %7713 = vmatprep.subr.mxu1 %v8194_v9  ;;  %7724 = vmatprep.subr.mxu0 %v8194_v9 }
0x146c   :  { %7714 = vmatpush3.msra.mxu1 %v9062_v43  ;;  %7725 = vmatpush3.msra.mxu0 %v9010_v21 }
0x146d   :  { %7715 = vmatprep.subr.mxu1 %v8194_v9  ;;  %7726 = vmatprep.subr.mxu0 %v8194_v9 }
0x146e   :  { %7716 = vmatpush3.msra.mxu1 %v9066_v44  ;;  %7717 = vmatprep.mubr.msk.f32.mxu1 %vm8195_vm9, %v8194_v9 }
0x146f   :  { %7727 = vmatpush3.msra.mxu0 %v9019_v23  ;;  %7728 = vmatprep.mubr.msk.f32.mxu0 %vm8195_vm9, %v8194_v9 }
0x1470   :  { %7731 = vmatprep.subr.mxu1 %v8194_v9  ;;  %7742 = vmatprep.subr.mxu0 %v8194_v9 }
0x1527   :  { %v4337_v34 = vpop.f32.mrf.mxu1  ;;  %v4409_v59 = vpop.f32.mrf.mxu0 }
0x1528   :  { %v4338_v60 = vadd.f32 %v9096_v48, %v4337_v34  ;;  %v4413_v61 = vadd.f32 %v4409_v59, %v4342_v36 }
0x1529   :  { %v7697_v37 = vpop.f32.mrf.mxu1  ;;  %v7708_v63 = vpop.f32.mrf.mxu0 }
0x152a   :  { %4341 = vst.msk [vmem:[#allocation2 + $0x8] sm:$0xff] %vm287_vm10, %v4338_v60  ;;  %8071 = vtanh.f32 %v4413_v61  ;;  %v9328_v60 = vld [vmem:[%s9494_s7] ss:$0 sm:$0xff] }
0x1531   :  { %v5394_v37 = vld [vmem:[#allocation2 + $0x8] sm:$0xff] }
0x1537   :  { %v8072_v3 = vpop.eup %8071 }
0x1538   :  { %7718 = vmatmul.mubr.msk.f32.vlgmr.msra.gmra.mxu1 %vm287_vm10, %v8072_v3  ;;  %7729 = vmatmul.mubr.msk.f32.vlgmr.msra.gmra.mxu0 %vm287_vm10, %v8072_v3 }
0x1539   :  { %7732 = vmatpush3.msra.mxu1 %v9049_v40  ;;  %7743 = vmatpush3.msra.mxu0 %v8994_v18 }
0x153a   :  { %7733 = vmatprep.subr.mxu1 %v8194_v9  ;;  %7744 = vmatprep.subr.mxu0 %v8194_v9 }
0x153b   :  { %7734 = vmatpush3.msra.mxu1 %v9056_v42  ;;  %7745 = vmatpush3.msra.mxu0 %v9001_v20 }
0x153c   :  { %7735 = vmatprep.subr.mxu1 %v8194_v9  ;;  %7746 = vmatprep.subr.mxu0 %v8194_v9 }
0x153d   :  { %7736 = vmatpush3.msra.mxu1 %v9062_v43  ;;  %7747 = vmatpush3.msra.mxu0 %v9010_v21 }
0x153e   :  { %7737 = vmatprep.subr.mxu1 %v8194_v9  ;;  %7748 = vmatprep.subr.mxu0 %v8194_v9 }
0x153f   :  { %7738 = vmatpush3.msra.mxu1 %v9066_v44  ;;  %7739 = vmatprep.mubr.msk.f32.mxu1 %vm8195_vm9, %v8194_v9 }
0x1540   :  { %7749 = vmatpush3.msra.mxu0 %v9019_v23  ;;  %7750 = vmatprep.mubr.msk.f32.mxu0 %vm8195_vm9, %v8194_v9 }
0x1541   :  { %7753 = vmatprep.subr.mxu1 %v8194_v9  ;;  %7764 = vmatprep.subr.mxu0 %v8194_v9 }
0x15f8   :  { %v4484_v49 = vpop.f32.mrf.mxu1  ;;  %v4556_v62 = vpop.f32.mrf.mxu0 }
0x15f9   :  { %v4485_v0 = vadd.f32 %v9096_v48, %v4484_v49  ;;  %v4560_v1 = vadd.f32 %v4556_v62, %v4489_v50 }
0x15fa   :  { %v7719_v51 = vpop.f32.mrf.mxu1  ;;  %v7730_v52 = vpop.f32.mrf.mxu0 }
0x15fb   :  { %4488 = vst.msk [vmem:[#allocation2 + $0x10] sm:$0xff] %vm287_vm10, %v4485_v0  ;;  %8073 = vtanh.f32 %v4560_v1 }
0x1602   :  { %v5553_v1 = vld [vmem:[#allocation2 + $0x10] sm:$0xff] }
0x1608   :  { %v8074_v4 = vpop.eup %8073 }
0x1609   :  { %7740 = vmatmul.mubr.msk.f32.vlgmr.msra.gmra.mxu1 %vm287_vm10, %v8074_v4  ;;  %7751 = vmatmul.mubr.msk.f32.vlgmr.msra.gmra.mxu0 %vm287_vm10, %v8074_v4 }
0x160a   :  { %7754 = vmatpush3.msra.mxu1 %v9049_v40  ;;  %7765 = vmatpush3.msra.mxu0 %v8994_v18 }
0x160b   :  { %7755 = vmatprep.subr.mxu1 %v8194_v9  ;;  %7766 = vmatprep.subr.mxu0 %v8194_v9 }
0x160c   :  { %7756 = vmatpush3.msra.mxu1 %v9056_v42  ;;  %7767 = vmatpush3.msra.mxu0 %v9001_v20 }
0x160d   :  { %7757 = vmatprep.subr.mxu1 %v8194_v9  ;;  %7768 = vmatprep.subr.mxu0 %v8194_v9 }
0x160e   :  { %7758 = vmatpush3.msra.mxu1 %v9062_v43  ;;  %7769 = vmatpush3.msra.mxu0 %v9010_v21 }
0x160f   :  { %7759 = vmatprep.subr.mxu1 %v8194_v9  ;;  %7770 = vmatprep.subr.mxu0 %v8194_v9 }
0x1610   :  { %7760 = vmatpush3.msra.mxu1 %v9066_v44  ;;  %7761 = vmatprep.mubr.msk.f32.mxu1 %vm8195_vm9, %v8194_v9 }
0x1611   :  { %7771 = vmatpush3.msra.mxu0 %v9019_v23  ;;  %7772 = vmatprep.mubr.msk.f32.mxu0 %vm8195_vm9, %v8194_v9 }
0x1612   :  { %7775 = vmatprep.subr.mxu1 %v8194_v9  ;;  %7786 = vmatprep.subr.mxu0 %v8194_v9 }
0x16c9   :  { %v4631_v2 = vpop.f32.mrf.mxu1  ;;  %v4703_v12 = vpop.f32.mrf.mxu0 }
0x16ca   :  { %v4632_v13 = vadd.f32 %v9096_v48, %v4631_v2  ;;  %v4707_v14 = vadd.f32 %v4703_v12, %v4636_v6 }
0x16cb   :  { %v7741_v5 = vpop.f32.mrf.mxu1  ;;  %v7752_v7 = vpop.f32.mrf.mxu0 }
0x16cc   :  { %4635 = vst.msk [vmem:[#allocation2 + $0x18] sm:$0xff] %vm287_vm10, %v4632_v13  ;;  %8075 = vtanh.f32 %v4707_v14 }
0x16d3   :  { %v5712_v14 = vld [vmem:[#allocation2 + $0x18] sm:$0xff] }
0x16d9   :  { %v8076_v8 = vpop.eup %8075 }
0x16da   :  { %7762 = vmatmul.mubr.msk.f32.vlgmr.msra.gmra.mxu1 %vm287_vm10, %v8076_v8  ;;  %7773 = vmatmul.mubr.msk.f32.vlgmr.msra.gmra.mxu0 %vm287_vm10, %v8076_v8 }
0x16db   :  { %7776 = vmatpush3.msra.mxu1 %v9049_v40  ;;  %7787 = vmatpush3.msra.mxu0 %v8994_v18 }
0x16dc   :  { %7777 = vmatprep.subr.mxu1 %v8194_v9  ;;  %7788 = vmatprep.subr.mxu0 %v8194_v9 }
0x16dd   :  { %7778 = vmatpush3.msra.mxu1 %v9056_v42  ;;  %7789 = vmatpush3.msra.mxu0 %v9001_v20 }
0x16de   :  { %7779 = vmatprep.subr.mxu1 %v8194_v9  ;;  %7790 = vmatprep.subr.mxu0 %v8194_v9 }
0x16df   :  { %7780 = vmatpush3.msra.mxu1 %v9062_v43  ;;  %7791 = vmatpush3.msra.mxu0 %v9010_v21 }
0x16e0   :  { %7781 = vmatprep.subr.mxu1 %v8194_v9  ;;  %7792 = vmatprep.subr.mxu0 %v8194_v9 }
0x16e1   :  { %7782 = vmatpush3.msra.mxu1 %v9066_v44  ;;  %7783 = vmatprep.mubr.msk.f32.mxu1 %vm8195_vm9, %v8194_v9 }
0x16e2   :  { %7793 = vmatpush3.msra.mxu0 %v9019_v23  ;;  %7794 = vmatprep.mubr.msk.f32.mxu0 %vm8195_vm9, %v8194_v9 }
0x16e3   :  { %7808 = vmatprep.subr.mxu0 %v8194_v9  ;;  %7797 = vmatprep.subr.mxu1 %v8194_v9 }
0x179a   :  { %v4778_v15 = vpop.f32.mrf.mxu1  ;;  %v4850_v17 = vpop.f32.mrf.mxu0 }
0x179b   :  { %v4779_v11 = vadd.f32 %v9096_v48, %v4778_v15  ;;  %v4854_v19 = vadd.f32 %v4850_v17, %v4783_v16 }
0x179c   :  { %v7763_v24 = vpop.f32.mrf.mxu1  ;;  %v7774_v25 = vpop.f32.mrf.mxu0 }
0x179d   :  { %4782 = vst.msk [vmem:[#allocation2 + $0x20] sm:$0xff] %vm287_vm10, %v4779_v11  ;;  %8077 = vtanh.f32 %v4854_v19 }
0x17a4   :  { %v5871_v19 = vld [vmem:[#allocation2 + $0x20] sm:$0xff] }
0x17aa   :  { %v8078_v26 = vpop.eup %8077 }
0x17ab   :  { %7784 = vmatmul.mubr.msk.f32.vlgmr.msra.gmra.mxu1 %vm287_vm10, %v8078_v26  ;;  %7795 = vmatmul.mubr.msk.f32.vlgmr.msra.gmra.mxu0 %vm287_vm10, %v8078_v26 }
0x17ac   :  { %7809 = vmatpush3.msra.mxu0 %v8994_v18  ;;  %7798 = vmatpush3.msra.mxu1 %v9049_v40 }
0x17ad   :  { %7810 = vmatprep.subr.mxu0 %v8194_v9  ;;  %7799 = vmatprep.subr.mxu1 %v8194_v9 }
0x17ae   :  { %7811 = vmatpush3.msra.mxu0 %v9001_v20  ;;  %7800 = vmatpush3.msra.mxu1 %v9056_v42  ;;  %v4930_v20 = vld [vmem:[#allocation3 + $0x30] sm:$0xff] }
0x17af   :  { %7812 = vmatprep.subr.mxu0 %v8194_v9  ;;  %7801 = vmatprep.subr.mxu1 %v8194_v9 }
0x17b0   :  { %7813 = vmatpush3.msra.mxu0 %v9010_v21  ;;  %7802 = vmatpush3.msra.mxu1 %v9062_v43 }
0x17b1   :  { %7814 = vmatprep.subr.mxu0 %v8194_v9  ;;  %7803 = vmatprep.subr.mxu1 %v8194_v9 }
0x17b2   :  { %7815 = vmatpush3.msra.mxu0 %v9019_v23  ;;  %7804 = vmatpush3.msra.mxu1 %v9066_v44 }
0x17b3   :  { %7805 = vmatprep.mubr.msk.f32.mxu1 %vm8195_vm9, %v8194_v9  ;;  %7816 = vmatprep.mubr.msk.f32.mxu0 %vm8195_vm9, %v8194_v9 }
0x17b4   :  { %7830 = vmatprep.subr.mxu0 %v8194_v9  ;;  %7819 = vmatprep.subr.mxu1 %v8194_v9 }
0x186b   :  { %v4925_v18 = vpop.f32.mrf.mxu1  ;;  %v4997_v21 = vpop.f32.mrf.mxu0 }
0x186c   :  { %v4926_v27 = vadd.f32 %v9096_v48, %v4925_v18  ;;  %v5001_v28 = vadd.f32 %v4997_v21, %v4930_v20 }
0x186d   :  { %v7785_v29 = vpop.f32.mrf.mxu1  ;;  %v7796_v23 = vpop.f32.mrf.mxu0 }
0x186e   :  { %4929 = vst.msk [vmem:[#allocation2 + $0x28] sm:$0xff] %vm287_vm10, %v4926_v27  ;;  %8079 = vtanh.f32 %v5001_v28 }
0x1875   :  { %v6030_v28 = vld [vmem:[#allocation2 + $0x28] sm:$0xff] }
0x187b   :  { %v8080_v10 = vpop.eup %8079 }
0x187c   :  { %7806 = vmatmul.mubr.msk.f32.vlgmr.msra.gmra.mxu1 %vm287_vm10, %v8080_v10  ;;  %7817 = vmatmul.mubr.msk.f32.vlgmr.msra.gmra.mxu0 %vm287_vm10, %v8080_v10 }
0x187d   :  { %7831 = vmatpush3.msra.mxu0 %v9223_v30  ;;  %7838 = vmatprep.mubr.msk.f32.mxu0 %vm8195_vm9, %v8194_v9 }
0x187e   :  { %7832 = vmatprep.subr.mxu0 %v8194_v9  ;;  %7820 = vmatpush3.msra.mxu1 %v9049_v40 }
0x187f   :  { %7833 = vmatpush3.msra.mxu0 %v9230_v31  ;;  %7821 = vmatprep.subr.mxu1 %v8194_v9 }
0x1880   :  { %7834 = vmatprep.subr.mxu0 %v8194_v9  ;;  %7822 = vmatpush3.msra.mxu1 %v9056_v42 }
0x1881   :  { %7835 = vmatpush3.msra.mxu0 %v9239_v32  ;;  %7823 = vmatprep.subr.mxu1 %v8194_v9 }
0x1882   :  { %7836 = vmatprep.subr.mxu0 %v8194_v9  ;;  %7824 = vmatpush3.msra.mxu1 %v9062_v43 }
0x1883   :  { %7837 = vmatpush3.msra.mxu0 %v9248_v38  ;;  %7825 = vmatprep.subr.mxu1 %v8194_v9 }
0x1884   :  { %7839 = vmatmul.mubr.msk.f32.vlgmr.msra.gmra.mxu0 %vm287_vm10, %v6635_v39  ;;  %7826 = vmatpush3.msra.mxu1 %v9066_v44 }
0x1885   :  { %7827 = vmatprep.mubr.msk.f32.mxu1 %vm8195_vm9, %v8194_v9  ;;  %7841 = vmatprep.subr.mxu1 %v8194_v9 }
0x1886   :  { %7852 = vmatprep.subr.mxu0 %v8194_v9  ;;  %7860 = vmatprep.mubr.msk.f32.mxu0 %vm8195_vm9, %v8194_v9 }
0x1887   :  { %7853 = vmatpush3.msra.mxu0 %v9223_v30 }
0x1888   :  { %7854 = vmatprep.subr.mxu0 %v8194_v9 }
0x1889   :  { %7855 = vmatpush3.msra.mxu0 %v9230_v31 }
0x188a   :  { %7856 = vmatprep.subr.mxu0 %v8194_v9 }
0x188b   :  { %7857 = vmatpush3.msra.mxu0 %v9239_v32 }
0x188c   :  { %7858 = vmatprep.subr.mxu0 %v8194_v9 }
0x188d   :  { %7859 = vmatpush3.msra.mxu0 %v9248_v38 }
0x188e   :  { %7874 = vmatprep.subr.mxu0 %v8194_v9 }
0x193c   :  { %v5072_v40 = vpop.f32.mrf.mxu1  ;;  %v5144_v42 = vpop.f32.mrf.mxu0 }
0x193d   :  { %v5073_v43 = vadd.f32 %v9096_v48, %v5072_v40  ;;  %v5148_v44 = vadd.f32 %v5144_v42, %v5077_v41 }
0x193e   :  { %v7807_v45 = vpop.f32.mrf.mxu1  ;;  %v7818_v22 = vpop.f32.mrf.mxu0 }
0x193f   :  { %5076 = vst.msk [vmem:[#allocation2 + $0x30] sm:$0xff] %vm287_vm10, %v5073_v43  ;;  %8081 = vtanh.f32 %v5148_v44 }
0x1944   :  { %v5303_v47 = vpop.f32.mrf.mxu0 }
0x1945   :  { %v5307_v53 = vadd.f32 %v5303_v47, %v5233_v46 }
0x1946   :  { %v7840_v54 = vpop.f32.mrf.mxu0 }
0x1947   :  { %8083 = vtanh.f32 %v5307_v53 }
0x194c   :  { %v8082_v56 = vpop.eup %8081 }
0x194d   :  { %6630 = vst.msk [vmem:[%s9496_s9 + $0x18] sm:$0xff] %vm287_vm10, %v8082_v56  ;;  %7828 = vmatmul.mubr.msk.f32.vlgmr.msra.gmra.mxu1 %vm287_vm10, %v8082_v56 }
0x194e   :  { %7842 = vmatpush3.msra.mxu1 %v9278_v55  ;;  %7849 = vmatprep.mubr.msk.f32.mxu1 %vm8195_vm9, %v8194_v9 }
0x194f   :  { %7843 = vmatprep.subr.mxu1 %v8194_v9 }
0x1950   :  { %7844 = vmatpush3.msra.mxu1 %v9285_v57 }
0x1951   :  { %7845 = vmatprep.subr.mxu1 %v8194_v9 }
0x1952   :  { %7846 = vmatpush3.msra.mxu1 %v9291_v58 }
0x1953   :  { %7847 = vmatprep.subr.mxu1 %v8194_v9 }
0x1954   :  { %v8084_v35 = vpop.eup %8083  ;;  %7848 = vmatpush3.msra.mxu1 %v9295_v33 }
0x1955   :  { %7850 = vmatmul.mubr.msk.f32.vlgmr.msra.gmra.mxu1 %vm287_vm10, %v8084_v35  ;;  %7861 = vmatmul.mubr.msk.f32.vlgmr.msra.gmra.mxu0 %vm287_vm10, %v8084_v35 }
0x1956   :  { %7863 = vmatprep.subr.mxu1 %v8194_v9  ;;  %7875 = vmatpush3.msra.mxu0 %v9223_v30 }
0x1957   :  { %7864 = vmatpush3.msra.mxu1 %v9278_v55  ;;  %7876 = vmatprep.subr.mxu0 %v8194_v9 }
0x1958   :  { %7865 = vmatprep.subr.mxu1 %v8194_v9  ;;  %7877 = vmatpush3.msra.mxu0 %v9230_v31 }
0x1959   :  { %7866 = vmatpush3.msra.mxu1 %v9285_v57  ;;  %7878 = vmatprep.subr.mxu0 %v8194_v9 }
0x195a   :  { %7867 = vmatprep.subr.mxu1 %v8194_v9  ;;  %7879 = vmatpush3.msra.mxu0 %v9239_v32 }
0x195b   :  { %7868 = vmatpush3.msra.mxu1 %v9291_v58  ;;  %7880 = vmatprep.subr.mxu0 %v8194_v9 }
0x195c   :  { %7869 = vmatprep.subr.mxu1 %v8194_v9  ;;  %7871 = vmatprep.mubr.msk.f32.mxu1 %vm8195_vm9, %v8194_v9 }
0x195d   :  { %7870 = vmatpush3.msra.mxu1 %v9295_v33  ;;  %7881 = vmatpush3.msra.mxu0 %v9248_v38 }
0x195e   :  { %7882 = vmatprep.mubr.msk.f32.mxu0 %vm8195_vm9, %v8194_v9  ;;  %7885 = vmatprep.subr.mxu1 %v8194_v9 }
0x195f   :  { %7896 = vmatprep.subr.mxu0 %v8194_v9 }
0x1a0d   :  { %v5219_v34 = vpop.f32.mrf.mxu1 }
0x1a0e   :  { %v5220_v36 = vadd.f32 %v9096_v48, %v5219_v34 }
0x1a0f   :  { %v7829_v59 = vpop.f32.mrf.mxu1 }
0x1a10   :  { %5223 = vst.msk [vmem:[#allocation2 + $0x38] sm:$0xff] %vm287_vm10, %v5220_v36 }
0x1a15   :  { %v5389_v61 = vpop.f32.mrf.mxu1  ;;  %v5461_v63 = vpop.f32.mrf.mxu0 }
0x1a16   :  { %v5390_v3 = vadd.f32 %v9328_v60, %v5389_v61  ;;  %v5465_v49 = vadd.f32 %v5461_v63, %v5394_v37 }
0x1a17   :  { %v7851_v50 = vpop.f32.mrf.mxu1  ;;  %v7862_v62 = vpop.f32.mrf.mxu0  ;;  %v6348_v46 = vld [vmem:[#allocation2 + $0x38] sm:$0xff] }
0x1a18   :  { %5393 = vst [vmem:[%s9495_s8] sm:$0xff] %v5390_v3  ;;  %8085 = vtanh.f32 %v5465_v49 }
0x1a25   :  { %v8086_v48 = vpop.eup %8085 }
0x1a26   :  { %7872 = vmatmul.mubr.msk.f32.vlgmr.msra.gmra.mxu1 %vm287_vm10, %v8086_v48  ;;  %7883 = vmatmul.mubr.msk.f32.vlgmr.msra.gmra.mxu0 %vm287_vm10, %v8086_v48 }
0x1a27   :  { %7886 = vmatpush3.msra.mxu1 %v9278_v55  ;;  %7897 = vmatpush3.msra.mxu0 %v9223_v30 }
0x1a28   :  { %7887 = vmatprep.subr.mxu1 %v8194_v9  ;;  %7898 = vmatprep.subr.mxu0 %v8194_v9 }
0x1a29   :  { %7888 = vmatpush3.msra.mxu1 %v9285_v57  ;;  %7899 = vmatpush3.msra.mxu0 %v9230_v31 }
0x1a2a   :  { %7889 = vmatprep.subr.mxu1 %v8194_v9  ;;  %7900 = vmatprep.subr.mxu0 %v8194_v9 }
0x1a2b   :  { %7890 = vmatpush3.msra.mxu1 %v9291_v58  ;;  %7901 = vmatpush3.msra.mxu0 %v9239_v32 }
0x1a2c   :  { %7891 = vmatprep.subr.mxu1 %v8194_v9  ;;  %7902 = vmatprep.subr.mxu0 %v8194_v9 }
0x1a2d   :  { %7892 = vmatpush3.msra.mxu1 %v9295_v33  ;;  %7893 = vmatprep.mubr.msk.f32.mxu1 %vm8195_vm9, %v8194_v9 }
0x1a2e   :  { %7903 = vmatpush3.msra.mxu0 %v9248_v38  ;;  %7904 = vmatprep.mubr.msk.f32.mxu0 %vm8195_vm9, %v8194_v9 }
0x1a2f   :  { %7907 = vmatprep.subr.mxu1 %v8194_v9  ;;  %7918 = vmatprep.subr.mxu0 %v8194_v9 }
0x1ae6   :  { %v5547_v0 = vpop.f32.mrf.mxu1  ;;  %v5620_v51 = vpop.f32.mrf.mxu0 }
0x1ae7   :  { %v5548_v52 = vadd.f32 %v9328_v60, %v5547_v0  ;;  %v5624_v4 = vadd.f32 %v5620_v51, %v5553_v1 }
0x1ae8   :  { %v7873_v2 = vpop.f32.mrf.mxu1  ;;  %v7884_v6 = vpop.f32.mrf.mxu0 }
0x1ae9   :  { %6642 = vst [vmem:[%s9495_s8 + $0x8] sm:$0xff] %v5548_v52  ;;  %8087 = vtanh.f32 %v5624_v4 }
0x1af6   :  { %v8088_v12 = vpop.eup %8087 }
0x1af7   :  { %7894 = vmatmul.mubr.msk.f32.vlgmr.msra.gmra.mxu1 %vm287_vm10, %v8088_v12  ;;  %7905 = vmatmul.mubr.msk.f32.vlgmr.msra.gmra.mxu0 %vm287_vm10, %v8088_v12 }
0x1af8   :  { %7908 = vmatpush3.msra.mxu1 %v9278_v55  ;;  %7919 = vmatpush3.msra.mxu0 %v9223_v30 }
0x1af9   :  { %7909 = vmatprep.subr.mxu1 %v8194_v9  ;;  %7920 = vmatprep.subr.mxu0 %v8194_v9 }
0x1afa   :  { %7910 = vmatpush3.msra.mxu1 %v9285_v57  ;;  %7921 = vmatpush3.msra.mxu0 %v9230_v31 }
0x1afb   :  { %7911 = vmatprep.subr.mxu1 %v8194_v9  ;;  %7922 = vmatprep.subr.mxu0 %v8194_v9 }
0x1afc   :  { %7912 = vmatpush3.msra.mxu1 %v9291_v58  ;;  %7923 = vmatpush3.msra.mxu0 %v9239_v32 }
0x1afd   :  { %7913 = vmatprep.subr.mxu1 %v8194_v9  ;;  %7924 = vmatprep.subr.mxu0 %v8194_v9 }
0x1afe   :  { %7914 = vmatpush3.msra.mxu1 %v9295_v33  ;;  %7915 = vmatprep.mubr.msk.f32.mxu1 %vm8195_vm9, %v8194_v9 }
0x1aff   :  { %7925 = vmatpush3.msra.mxu0 %v9248_v38  ;;  %7926 = vmatprep.mubr.msk.f32.mxu0 %vm8195_vm9, %v8194_v9 }
0x1b00   :  { %7929 = vmatprep.subr.mxu1 %v8194_v9  ;;  %7940 = vmatprep.subr.mxu0 %v8194_v9 }
0x1bb7   :  { %v5706_v13 = vpop.f32.mrf.mxu1  ;;  %v5779_v5 = vpop.f32.mrf.mxu0 }
0x1bb8   :  { %v5707_v7 = vadd.f32 %v9328_v60, %v5706_v13  ;;  %v5783_v8 = vadd.f32 %v5779_v5, %v5712_v14 }
0x1bb9   :  { %v7895_v15 = vpop.f32.mrf.mxu1  ;;  %v7906_v16 = vpop.f32.mrf.mxu0 }
0x1bba   :  { %6646 = vst [vmem:[%s9495_s8 + $0x10] sm:$0xff] %v5707_v7  ;;  %8089 = vtanh.f32 %v5783_v8 }
0x1bc7   :  { %v8090_v17 = vpop.eup %8089 }
0x1bc8   :  { %7916 = vmatmul.mubr.msk.f32.vlgmr.msra.gmra.mxu1 %vm287_vm10, %v8090_v17  ;;  %7927 = vmatmul.mubr.msk.f32.vlgmr.msra.gmra.mxu0 %vm287_vm10, %v8090_v17 }
0x1bc9   :  { %7930 = vmatpush3.msra.mxu1 %v9278_v55  ;;  %7941 = vmatpush3.msra.mxu0 %v9223_v30 }
0x1bca   :  { %7931 = vmatprep.subr.mxu1 %v8194_v9  ;;  %7942 = vmatprep.subr.mxu0 %v8194_v9 }
0x1bcb   :  { %7932 = vmatpush3.msra.mxu1 %v9285_v57  ;;  %7943 = vmatpush3.msra.mxu0 %v9230_v31 }
0x1bcc   :  { %7933 = vmatprep.subr.mxu1 %v8194_v9  ;;  %7944 = vmatprep.subr.mxu0 %v8194_v9 }
0x1bcd   :  { %7934 = vmatpush3.msra.mxu1 %v9291_v58  ;;  %7945 = vmatpush3.msra.mxu0 %v9239_v32 }
0x1bce   :  { %7935 = vmatprep.subr.mxu1 %v8194_v9  ;;  %7946 = vmatprep.subr.mxu0 %v8194_v9 }
0x1bcf   :  { %7936 = vmatpush3.msra.mxu1 %v9295_v33  ;;  %7937 = vmatprep.mubr.msk.f32.mxu1 %vm8195_vm9, %v8194_v9 }
0x1bd0   :  { %7947 = vmatpush3.msra.mxu0 %v9248_v38  ;;  %7948 = vmatprep.mubr.msk.f32.mxu0 %vm8195_vm9, %v8194_v9 }
0x1bd1   :  { %7951 = vmatprep.subr.mxu1 %v8194_v9  ;;  %7962 = vmatprep.subr.mxu0 %v8194_v9 }
0x1c88   :  { %v5865_v11 = vpop.f32.mrf.mxu1  ;;  %v5938_v24 = vpop.f32.mrf.mxu0 }
0x1c89   :  { %v5866_v25 = vadd.f32 %v9328_v60, %v5865_v11  ;;  %v5942_v26 = vadd.f32 %v5938_v24, %v5871_v19 }
0x1c8a   :  { %v7917_v18 = vpop.f32.mrf.mxu1  ;;  %v7928_v20 = vpop.f32.mrf.mxu0 }
0x1c8b   :  { %6650 = vst [vmem:[%s9495_s8 + $0x18] sm:$0xff] %v5866_v25  ;;  %8091 = vtanh.f32 %v5942_v26 }
0x1c98   :  { %v8092_v21 = vpop.eup %8091 }
0x1c99   :  { %7938 = vmatmul.mubr.msk.f32.vlgmr.msra.gmra.mxu1 %vm287_vm10, %v8092_v21  ;;  %7949 = vmatmul.mubr.msk.f32.vlgmr.msra.gmra.mxu0 %vm287_vm10, %v8092_v21 }
0x1c9a   :  { %7952 = vmatpush3.msra.mxu1 %v9278_v55  ;;  %7963 = vmatpush3.msra.mxu0 %v9223_v30 }
0x1c9b   :  { %7953 = vmatprep.subr.mxu1 %v8194_v9  ;;  %7964 = vmatprep.subr.mxu0 %v8194_v9 }
0x1c9c   :  { %7954 = vmatpush3.msra.mxu1 %v9285_v57  ;;  %7965 = vmatpush3.msra.mxu0 %v9230_v31 }
0x1c9d   :  { %7955 = vmatprep.subr.mxu1 %v8194_v9  ;;  %7966 = vmatprep.subr.mxu0 %v8194_v9 }
0x1c9e   :  { %7956 = vmatpush3.msra.mxu1 %v9291_v58  ;;  %7967 = vmatpush3.msra.mxu0 %v9239_v32 }
0x1c9f   :  { %7957 = vmatprep.subr.mxu1 %v8194_v9  ;;  %7968 = vmatprep.subr.mxu0 %v8194_v9 }
0x1ca0   :  { %7958 = vmatpush3.msra.mxu1 %v9295_v33  ;;  %7959 = vmatprep.mubr.msk.f32.mxu1 %vm8195_vm9, %v8194_v9 }
0x1ca1   :  { %7969 = vmatpush3.msra.mxu0 %v9248_v38  ;;  %7970 = vmatprep.mubr.msk.f32.mxu0 %vm8195_vm9, %v8194_v9 }
0x1ca2   :  { %7973 = vmatprep.subr.mxu1 %v8194_v9  ;;  %7984 = vmatprep.subr.mxu0 %v8194_v9 }
0x1d59   :  { %v6024_v27 = vpop.f32.mrf.mxu1  ;;  %v6097_v29 = vpop.f32.mrf.mxu0 }
0x1d5a   :  { %v6025_v23 = vadd.f32 %v9328_v60, %v6024_v27  ;;  %v6101_v10 = vadd.f32 %v6097_v29, %v6030_v28 }
0x1d5b   :  { %v7939_v39 = vpop.f32.mrf.mxu1  ;;  %v7950_v40 = vpop.f32.mrf.mxu0 }
0x1d5c   :  { %6654 = vst [vmem:[%s9495_s8 + $0x20] sm:$0xff] %v6025_v23  ;;  %8093 = vtanh.f32 %v6101_v10 }
0x1d69   :  { %v8094_v41 = vpop.eup %8093 }
0x1d6a   :  { %7960 = vmatmul.mubr.msk.f32.vlgmr.msra.gmra.mxu1 %vm287_vm10, %v8094_v41  ;;  %7971 = vmatmul.mubr.msk.f32.vlgmr.msra.gmra.mxu0 %vm287_vm10, %v8094_v41 }
0x1d6b   :  { %7974 = vmatpush3.msra.mxu1 %v9278_v55  ;;  %7985 = vmatpush3.msra.mxu0 %v9223_v30 }
0x1d6c   :  { %7975 = vmatprep.subr.mxu1 %v8194_v9  ;;  %7986 = vmatprep.subr.mxu0 %v8194_v9 }
0x1d6d   :  { %7976 = vmatpush3.msra.mxu1 %v9285_v57  ;;  %7987 = vmatpush3.msra.mxu0 %v9230_v31  ;;  %v6189_v31 = vld [vmem:[#allocation2 + $0x30] sm:$0xff] }
0x1d6e   :  { %7977 = vmatprep.subr.mxu1 %v8194_v9  ;;  %7988 = vmatprep.subr.mxu0 %v8194_v9 }
0x1d6f   :  { %7978 = vmatpush3.msra.mxu1 %v9291_v58  ;;  %7989 = vmatpush3.msra.mxu0 %v9239_v32 }
0x1d70   :  { %7979 = vmatprep.subr.mxu1 %v8194_v9  ;;  %7990 = vmatprep.subr.mxu0 %v8194_v9 }
0x1d71   :  { %7980 = vmatpush3.msra.mxu1 %v9295_v33  ;;  %7981 = vmatprep.mubr.msk.f32.mxu1 %vm8195_vm9, %v8194_v9 }
0x1d72   :  { %7991 = vmatpush3.msra.mxu0 %v9248_v38  ;;  %7992 = vmatprep.mubr.msk.f32.mxu0 %vm8195_vm9, %v8194_v9 }
0x1d73   :  { %7995 = vmatprep.subr.mxu1 %v8194_v9 }
0x1e2a   :  { %v6183_v30 = vpop.f32.mrf.mxu1  ;;  %v6256_v42 = vpop.f32.mrf.mxu0 }
0x1e2b   :  { %v6184_v32 = vadd.f32 %v9328_v60, %v6183_v30  ;;  %v6260_v43 = vadd.f32 %v6256_v42, %v6189_v31 }
0x1e2c   :  { %v7961_v44 = vpop.f32.mrf.mxu1  ;;  %v7972_v45 = vpop.f32.mrf.mxu0 }
0x1e2d   :  { %6658 = vst [vmem:[%s9495_s8 + $0x28] sm:$0xff] %v6184_v32  ;;  %8095 = vtanh.f32 %v6260_v43 }
0x1e3a   :  { %v8096_v22 = vpop.eup %8095 }
0x1e3b   :  { %7982 = vmatmul.mubr.msk.f32.vlgmr.msra.gmra.mxu1 %vm287_vm10, %v8096_v22  ;;  %7993 = vmatmul.mubr.msk.f32.vlgmr.msra.gmra.mxu0 %vm287_vm10, %v8096_v22 }
0x1e3c   :  { %7996 = vmatpush3.msra.mxu1 %v9278_v55  ;;  %8003 = vmatprep.mubr.msk.f32.mxu1 %vm8195_vm9, %v8194_v9 }
0x1e3d   :  { %7997 = vmatprep.subr.mxu1 %v8194_v9 }
0x1e3e   :  { %7998 = vmatpush3.msra.mxu1 %v9285_v57 }
0x1e3f   :  { %7999 = vmatprep.subr.mxu1 %v8194_v9 }
0x1e40   :  { %8000 = vmatpush3.msra.mxu1 %v9291_v58 }
0x1e41   :  { %8001 = vmatprep.subr.mxu1 %v8194_v9 }
0x1e42   :  { %8002 = vmatpush3.msra.mxu1 %v9295_v33 }
0x1efb   :  { %v6342_v38 = vpop.f32.mrf.mxu1  ;;  %v6415_v47 = vpop.f32.mrf.mxu0 }
0x1efc   :  { %v6343_v53 = vadd.f32 %v9328_v60, %v6342_v38  ;;  %v6419_v54 = vadd.f32 %v6415_v47, %v6348_v46 }
0x1efd   :  { %v7983_v55 = vpop.f32.mrf.mxu1  ;;  %v7994_v56 = vpop.f32.mrf.mxu0 }
0x1efe   :  { %6662 = vst [vmem:[%s9495_s8 + $0x30] sm:$0xff] %v6343_v53  ;;  %8097 = vtanh.f32 %v6419_v54 }
0x1f0b   :  { %v8098_v57 = vpop.eup %8097 }
0x1f0c   :  { %6667 = vst.msk [vmem:[%s9496_s9 + $0x20] sm:$0xff] %vm287_vm10, %v8098_v57  ;;  %8004 = vmatmul.mubr.msk.f32.vlgmr.msra.gmra.mxu1 %vm287_vm10, %v8098_v57 }
0x1fcc   :  { %v6501_v9 = vpop.f32.mrf.mxu1 }
0x1fcd   :  { %v6502_v58 = vadd.f32 %v9328_v60, %v6501_v9 }
0x1fce   :  { %v8005_v33 = vpop.f32.mrf.mxu1 }
0x1fcf   :  { %6666 = vst [vmem:[%s9495_s8 + $0x38] sm:$0xff] %v6502_v58 }
0x1fd0   :  { %6517 = vsyncpa [#allocation5], 1 }
0x1fd1   :  { %6518 = vsyncpa [#allocation7], 1 }
0x1fd2   :  { %6519 = vsyncpa [#allocation10], 1 }

</bundles_post_ra>
